<compile_context>
chip_gen: v5e
topology: v5e:2x2
jax: 0.10.0
libtpu: 0.0.40
codegen_flags: <defaults>
</compile_context>

<pallas_src>
import functools

import jax
import jax.numpy as jnp
from jax.experimental import pallas as pl
from jax.experimental.pallas import tpu as pltpu


# ----------------------------------------------------------------------------
# Pallas kernel
# ----------------------------------------------------------------------------
def _gates_to_hc(g, c, H):
    """torch.nn.LSTMCell gate math; g has gate order [i, f, g, o]."""
    i_g = jax.nn.sigmoid(g[:, 0 * H:1 * H])
    f_g = jax.nn.sigmoid(g[:, 1 * H:2 * H])
    g_g = jnp.tanh(g[:, 2 * H:3 * H])
    o_g = jax.nn.sigmoid(g[:, 3 * H:4 * H])
    c_new = f_g * c + i_g * g_g
    h_new = o_g * jnp.tanh(c_new)
    return h_new, c_new


def _lstm_cell_fused(x, h, c, w_stacked, b, H):
    """Fused gate matmul: [x, h] @ [Wi; Wh] + b."""
    xh = jnp.concatenate([x, h], axis=-1)
    g = jnp.dot(xh, w_stacked, preferred_element_type=jnp.float32) + b
    return _gates_to_hc(g, c, H)


def _lstm_cell_h_only(h, c, wh, b, H):
    """LSTM cell whose input is identically zero -> Wi matmul dropped."""
    g = jnp.dot(h, wh, preferred_element_type=jnp.float32) + b
    return _gates_to_hc(g, c, H)


def fsrnn_kernel(
    # inputs
    emb_ref, state_in_ref,
    w0_ref, b0_ref, ws_ref, bs_ref, w1_ref, b1_ref,
    whr_ref, br_ref, wout_ref, bout_ref,
    # outputs
    logits_ref, state_out_ref,
    # scratch (state carried across the time grid)
    fh_sc, fc_sc, sh_sc, sc_sc,
    *, F_size, S_size, n_rest, keep_h, keep_c, time_block,
):
    tb = pl.program_id(0)
    F, S = F_size, S_size

    @pl.when(tb == 0)
    def _init():
        st = state_in_ref[...]                       # (B, 2F+2S), lane-dense
        fh_sc[...] = st[:, 0:F]
        fc_sc[...] = st[:, F:2 * F]
        sh_sc[...] = st[:, 2 * F:2 * F + S]
        sc_sc[...] = st[:, 2 * F + S:2 * F + 2 * S]

    def zoneout_eval(h_new, c_new, h, c):
        h = h_new * keep_h + (1.0 - keep_h) * h
        c = c_new * keep_c + (1.0 - keep_c) * c
        return h, c

    # Weights are VMEM-resident; load once per grid step (hoisted out of the
    # unrolled time loop so the regalloc keeps them in vregs).
    w0, b0 = w0_ref[...], b0_ref[...]
    ws, bs = ws_ref[...], bs_ref[...]
    w1, b1 = w1_ref[...], b1_ref[...]
    wout, bout = wout_ref[...], bout_ref[...]
    whr = [whr_ref[l] for l in range(n_rest)]
    br = [br_ref[l] for l in range(n_rest)]

    fh = fh_sc[...]
    fc = fc_sc[...]
    sh = sh_sc[...]
    sc = sc_sc[...]

    # Statically unrolled block of timesteps (all indexing is constant-offset).
    for tt in range(time_block):
        x = emb_ref[tt]                              # (B, E) embedded tokens

        # fast cell 0 (input = embedded tokens); d0/d1 dropout = identity
        fh_n, fc_n = _lstm_cell_fused(x, fh, fc, w0, b0, F)
        fh, fc = zoneout_eval(fh_n, fc_n, fh, fc)

        # slow cell (input = fast hidden state)
        sh_n, sc_n = _lstm_cell_fused(fh, sh, sc, ws, bs, S)
        sh, sc = zoneout_eval(sh_n, sc_n, sh, sc)

        # fast cell 1 (input = slow hidden state); d2 dropout = identity
        fh_n, fc_n = _lstm_cell_fused(sh, fh, fc, w1, b1, F)
        fh, fc = zoneout_eval(fh_n, fc_n, fh, fc)

        # remaining fast cells: module input is F_h * 0.0 == 0, so the input
        # matmul is dropped entirely (h @ Wh + b only).
        for l in range(n_rest):
            fh_n, fc_n = _lstm_cell_h_only(fh, fc, whr[l], br[l], F)
            fh, fc = zoneout_eval(fh_n, fc_n, fh, fc)

        # output projection; d3 dropout = identity (eval)
        logits_ref[tt] = (jnp.dot(fh, wout,
                                  preferred_element_type=jnp.float32) + bout)

    # carry state to next grid step
    fh_sc[...] = fh
    fc_sc[...] = fc
    sh_sc[...] = sh
    sc_sc[...] = sc

    # lane-dense packed state written once, at the last step
    @pl.when(tb == pl.num_programs(0) - 1)
    def _final():
        state_out_ref[...] = jnp.concatenate([fh, fc, sh, sc], axis=-1)


# ----------------------------------------------------------------------------
# Wrapper
# ----------------------------------------------------------------------------
def _resident_spec(shape):
    """Whole-array block whose index never changes -> stays VMEM-resident."""
    nd = len(shape)
    return pl.BlockSpec(tuple(shape), lambda *_, _nd=nd: (0,) * _nd)


def _pick_time_block(T, cap=8):
    """Largest divisor of T that is <= cap (static, computed at trace time)."""
    for tb in range(min(T, cap), 0, -1):
        if T % tb == 0:
            return tb
    return 1


@functools.partial(jax.jit, static_argnames=("keep_h", "keep_c"))
def fsrnn_forward_steps(params, state, tokens, *, keep_h, keep_c):
    """Runs T FSRNNLM steps (eval mode), `time_block` steps per grid iteration.

    tokens: (T, B) int32. Returns (new_state, logits of shape (T, B, V)).
    Running with T timesteps is equivalent to calling the module T times.
    """
    emb = params["embed"][tokens].astype(jnp.float32)   # glue: gather (T,B,E)
    T, B, E = emb.shape
    F = params["b0"].shape[1] // 4
    S = params["bs"].shape[1] // 4
    V = params["wout"].shape[1]
    n_rest = params["whr"].shape[0]
    TB = _pick_time_block(T)

    whr, br = params["whr"], params["br"]
    if n_rest == 0:  # never read; keep shapes non-degenerate for the DMA path
        whr = jnp.zeros((1, F, 4 * F), jnp.float32)
        br = jnp.zeros((1, 1, 4 * F), jnp.float32)

    state_packed = jnp.concatenate(
        [state["F_h"], state["F_c"], state["S_h"], state["S_c"]], axis=-1)

    inputs = (
        emb, state_packed,
        params["w0"], params["b0"],
        params["ws"], params["bs"],
        params["w1"], params["b1"],
        whr, br,
        params["wout"], params["bout"],
    )

    in_specs = [
        pl.BlockSpec((TB, B, E), lambda t: (t, 0, 0)),      # time-block tokens
        _resident_spec((B, 2 * F + 2 * S)),                 # packed state in
        _resident_spec(params["w0"].shape),
        _resident_spec(params["b0"].shape),
        _resident_spec(params["ws"].shape),
        _resident_spec(params["bs"].shape),
        _resident_spec(params["w1"].shape),
        _resident_spec(params["b1"].shape),
        _resident_spec(whr.shape),
        _resident_spec(br.shape),
        _resident_spec(params["wout"].shape),
        _resident_spec(params["bout"].shape),
    ]
    out_specs = (
        pl.BlockSpec((TB, B, V), lambda t: (t, 0, 0)),       # logits per block
        _resident_spec((B, 2 * F + 2 * S)),                  # packed state out
    )

    kernel = functools.partial(
        fsrnn_kernel,
        F_size=F, S_size=S, n_rest=n_rest,
        keep_h=float(keep_h), keep_c=float(keep_c),
        time_block=TB,
    )

    logits, state_out = pl.pallas_call(
        kernel,
        out_shape=(
            jax.ShapeDtypeStruct((T, B, V), jnp.float32),
            jax.ShapeDtypeStruct((B, 2 * F + 2 * S), jnp.float32),
        ),
        grid_spec=pltpu.PrefetchScalarGridSpec(
            num_scalar_prefetch=0,
            grid=(T // TB,),
            in_specs=in_specs,
            out_specs=out_specs,
            scratch_shapes=[
                pltpu.VMEM((B, F), jnp.float32),   # F_h carry
                pltpu.VMEM((B, F), jnp.float32),   # F_c carry
                pltpu.VMEM((B, S), jnp.float32),   # S_h carry
                pltpu.VMEM((B, S), jnp.float32),   # S_c carry
            ],
        ),
        compiler_params=pltpu.CompilerParams(
            dimension_semantics=("arbitrary",)),   # time is sequential
        input_output_aliases={1: 1},               # state in -> state out
    )(*inputs)

    new_state = {
        "F_h": state_out[:, 0:F],
        "F_c": state_out[:, F:2 * F],
        "S_h": state_out[:, 2 * F:2 * F + S],
        "S_c": state_out[:, 2 * F + S:2 * F + 2 * S],
    }
    return new_state, logits


# ----------------------------------------------------------------------------
# Pure-JAX reference (un-fused, includes the dead zero-input matmuls),
# looped over timesteps — faithful to the PyTorch module called T times.
# ----------------------------------------------------------------------------
def fsrnn_forward_ref(raw, state, tokens, *, keep_h, keep_c):
    def lstm(x, h, c, wi, wh, b, H):
        g = x @ wi + h @ wh + b
        i = jax.nn.sigmoid(g[:, :H])
        f = jax.nn.sigmoid(g[:, H:2 * H])
        gg = jnp.tanh(g[:, 2 * H:3 * H])
        o = jax.nn.sigmoid(g[:, 3 * H:])
        c_new = f * c + i * gg
        return o * jnp.tanh(c_new), c_new

    def zo(hn, cn, h, c):
        return hn * keep_h + (1 - keep_h) * h, cn * keep_c + (1 - keep_c) * c

    F = raw["wh0"].shape[0]
    fh, fc, sh, sc = state["F_h"], state["F_c"], state["S_h"], state["S_c"]
    logits_all = []
    for t in range(tokens.shape[0]):
        x = raw["embed"][tokens[t]]
        fhn, fcn = lstm(x, fh, fc, raw["wi0"], raw["wh0"], raw["b0"], F)
        fh, fc = zo(fhn, fcn, fh, fc)
        shn, scn = lstm(fh, sh, sc, raw["wis"], raw["whs"], raw["bs"],
                        raw["whs"].shape[0])
        sh, sc = zo(shn, scn, sh, sc)
        fhn, fcn = lstm(sh, fh, fc, raw["wi1"], raw["wh1"], raw["b1"], F)
        fh, fc = zo(fhn, fcn, fh, fc)
        for l in range(raw["whr"].shape[0]):
            fhn, fcn = lstm(fh * 0.0, fh, fc, raw["wir"][l], raw["whr"][l],
                            raw["br"][l], F)
            fh, fc = zo(fhn, fcn, fh, fc)
        logits_all.append(fh @ raw["wout"] + raw["bout"])
    return ({"F_h": fh, "F_c": fc, "S_h": sh, "S_c": sc},
            jnp.stack(logits_all, axis=0))


# ----------------------------------------------------------------------------
# Parameter init (uniform(-0.1, 0.1), like the module) and packing
# ----------------------------------------------------------------------------
def init_raw_params(key, n_vocab, emb_size, fast_layers, F_size, S_size):
    def uni(k, shape):
        return jax.random.uniform(k, shape, jnp.float32, -0.1, 0.1)

    keys = jax.random.split(key, 32)
    n_rest = fast_layers - 2
    return {
        "embed": uni(keys[0], (n_vocab, emb_size)),
        # fast cell 0: LSTMCell(emb_size, F_size)
        "wi0": uni(keys[1], (emb_size, 4 * F_size)),
        "wh0": uni(keys[2], (F_size, 4 * F_size)),
        "b0": uni(keys[3], (1, 4 * F_size)) + uni(keys[4], (1, 4 * F_size)),
        # slow cell: LSTMCell(F_size, S_size)
        "wis": uni(keys[5], (F_size, 4 * S_size)),
        "whs": uni(keys[6], (S_size, 4 * S_size)),
        "bs": uni(keys[7], (1, 4 * S_size)) + uni(keys[8], (1, 4 * S_size)),
        # fast cell 1: LSTMCell(F_size, F_size); input is S_h so requires S==F
        "wi1": uni(keys[9], (S_size, 4 * F_size)),
        "wh1": uni(keys[10], (F_size, 4 * F_size)),
        "b1": uni(keys[11], (1, 4 * F_size)) + uni(keys[12], (1, 4 * F_size)),
        # fast cells 2..L-1 (their inputs are zero vectors)
        "wir": uni(keys[13], (n_rest, F_size, 4 * F_size)),
        "whr": uni(keys[14], (n_rest, F_size, 4 * F_size)),
        "br": uni(keys[15], (n_rest, 1, 4 * F_size))
              + uni(keys[16], (n_rest, 1, 4 * F_size)),
        # output projection
        "wout": uni(keys[17], (F_size, n_vocab)),
        "bout": uni(keys[18], (1, n_vocab)),
    }


def pack_params(raw):
    """Stack [Wi; Wh] per cell; drop wir (its input is identically zero)."""
    return {
        "embed": raw["embed"],
        "w0": jnp.concatenate([raw["wi0"], raw["wh0"]], axis=0),
        "b0": raw["b0"],
        "ws": jnp.concatenate([raw["wis"], raw["whs"]], axis=0),
        "bs": raw["bs"],
        "w1": jnp.concatenate([raw["wi1"], raw["wh1"]], axis=0),
        "b1": raw["b1"],
        "whr": raw["whr"],
        "br": raw["br"],
        "wout": raw["wout"],
        "bout": raw["bout"],
    }


if __name__ == "__main__":
    # Small, MXU/vreg-friendly shapes consistent with the module.
    B = 8
    T = 8
    n_vocab = 128
    emb_size = 32
    fast_layers = 3        # -> one "remaining" fast cell
    F_size = 32
    S_size = 32            # must equal F_size (fast_cells[1] consumes S_h)
    keep_h = 0.9
    keep_c = 0.5

    key = jax.random.PRNGKey(0)
    k_params, k_tokens = jax.random.split(key)
    raw = init_raw_params(k_params, n_vocab, emb_size, fast_layers,
                          F_size, S_size)
    params = pack_params(raw)

    tokens = jax.random.randint(k_tokens, (T, B), 0, n_vocab, dtype=jnp.int32)
    state = {
        "F_h": jnp.zeros((B, F_size), jnp.float32),
        "F_c": jnp.zeros((B, F_size), jnp.float32),
        "S_h": jnp.zeros((B, S_size), jnp.float32),
        "S_c": jnp.zeros((B, S_size), jnp.float32),
    }

    new_state, logits = fsrnn_forward_steps(params, state, tokens,
                                            keep_h=keep_h, keep_c=keep_c)
    jax.block_until_ready(logits)

    # Compare against the un-fused pure-JAX reference of the module math.
    ref_state, ref_logits = fsrnn_forward_ref(raw, state, tokens,
                                              keep_h=keep_h, keep_c=keep_c)
    assert logits.shape == (T, B, n_vocab)
    assert jnp.allclose(logits, ref_logits, atol=1e-4, rtol=1e-4), (
        float(jnp.max(jnp.abs(logits - ref_logits))))
    for k in new_state:
        assert jnp.allclose(new_state[k], ref_state[k], atol=1e-4, rtol=1e-4)

    print("KERNEL_OK")
</pallas_src>

<mosaic_0001>
module attributes {stable_mosaic.version = 11 : i64} {
  func.func @fsrnn_kernel(%arg0: i32, %arg1: memref<8x8x32xf32, #tpu.memory_space<vmem>>, %arg2: memref<8x128xf32, #tpu.memory_space<vmem>>, %arg3: memref<64x128xf32, #tpu.memory_space<vmem>>, %arg4: memref<1x128xf32, #tpu.memory_space<vmem>>, %arg5: memref<64x128xf32, #tpu.memory_space<vmem>>, %arg6: memref<1x128xf32, #tpu.memory_space<vmem>>, %arg7: memref<64x128xf32, #tpu.memory_space<vmem>>, %arg8: memref<1x128xf32, #tpu.memory_space<vmem>>, %arg9: memref<1x32x128xf32, #tpu.memory_space<vmem>>, %arg10: memref<1x1x128xf32, #tpu.memory_space<vmem>>, %arg11: memref<32x128xf32, #tpu.memory_space<vmem>>, %arg12: memref<1x128xf32, #tpu.memory_space<vmem>>, %arg13: memref<8x8x128xf32, #tpu.memory_space<vmem>>, %arg14: memref<8x128xf32, #tpu.memory_space<vmem>>, %arg15: memref<8x32xf32, #tpu.memory_space<vmem>>, %arg16: memref<8x32xf32, #tpu.memory_space<vmem>>, %arg17: memref<8x32xf32, #tpu.memory_space<vmem>>, %arg18: memref<8x32xf32, #tpu.memory_space<vmem>>) attributes {dimension_semantics = [#tpu.dimension_semantics<arbitrary>], iteration_bounds = array<i64: 1>, scalar_prefetch = 0 : i64, scratch_operands = 4 : i64, tpu.core_type = #tpu.core_type<tc>, window_params = [{transform_indices = @transform_0, window_bounds = array<i64: 8, 8, 32>}, {pipeline_mode = #tpu.pipeline_mode<synchronous>, transform_indices = @transform_1, window_bounds = array<i64: 8, 128>}, {pipeline_mode = #tpu.pipeline_mode<synchronous>, transform_indices = @transform_2, window_bounds = array<i64: 64, 128>}, {pipeline_mode = #tpu.pipeline_mode<synchronous>, transform_indices = @transform_3, window_bounds = array<i64: 1, 128>}, {pipeline_mode = #tpu.pipeline_mode<synchronous>, transform_indices = @transform_4, window_bounds = array<i64: 64, 128>}, {pipeline_mode = #tpu.pipeline_mode<synchronous>, transform_indices = @transform_5, window_bounds = array<i64: 1, 128>}, {pipeline_mode = #tpu.pipeline_mode<synchronous>, transform_indices = @transform_6, window_bounds = array<i64: 64, 128>}, {pipeline_mode = #tpu.pipeline_mode<synchronous>, transform_indices = @transform_7, window_bounds = array<i64: 1, 128>}, {pipeline_mode = #tpu.pipeline_mode<synchronous>, transform_indices = @transform_8, window_bounds = array<i64: 1, 32, 128>}, {pipeline_mode = #tpu.pipeline_mode<synchronous>, transform_indices = @transform_9, window_bounds = array<i64: 1, 1, 128>}, {pipeline_mode = #tpu.pipeline_mode<synchronous>, transform_indices = @transform_10, window_bounds = array<i64: 32, 128>}, {pipeline_mode = #tpu.pipeline_mode<synchronous>, transform_indices = @transform_11, window_bounds = array<i64: 1, 128>}, {transform_indices = @transform_12, window_bounds = array<i64: 8, 8, 128>}, {pipeline_mode = #tpu.pipeline_mode<synchronous>, transform_indices = @transform_13, window_bounds = array<i64: 8, 128>}]} {
    %c0_i32 = arith.constant 0 : i32
    %0 = arith.cmpi eq, %arg0, %c0_i32 : i32
    %1 = arith.extui %0 : i1 to i32
    %c0_i32_0 = arith.constant 0 : i32
    %2 = arith.cmpi ne, %1, %c0_i32_0 : i32
    scf.if %2 {
      %c0_344 = arith.constant 0 : index
      %c0_345 = arith.constant 0 : index
      %1330 = vector.load %arg2[%c0_344, %c0_345] : memref<8x128xf32, #tpu.memory_space<vmem>>, vector<8x128xf32>
      %1331 = vector.extract_strided_slice %1330 {offsets = [0, 0], sizes = [8, 32], strides = [1, 1]} : vector<8x128xf32> to vector<8x32xf32>
      %c0_346 = arith.constant 0 : index
      %c0_347 = arith.constant 0 : index
      %1332 = vector.load %arg15[%c0_346, %c0_347] : memref<8x32xf32, #tpu.memory_space<vmem>>, vector<8x32xf32>
      tpu.vector_store %arg15[%c0_346, %c0_347], %1331 {strides = array<i32>} : memref<8x32xf32, #tpu.memory_space<vmem>>, vector<8x32xf32>,
      %1333 = vector.extract_strided_slice %1330 {offsets = [0, 32], sizes = [8, 32], strides = [1, 1]} : vector<8x128xf32> to vector<8x32xf32>
      %c0_348 = arith.constant 0 : index
      %c0_349 = arith.constant 0 : index
      %1334 = vector.load %arg16[%c0_348, %c0_349] : memref<8x32xf32, #tpu.memory_space<vmem>>, vector<8x32xf32>
      tpu.vector_store %arg16[%c0_348, %c0_349], %1333 {strides = array<i32>} : memref<8x32xf32, #tpu.memory_space<vmem>>, vector<8x32xf32>,
      %1335 = vector.extract_strided_slice %1330 {offsets = [0, 64], sizes = [8, 32], strides = [1, 1]} : vector<8x128xf32> to vector<8x32xf32>
      %c0_350 = arith.constant 0 : index
      %c0_351 = arith.constant 0 : index
      %1336 = vector.load %arg17[%c0_350, %c0_351] : memref<8x32xf32, #tpu.memory_space<vmem>>, vector<8x32xf32>
      tpu.vector_store %arg17[%c0_350, %c0_351], %1335 {strides = array<i32>} : memref<8x32xf32, #tpu.memory_space<vmem>>, vector<8x32xf32>,
      %1337 = vector.extract_strided_slice %1330 {offsets = [0, 96], sizes = [8, 32], strides = [1, 1]} : vector<8x128xf32> to vector<8x32xf32>
      %c0_352 = arith.constant 0 : index
      %c0_353 = arith.constant 0 : index
      %1338 = vector.load %arg18[%c0_352, %c0_353] : memref<8x32xf32, #tpu.memory_space<vmem>>, vector<8x32xf32>
      tpu.vector_store %arg18[%c0_352, %c0_353], %1337 {strides = array<i32>} : memref<8x32xf32, #tpu.memory_space<vmem>>, vector<8x32xf32>,
    } else {
    }
    %c0 = arith.constant 0 : index
    %c0_1 = arith.constant 0 : index
    %3 = vector.load %arg3[%c0, %c0_1] : memref<64x128xf32, #tpu.memory_space<vmem>>, vector<64x128xf32>
    %c0_2 = arith.constant 0 : index
    %c0_3 = arith.constant 0 : index
    %4 = vector.load %arg4[%c0_2, %c0_3] : memref<1x128xf32, #tpu.memory_space<vmem>>, vector<1x128xf32>
    %c0_4 = arith.constant 0 : index
    %c0_5 = arith.constant 0 : index
    %5 = vector.load %arg5[%c0_4, %c0_5] : memref<64x128xf32, #tpu.memory_space<vmem>>, vector<64x128xf32>
    %c0_6 = arith.constant 0 : index
    %c0_7 = arith.constant 0 : index
    %6 = vector.load %arg6[%c0_6, %c0_7] : memref<1x128xf32, #tpu.memory_space<vmem>>, vector<1x128xf32>
    %c0_8 = arith.constant 0 : index
    %c0_9 = arith.constant 0 : index
    %7 = vector.load %arg7[%c0_8, %c0_9] : memref<64x128xf32, #tpu.memory_space<vmem>>, vector<64x128xf32>
    %c0_10 = arith.constant 0 : index
    %c0_11 = arith.constant 0 : index
    %8 = vector.load %arg8[%c0_10, %c0_11] : memref<1x128xf32, #tpu.memory_space<vmem>>, vector<1x128xf32>
    %c0_12 = arith.constant 0 : index
    %c0_13 = arith.constant 0 : index
    %9 = vector.load %arg11[%c0_12, %c0_13] : memref<32x128xf32, #tpu.memory_space<vmem>>, vector<32x128xf32>
    %c0_14 = arith.constant 0 : index
    %c0_15 = arith.constant 0 : index
    %10 = vector.load %arg12[%c0_14, %c0_15] : memref<1x128xf32, #tpu.memory_space<vmem>>, vector<1x128xf32>
    %c0_16 = arith.constant 0 : index
    %c0_17 = arith.constant 0 : index
    %c0_18 = arith.constant 0 : index
    %11 = vector.load %arg9[%c0_16, %c0_17, %c0_18] : memref<1x32x128xf32, #tpu.memory_space<vmem>>, vector<1x32x128xf32>
    %12 = vector.shape_cast %11 : vector<1x32x128xf32> to vector<32x128xf32>
    %c0_19 = arith.constant 0 : index
    %c0_20 = arith.constant 0 : index
    %c0_21 = arith.constant 0 : index
    %13 = vector.load %arg10[%c0_19, %c0_20, %c0_21] : memref<1x1x128xf32, #tpu.memory_space<vmem>>, vector<1x1x128xf32>
    %14 = vector.shape_cast %13 : vector<1x1x128xf32> to vector<1x128xf32>
    %c0_22 = arith.constant 0 : index
    %c0_23 = arith.constant 0 : index
    %15 = vector.load %arg15[%c0_22, %c0_23] : memref<8x32xf32, #tpu.memory_space<vmem>>, vector<8x32xf32>
    %c0_24 = arith.constant 0 : index
    %c0_25 = arith.constant 0 : index
    %16 = vector.load %arg16[%c0_24, %c0_25] : memref<8x32xf32, #tpu.memory_space<vmem>>, vector<8x32xf32>
    %c0_26 = arith.constant 0 : index
    %c0_27 = arith.constant 0 : index
    %17 = vector.load %arg17[%c0_26, %c0_27] : memref<8x32xf32, #tpu.memory_space<vmem>>, vector<8x32xf32>
    %c0_28 = arith.constant 0 : index
    %c0_29 = arith.constant 0 : index
    %18 = vector.load %arg18[%c0_28, %c0_29] : memref<8x32xf32, #tpu.memory_space<vmem>>, vector<8x32xf32>
    %c0_30 = arith.constant 0 : index
    %c0_31 = arith.constant 0 : index
    %c0_32 = arith.constant 0 : index
    %19 = vector.load %arg1[%c0_30, %c0_31, %c0_32] : memref<8x8x32xf32, #tpu.memory_space<vmem>>, vector<1x8x32xf32>
    %20 = vector.shape_cast %19 : vector<1x8x32xf32> to vector<8x32xf32>
    %21 = tpu.concatenate %20, %15 in 1 : vector<8x32xf32>, vector<8x32xf32> -> vector<8x64xf32>
    %cst = arith.constant dense<0.000000e+00> : vector<8x128xf32>
    %22 = tpu.matmul %21, %3, %cst {dimension_numbers = #tpu.dot_dimension_numbers<[1], [0], [0], [1], [0, 0, 1, 1], [], []>} : vector<8x64xf32>, vector<64x128xf32>, vector<8x128xf32> -> vector<8x128xf32>
    %23 = vector.broadcast %4 : vector<1x128xf32> to vector<8x128xf32>
    %24 = arith.addf %22, %23 : vector<8x128xf32>
    %25 = vector.extract_strided_slice %24 {offsets = [0, 0], sizes = [8, 32], strides = [1, 1]} : vector<8x128xf32> to vector<8x32xf32>
    %26 = arith.negf %25 : vector<8x32xf32>
    %27 = math.exp %26 : vector<8x32xf32>
    %cst_33 = arith.constant 1.000000e+00 : f32
    %28 = vector.broadcast %cst_33 : f32 to vector<8x32xf32>
    %29 = arith.addf %28, %27 : vector<8x32xf32>
    %30 = arith.divf %28, %29 : vector<8x32xf32>
    %31 = vector.extract_strided_slice %24 {offsets = [0, 32], sizes = [8, 32], strides = [1, 1]} : vector<8x128xf32> to vector<8x32xf32>
    %32 = arith.negf %31 : vector<8x32xf32>
    %33 = math.exp %32 : vector<8x32xf32>
    %cst_34 = arith.constant 1.000000e+00 : f32
    %34 = vector.broadcast %cst_34 : f32 to vector<8x32xf32>
    %35 = arith.addf %34, %33 : vector<8x32xf32>
    %36 = arith.divf %34, %35 : vector<8x32xf32>
    %37 = vector.extract_strided_slice %24 {offsets = [0, 64], sizes = [8, 32], strides = [1, 1]} : vector<8x128xf32> to vector<8x32xf32>
    %38 = math.tanh %37 : vector<8x32xf32>
    %39 = vector.extract_strided_slice %24 {offsets = [0, 96], sizes = [8, 32], strides = [1, 1]} : vector<8x128xf32> to vector<8x32xf32>
    %40 = arith.negf %39 : vector<8x32xf32>
    %41 = math.exp %40 : vector<8x32xf32>
    %cst_35 = arith.constant 1.000000e+00 : f32
    %42 = vector.broadcast %cst_35 : f32 to vector<8x32xf32>
    %43 = arith.addf %42, %41 : vector<8x32xf32>
    %44 = arith.divf %42, %43 : vector<8x32xf32>
    %45 = arith.mulf %36, %16 : vector<8x32xf32>
    %46 = arith.mulf %30, %38 : vector<8x32xf32>
    %47 = arith.addf %45, %46 : vector<8x32xf32>
    %48 = math.tanh %47 : vector<8x32xf32>
    %49 = arith.mulf %44, %48 : vector<8x32xf32>
    %cst_36 = arith.constant 0.899999976 : f32
    %50 = vector.broadcast %cst_36 : f32 to vector<8x32xf32>
    %51 = arith.mulf %49, %50 : vector<8x32xf32>
    %cst_37 = arith.constant 1.000000e-01 : f32
    %52 = vector.broadcast %cst_37 : f32 to vector<8x32xf32>
    %53 = arith.mulf %52, %15 : vector<8x32xf32>
    %54 = arith.addf %51, %53 : vector<8x32xf32>
    %cst_38 = arith.constant 5.000000e-01 : f32
    %55 = vector.broadcast %cst_38 : f32 to vector<8x32xf32>
    %56 = arith.mulf %47, %55 : vector<8x32xf32>
    %cst_39 = arith.constant 5.000000e-01 : f32
    %57 = vector.broadcast %cst_39 : f32 to vector<8x32xf32>
    %58 = arith.mulf %57, %16 : vector<8x32xf32>
    %59 = arith.addf %56, %58 : vector<8x32xf32>
    %60 = tpu.concatenate %54, %17 in 1 : vector<8x32xf32>, vector<8x32xf32> -> vector<8x64xf32>
    %cst_40 = arith.constant dense<0.000000e+00> : vector<8x128xf32>
    %61 = tpu.matmul %60, %5, %cst_40 {dimension_numbers = #tpu.dot_dimension_numbers<[1], [0], [0], [1], [0, 0, 1, 1], [], []>} : vector<8x64xf32>, vector<64x128xf32>, vector<8x128xf32> -> vector<8x128xf32>
    %62 = vector.broadcast %6 : vector<1x128xf32> to vector<8x128xf32>
    %63 = arith.addf %61, %62 : vector<8x128xf32>
    %64 = vector.extract_strided_slice %63 {offsets = [0, 0], sizes = [8, 32], strides = [1, 1]} : vector<8x128xf32> to vector<8x32xf32>
    %65 = arith.negf %64 : vector<8x32xf32>
    %66 = math.exp %65 : vector<8x32xf32>
    %cst_41 = arith.constant 1.000000e+00 : f32
    %67 = vector.broadcast %cst_41 : f32 to vector<8x32xf32>
    %68 = arith.addf %67, %66 : vector<8x32xf32>
    %69 = arith.divf %67, %68 : vector<8x32xf32>
    %70 = vector.extract_strided_slice %63 {offsets = [0, 32], sizes = [8, 32], strides = [1, 1]} : vector<8x128xf32> to vector<8x32xf32>
    %71 = arith.negf %70 : vector<8x32xf32>
    %72 = math.exp %71 : vector<8x32xf32>
    %cst_42 = arith.constant 1.000000e+00 : f32
    %73 = vector.broadcast %cst_42 : f32 to vector<8x32xf32>
    %74 = arith.addf %73, %72 : vector<8x32xf32>
    %75 = arith.divf %73, %74 : vector<8x32xf32>
    %76 = vector.extract_strided_slice %63 {offsets = [0, 64], sizes = [8, 32], strides = [1, 1]} : vector<8x128xf32> to vector<8x32xf32>
    %77 = math.tanh %76 : vector<8x32xf32>
    %78 = vector.extract_strided_slice %63 {offsets = [0, 96], sizes = [8, 32], strides = [1, 1]} : vector<8x128xf32> to vector<8x32xf32>
    %79 = arith.negf %78 : vector<8x32xf32>
    %80 = math.exp %79 : vector<8x32xf32>
    %cst_43 = arith.constant 1.000000e+00 : f32
    %81 = vector.broadcast %cst_43 : f32 to vector<8x32xf32>
    %82 = arith.addf %81, %80 : vector<8x32xf32>
    %83 = arith.divf %81, %82 : vector<8x32xf32>
    %84 = arith.mulf %75, %18 : vector<8x32xf32>
    %85 = arith.mulf %69, %77 : vector<8x32xf32>
    %86 = arith.addf %84, %85 : vector<8x32xf32>
    %87 = math.tanh %86 : vector<8x32xf32>
    %88 = arith.mulf %83, %87 : vector<8x32xf32>
    %cst_44 = arith.constant 0.899999976 : f32
    %89 = vector.broadcast %cst_44 : f32 to vector<8x32xf32>
    %90 = arith.mulf %88, %89 : vector<8x32xf32>
    %cst_45 = arith.constant 1.000000e-01 : f32
    %91 = vector.broadcast %cst_45 : f32 to vector<8x32xf32>
    %92 = arith.mulf %91, %17 : vector<8x32xf32>
    %93 = arith.addf %90, %92 : vector<8x32xf32>
    %cst_46 = arith.constant 5.000000e-01 : f32
    %94 = vector.broadcast %cst_46 : f32 to vector<8x32xf32>
    %95 = arith.mulf %86, %94 : vector<8x32xf32>
    %cst_47 = arith.constant 5.000000e-01 : f32
    %96 = vector.broadcast %cst_47 : f32 to vector<8x32xf32>
    %97 = arith.mulf %96, %18 : vector<8x32xf32>
    %98 = arith.addf %95, %97 : vector<8x32xf32>
    %99 = tpu.concatenate %93, %54 in 1 : vector<8x32xf32>, vector<8x32xf32> -> vector<8x64xf32>
    %cst_48 = arith.constant dense<0.000000e+00> : vector<8x128xf32>
    %100 = tpu.matmul %99, %7, %cst_48 {dimension_numbers = #tpu.dot_dimension_numbers<[1], [0], [0], [1], [0, 0, 1, 1], [], []>} : vector<8x64xf32>, vector<64x128xf32>, vector<8x128xf32> -> vector<8x128xf32>
    %101 = vector.broadcast %8 : vector<1x128xf32> to vector<8x128xf32>
    %102 = arith.addf %100, %101 : vector<8x128xf32>
    %103 = vector.extract_strided_slice %102 {offsets = [0, 0], sizes = [8, 32], strides = [1, 1]} : vector<8x128xf32> to vector<8x32xf32>
    %104 = arith.negf %103 : vector<8x32xf32>
    %105 = math.exp %104 : vector<8x32xf32>
    %cst_49 = arith.constant 1.000000e+00 : f32
    %106 = vector.broadcast %cst_49 : f32 to vector<8x32xf32>
    %107 = arith.addf %106, %105 : vector<8x32xf32>
    %108 = arith.divf %106, %107 : vector<8x32xf32>
    %109 = vector.extract_strided_slice %102 {offsets = [0, 32], sizes = [8, 32], strides = [1, 1]} : vector<8x128xf32> to vector<8x32xf32>
    %110 = arith.negf %109 : vector<8x32xf32>
    %111 = math.exp %110 : vector<8x32xf32>
    %cst_50 = arith.constant 1.000000e+00 : f32
    %112 = vector.broadcast %cst_50 : f32 to vector<8x32xf32>
    %113 = arith.addf %112, %111 : vector<8x32xf32>
    %114 = arith.divf %112, %113 : vector<8x32xf32>
    %115 = vector.extract_strided_slice %102 {offsets = [0, 64], sizes = [8, 32], strides = [1, 1]} : vector<8x128xf32> to vector<8x32xf32>
    %116 = math.tanh %115 : vector<8x32xf32>
    %117 = vector.extract_strided_slice %102 {offsets = [0, 96], sizes = [8, 32], strides = [1, 1]} : vector<8x128xf32> to vector<8x32xf32>
    %118 = arith.negf %117 : vector<8x32xf32>
    %119 = math.exp %118 : vector<8x32xf32>
    %cst_51 = arith.constant 1.000000e+00 : f32
    %120 = vector.broadcast %cst_51 : f32 to vector<8x32xf32>
    %121 = arith.addf %120, %119 : vector<8x32xf32>
    %122 = arith.divf %120, %121 : vector<8x32xf32>
    %123 = arith.mulf %114, %59 : vector<8x32xf32>
    %124 = arith.mulf %108, %116 : vector<8x32xf32>
    %125 = arith.addf %123, %124 : vector<8x32xf32>
    %126 = math.tanh %125 : vector<8x32xf32>
    %127 = arith.mulf %122, %126 : vector<8x32xf32>
    %cst_52 = arith.constant 0.899999976 : f32
    %128 = vector.broadcast %cst_52 : f32 to vector<8x32xf32>
    %129 = arith.mulf %127, %128 : vector<8x32xf32>
    %cst_53 = arith.constant 1.000000e-01 : f32
    %130 = vector.broadcast %cst_53 : f32 to vector<8x32xf32>
    %131 = arith.mulf %130, %54 : vector<8x32xf32>
    %132 = arith.addf %129, %131 : vector<8x32xf32>
    %cst_54 = arith.constant 5.000000e-01 : f32
    %133 = vector.broadcast %cst_54 : f32 to vector<8x32xf32>
    %134 = arith.mulf %125, %133 : vector<8x32xf32>
    %cst_55 = arith.constant 5.000000e-01 : f32
    %135 = vector.broadcast %cst_55 : f32 to vector<8x32xf32>
    %136 = arith.mulf %135, %59 : vector<8x32xf32>
    %137 = arith.addf %134, %136 : vector<8x32xf32>
    %cst_56 = arith.constant dense<0.000000e+00> : vector<8x128xf32>
    %138 = tpu.matmul %132, %12, %cst_56 {dimension_numbers = #tpu.dot_dimension_numbers<[1], [0], [0], [1], [0, 0, 1, 1], [], []>} : vector<8x32xf32>, vector<32x128xf32>, vector<8x128xf32> -> vector<8x128xf32>
    %139 = vector.broadcast %14 : vector<1x128xf32> to vector<8x128xf32>
    %140 = arith.addf %138, %139 : vector<8x128xf32>
    %141 = vector.extract_strided_slice %140 {offsets = [0, 0], sizes = [8, 32], strides = [1, 1]} : vector<8x128xf32> to vector<8x32xf32>
    %142 = arith.negf %141 : vector<8x32xf32>
    %143 = math.exp %142 : vector<8x32xf32>
    %cst_57 = arith.constant 1.000000e+00 : f32
    %144 = vector.broadcast %cst_57 : f32 to vector<8x32xf32>
    %145 = arith.addf %144, %143 : vector<8x32xf32>
    %146 = arith.divf %144, %145 : vector<8x32xf32>
    %147 = vector.extract_strided_slice %140 {offsets = [0, 32], sizes = [8, 32], strides = [1, 1]} : vector<8x128xf32> to vector<8x32xf32>
    %148 = arith.negf %147 : vector<8x32xf32>
    %149 = math.exp %148 : vector<8x32xf32>
    %cst_58 = arith.constant 1.000000e+00 : f32
    %150 = vector.broadcast %cst_58 : f32 to vector<8x32xf32>
    %151 = arith.addf %150, %149 : vector<8x32xf32>
    %152 = arith.divf %150, %151 : vector<8x32xf32>
    %153 = vector.extract_strided_slice %140 {offsets = [0, 64], sizes = [8, 32], strides = [1, 1]} : vector<8x128xf32> to vector<8x32xf32>
    %154 = math.tanh %153 : vector<8x32xf32>
    %155 = vector.extract_strided_slice %140 {offsets = [0, 96], sizes = [8, 32], strides = [1, 1]} : vector<8x128xf32> to vector<8x32xf32>
    %156 = arith.negf %155 : vector<8x32xf32>
    %157 = math.exp %156 : vector<8x32xf32>
    %cst_59 = arith.constant 1.000000e+00 : f32
    %158 = vector.broadcast %cst_59 : f32 to vector<8x32xf32>
    %159 = arith.addf %158, %157 : vector<8x32xf32>
    %160 = arith.divf %158, %159 : vector<8x32xf32>
    %161 = arith.mulf %152, %137 : vector<8x32xf32>
    %162 = arith.mulf %146, %154 : vector<8x32xf32>
    %163 = arith.addf %161, %162 : vector<8x32xf32>
    %164 = math.tanh %163 : vector<8x32xf32>
    %165 = arith.mulf %160, %164 : vector<8x32xf32>
    %cst_60 = arith.constant 0.899999976 : f32
    %166 = vector.broadcast %cst_60 : f32 to vector<8x32xf32>
    %167 = arith.mulf %165, %166 : vector<8x32xf32>
    %cst_61 = arith.constant 1.000000e-01 : f32
    %168 = vector.broadcast %cst_61 : f32 to vector<8x32xf32>
    %169 = arith.mulf %168, %132 : vector<8x32xf32>
    %170 = arith.addf %167, %169 : vector<8x32xf32>
    %cst_62 = arith.constant 5.000000e-01 : f32
    %171 = vector.broadcast %cst_62 : f32 to vector<8x32xf32>
    %172 = arith.mulf %163, %171 : vector<8x32xf32>
    %cst_63 = arith.constant 5.000000e-01 : f32
    %173 = vector.broadcast %cst_63 : f32 to vector<8x32xf32>
    %174 = arith.mulf %173, %137 : vector<8x32xf32>
    %175 = arith.addf %172, %174 : vector<8x32xf32>
    %cst_64 = arith.constant dense<0.000000e+00> : vector<8x128xf32>
    %176 = tpu.matmul %170, %9, %cst_64 {dimension_numbers = #tpu.dot_dimension_numbers<[1], [0], [0], [1], [0, 0, 1, 1], [], []>} : vector<8x32xf32>, vector<32x128xf32>, vector<8x128xf32> -> vector<8x128xf32>
    %177 = vector.broadcast %10 : vector<1x128xf32> to vector<8x128xf32>
    %178 = arith.addf %176, %177 : vector<8x128xf32>
    %c0_65 = arith.constant 0 : index
    %c0_66 = arith.constant 0 : index
    %c0_67 = arith.constant 0 : index
    %179 = vector.load %arg13[%c0_65, %c0_66, %c0_67] : memref<8x8x128xf32, #tpu.memory_space<vmem>>, vector<1x8x128xf32>
    %180 = vector.shape_cast %179 : vector<1x8x128xf32> to vector<8x128xf32>
    %181 = vector.shape_cast %178 : vector<8x128xf32> to vector<1x8x128xf32>
    tpu.vector_store %arg13[%c0_65, %c0_66, %c0_67], %181 {strides = array<i32>} : memref<8x8x128xf32, #tpu.memory_space<vmem>>, vector<1x8x128xf32>,
    %c1 = arith.constant 1 : index
    %c0_68 = arith.constant 0 : index
    %c0_69 = arith.constant 0 : index
    %182 = vector.load %arg1[%c1, %c0_68, %c0_69] : memref<8x8x32xf32, #tpu.memory_space<vmem>>, vector<1x8x32xf32>
    %183 = vector.shape_cast %182 : vector<1x8x32xf32> to vector<8x32xf32>
    %184 = tpu.concatenate %183, %170 in 1 : vector<8x32xf32>, vector<8x32xf32> -> vector<8x64xf32>
    %cst_70 = arith.constant dense<0.000000e+00> : vector<8x128xf32>
    %185 = tpu.matmul %184, %3, %cst_70 {dimension_numbers = #tpu.dot_dimension_numbers<[1], [0], [0], [1], [0, 0, 1, 1], [], []>} : vector<8x64xf32>, vector<64x128xf32>, vector<8x128xf32> -> vector<8x128xf32>
    %186 = vector.broadcast %4 : vector<1x128xf32> to vector<8x128xf32>
    %187 = arith.addf %185, %186 : vector<8x128xf32>
    %188 = vector.extract_strided_slice %187 {offsets = [0, 0], sizes = [8, 32], strides = [1, 1]} : vector<8x128xf32> to vector<8x32xf32>
    %189 = arith.negf %188 : vector<8x32xf32>
    %190 = math.exp %189 : vector<8x32xf32>
    %cst_71 = arith.constant 1.000000e+00 : f32
    %191 = vector.broadcast %cst_71 : f32 to vector<8x32xf32>
    %192 = arith.addf %191, %190 : vector<8x32xf32>
    %193 = arith.divf %191, %192 : vector<8x32xf32>
    %194 = vector.extract_strided_slice %187 {offsets = [0, 32], sizes = [8, 32], strides = [1, 1]} : vector<8x128xf32> to vector<8x32xf32>
    %195 = arith.negf %194 : vector<8x32xf32>
    %196 = math.exp %195 : vector<8x32xf32>
    %cst_72 = arith.constant 1.000000e+00 : f32
    %197 = vector.broadcast %cst_72 : f32 to vector<8x32xf32>
    %198 = arith.addf %197, %196 : vector<8x32xf32>
    %199 = arith.divf %197, %198 : vector<8x32xf32>
    %200 = vector.extract_strided_slice %187 {offsets = [0, 64], sizes = [8, 32], strides = [1, 1]} : vector<8x128xf32> to vector<8x32xf32>
    %201 = math.tanh %200 : vector<8x32xf32>
    %202 = vector.extract_strided_slice %187 {offsets = [0, 96], sizes = [8, 32], strides = [1, 1]} : vector<8x128xf32> to vector<8x32xf32>
    %203 = arith.negf %202 : vector<8x32xf32>
    %204 = math.exp %203 : vector<8x32xf32>
    %cst_73 = arith.constant 1.000000e+00 : f32
    %205 = vector.broadcast %cst_73 : f32 to vector<8x32xf32>
    %206 = arith.addf %205, %204 : vector<8x32xf32>
    %207 = arith.divf %205, %206 : vector<8x32xf32>
    %208 = arith.mulf %199, %175 : vector<8x32xf32>
    %209 = arith.mulf %193, %201 : vector<8x32xf32>
    %210 = arith.addf %208, %209 : vector<8x32xf32>
    %211 = math.tanh %210 : vector<8x32xf32>
    %212 = arith.mulf %207, %211 : vector<8x32xf32>
    %cst_74 = arith.constant 0.899999976 : f32
    %213 = vector.broadcast %cst_74 : f32 to vector<8x32xf32>
    %214 = arith.mulf %212, %213 : vector<8x32xf32>
    %cst_75 = arith.constant 1.000000e-01 : f32
    %215 = vector.broadcast %cst_75 : f32 to vector<8x32xf32>
    %216 = arith.mulf %215, %170 : vector<8x32xf32>
    %217 = arith.addf %214, %216 : vector<8x32xf32>
    %cst_76 = arith.constant 5.000000e-01 : f32
    %218 = vector.broadcast %cst_76 : f32 to vector<8x32xf32>
    %219 = arith.mulf %210, %218 : vector<8x32xf32>
    %cst_77 = arith.constant 5.000000e-01 : f32
    %220 = vector.broadcast %cst_77 : f32 to vector<8x32xf32>
    %221 = arith.mulf %220, %175 : vector<8x32xf32>
    %222 = arith.addf %219, %221 : vector<8x32xf32>
    %223 = tpu.concatenate %217, %93 in 1 : vector<8x32xf32>, vector<8x32xf32> -> vector<8x64xf32>
    %cst_78 = arith.constant dense<0.000000e+00> : vector<8x128xf32>
    %224 = tpu.matmul %223, %5, %cst_78 {dimension_numbers = #tpu.dot_dimension_numbers<[1], [0], [0], [1], [0, 0, 1, 1], [], []>} : vector<8x64xf32>, vector<64x128xf32>, vector<8x128xf32> -> vector<8x128xf32>
    %225 = vector.broadcast %6 : vector<1x128xf32> to vector<8x128xf32>
    %226 = arith.addf %224, %225 : vector<8x128xf32>
    %227 = vector.extract_strided_slice %226 {offsets = [0, 0], sizes = [8, 32], strides = [1, 1]} : vector<8x128xf32> to vector<8x32xf32>
    %228 = arith.negf %227 : vector<8x32xf32>
    %229 = math.exp %228 : vector<8x32xf32>
    %cst_79 = arith.constant 1.000000e+00 : f32
    %230 = vector.broadcast %cst_79 : f32 to vector<8x32xf32>
    %231 = arith.addf %230, %229 : vector<8x32xf32>
    %232 = arith.divf %230, %231 : vector<8x32xf32>
    %233 = vector.extract_strided_slice %226 {offsets = [0, 32], sizes = [8, 32], strides = [1, 1]} : vector<8x128xf32> to vector<8x32xf32>
    %234 = arith.negf %233 : vector<8x32xf32>
    %235 = math.exp %234 : vector<8x32xf32>
    %cst_80 = arith.constant 1.000000e+00 : f32
    %236 = vector.broadcast %cst_80 : f32 to vector<8x32xf32>
    %237 = arith.addf %236, %235 : vector<8x32xf32>
    %238 = arith.divf %236, %237 : vector<8x32xf32>
    %239 = vector.extract_strided_slice %226 {offsets = [0, 64], sizes = [8, 32], strides = [1, 1]} : vector<8x128xf32> to vector<8x32xf32>
    %240 = math.tanh %239 : vector<8x32xf32>
    %241 = vector.extract_strided_slice %226 {offsets = [0, 96], sizes = [8, 32], strides = [1, 1]} : vector<8x128xf32> to vector<8x32xf32>
    %242 = arith.negf %241 : vector<8x32xf32>
    %243 = math.exp %242 : vector<8x32xf32>
    %cst_81 = arith.constant 1.000000e+00 : f32
    %244 = vector.broadcast %cst_81 : f32 to vector<8x32xf32>
    %245 = arith.addf %244, %243 : vector<8x32xf32>
    %246 = arith.divf %244, %245 : vector<8x32xf32>
    %247 = arith.mulf %238, %98 : vector<8x32xf32>
    %248 = arith.mulf %232, %240 : vector<8x32xf32>
    %249 = arith.addf %247, %248 : vector<8x32xf32>
    %250 = math.tanh %249 : vector<8x32xf32>
    %251 = arith.mulf %246, %250 : vector<8x32xf32>
    %cst_82 = arith.constant 0.899999976 : f32
    %252 = vector.broadcast %cst_82 : f32 to vector<8x32xf32>
    %253 = arith.mulf %251, %252 : vector<8x32xf32>
    %cst_83 = arith.constant 1.000000e-01 : f32
    %254 = vector.broadcast %cst_83 : f32 to vector<8x32xf32>
    %255 = arith.mulf %254, %93 : vector<8x32xf32>
    %256 = arith.addf %253, %255 : vector<8x32xf32>
    %cst_84 = arith.constant 5.000000e-01 : f32
    %257 = vector.broadcast %cst_84 : f32 to vector<8x32xf32>
    %258 = arith.mulf %249, %257 : vector<8x32xf32>
    %cst_85 = arith.constant 5.000000e-01 : f32
    %259 = vector.broadcast %cst_85 : f32 to vector<8x32xf32>
    %260 = arith.mulf %259, %98 : vector<8x32xf32>
    %261 = arith.addf %258, %260 : vector<8x32xf32>
    %262 = tpu.concatenate %256, %217 in 1 : vector<8x32xf32>, vector<8x32xf32> -> vector<8x64xf32>
    %cst_86 = arith.constant dense<0.000000e+00> : vector<8x128xf32>
    %263 = tpu.matmul %262, %7, %cst_86 {dimension_numbers = #tpu.dot_dimension_numbers<[1], [0], [0], [1], [0, 0, 1, 1], [], []>} : vector<8x64xf32>, vector<64x128xf32>, vector<8x128xf32> -> vector<8x128xf32>
    %264 = vector.broadcast %8 : vector<1x128xf32> to vector<8x128xf32>
    %265 = arith.addf %263, %264 : vector<8x128xf32>
    %266 = vector.extract_strided_slice %265 {offsets = [0, 0], sizes = [8, 32], strides = [1, 1]} : vector<8x128xf32> to vector<8x32xf32>
    %267 = arith.negf %266 : vector<8x32xf32>
    %268 = math.exp %267 : vector<8x32xf32>
    %cst_87 = arith.constant 1.000000e+00 : f32
    %269 = vector.broadcast %cst_87 : f32 to vector<8x32xf32>
    %270 = arith.addf %269, %268 : vector<8x32xf32>
    %271 = arith.divf %269, %270 : vector<8x32xf32>
    %272 = vector.extract_strided_slice %265 {offsets = [0, 32], sizes = [8, 32], strides = [1, 1]} : vector<8x128xf32> to vector<8x32xf32>
    %273 = arith.negf %272 : vector<8x32xf32>
    %274 = math.exp %273 : vector<8x32xf32>
    %cst_88 = arith.constant 1.000000e+00 : f32
    %275 = vector.broadcast %cst_88 : f32 to vector<8x32xf32>
    %276 = arith.addf %275, %274 : vector<8x32xf32>
    %277 = arith.divf %275, %276 : vector<8x32xf32>
    %278 = vector.extract_strided_slice %265 {offsets = [0, 64], sizes = [8, 32], strides = [1, 1]} : vector<8x128xf32> to vector<8x32xf32>
    %279 = math.tanh %278 : vector<8x32xf32>
    %280 = vector.extract_strided_slice %265 {offsets = [0, 96], sizes = [8, 32], strides = [1, 1]} : vector<8x128xf32> to vector<8x32xf32>
    %281 = arith.negf %280 : vector<8x32xf32>
    %282 = math.exp %281 : vector<8x32xf32>
    %cst_89 = arith.constant 1.000000e+00 : f32
    %283 = vector.broadcast %cst_89 : f32 to vector<8x32xf32>
    %284 = arith.addf %283, %282 : vector<8x32xf32>
    %285 = arith.divf %283, %284 : vector<8x32xf32>
    %286 = arith.mulf %277, %222 : vector<8x32xf32>
    %287 = arith.mulf %271, %279 : vector<8x32xf32>
    %288 = arith.addf %286, %287 : vector<8x32xf32>
    %289 = math.tanh %288 : vector<8x32xf32>
    %290 = arith.mulf %285, %289 : vector<8x32xf32>
    %cst_90 = arith.constant 0.899999976 : f32
    %291 = vector.broadcast %cst_90 : f32 to vector<8x32xf32>
    %292 = arith.mulf %290, %291 : vector<8x32xf32>
    %cst_91 = arith.constant 1.000000e-01 : f32
    %293 = vector.broadcast %cst_91 : f32 to vector<8x32xf32>
    %294 = arith.mulf %293, %217 : vector<8x32xf32>
    %295 = arith.addf %292, %294 : vector<8x32xf32>
    %cst_92 = arith.constant 5.000000e-01 : f32
    %296 = vector.broadcast %cst_92 : f32 to vector<8x32xf32>
    %297 = arith.mulf %288, %296 : vector<8x32xf32>
    %cst_93 = arith.constant 5.000000e-01 : f32
    %298 = vector.broadcast %cst_93 : f32 to vector<8x32xf32>
    %299 = arith.mulf %298, %222 : vector<8x32xf32>
    %300 = arith.addf %297, %299 : vector<8x32xf32>
    %cst_94 = arith.constant dense<0.000000e+00> : vector<8x128xf32>
    %301 = tpu.matmul %295, %12, %cst_94 {dimension_numbers = #tpu.dot_dimension_numbers<[1], [0], [0], [1], [0, 0, 1, 1], [], []>} : vector<8x32xf32>, vector<32x128xf32>, vector<8x128xf32> -> vector<8x128xf32>
    %302 = vector.broadcast %14 : vector<1x128xf32> to vector<8x128xf32>
    %303 = arith.addf %301, %302 : vector<8x128xf32>
    %304 = vector.extract_strided_slice %303 {offsets = [0, 0], sizes = [8, 32], strides = [1, 1]} : vector<8x128xf32> to vector<8x32xf32>
    %305 = arith.negf %304 : vector<8x32xf32>
    %306 = math.exp %305 : vector<8x32xf32>
    %cst_95 = arith.constant 1.000000e+00 : f32
    %307 = vector.broadcast %cst_95 : f32 to vector<8x32xf32>
    %308 = arith.addf %307, %306 : vector<8x32xf32>
    %309 = arith.divf %307, %308 : vector<8x32xf32>
    %310 = vector.extract_strided_slice %303 {offsets = [0, 32], sizes = [8, 32], strides = [1, 1]} : vector<8x128xf32> to vector<8x32xf32>
    %311 = arith.negf %310 : vector<8x32xf32>
    %312 = math.exp %311 : vector<8x32xf32>
    %cst_96 = arith.constant 1.000000e+00 : f32
    %313 = vector.broadcast %cst_96 : f32 to vector<8x32xf32>
    %314 = arith.addf %313, %312 : vector<8x32xf32>
    %315 = arith.divf %313, %314 : vector<8x32xf32>
    %316 = vector.extract_strided_slice %303 {offsets = [0, 64], sizes = [8, 32], strides = [1, 1]} : vector<8x128xf32> to vector<8x32xf32>
    %317 = math.tanh %316 : vector<8x32xf32>
    %318 = vector.extract_strided_slice %303 {offsets = [0, 96], sizes = [8, 32], strides = [1, 1]} : vector<8x128xf32> to vector<8x32xf32>
    %319 = arith.negf %318 : vector<8x32xf32>
    %320 = math.exp %319 : vector<8x32xf32>
    %cst_97 = arith.constant 1.000000e+00 : f32
    %321 = vector.broadcast %cst_97 : f32 to vector<8x32xf32>
    %322 = arith.addf %321, %320 : vector<8x32xf32>
    %323 = arith.divf %321, %322 : vector<8x32xf32>
    %324 = arith.mulf %315, %300 : vector<8x32xf32>
    %325 = arith.mulf %309, %317 : vector<8x32xf32>
    %326 = arith.addf %324, %325 : vector<8x32xf32>
    %327 = math.tanh %326 : vector<8x32xf32>
    %328 = arith.mulf %323, %327 : vector<8x32xf32>
    %cst_98 = arith.constant 0.899999976 : f32
    %329 = vector.broadcast %cst_98 : f32 to vector<8x32xf32>
    %330 = arith.mulf %328, %329 : vector<8x32xf32>
    %cst_99 = arith.constant 1.000000e-01 : f32
    %331 = vector.broadcast %cst_99 : f32 to vector<8x32xf32>
    %332 = arith.mulf %331, %295 : vector<8x32xf32>
    %333 = arith.addf %330, %332 : vector<8x32xf32>
    %cst_100 = arith.constant 5.000000e-01 : f32
    %334 = vector.broadcast %cst_100 : f32 to vector<8x32xf32>
    %335 = arith.mulf %326, %334 : vector<8x32xf32>
    %cst_101 = arith.constant 5.000000e-01 : f32
    %336 = vector.broadcast %cst_101 : f32 to vector<8x32xf32>
    %337 = arith.mulf %336, %300 : vector<8x32xf32>
    %338 = arith.addf %335, %337 : vector<8x32xf32>
    %cst_102 = arith.constant dense<0.000000e+00> : vector<8x128xf32>
    %339 = tpu.matmul %333, %9, %cst_102 {dimension_numbers = #tpu.dot_dimension_numbers<[1], [0], [0], [1], [0, 0, 1, 1], [], []>} : vector<8x32xf32>, vector<32x128xf32>, vector<8x128xf32> -> vector<8x128xf32>
    %340 = vector.broadcast %10 : vector<1x128xf32> to vector<8x128xf32>
    %341 = arith.addf %339, %340 : vector<8x128xf32>
    %c1_103 = arith.constant 1 : index
    %c0_104 = arith.constant 0 : index
    %c0_105 = arith.constant 0 : index
    %342 = vector.load %arg13[%c1_103, %c0_104, %c0_105] : memref<8x8x128xf32, #tpu.memory_space<vmem>>, vector<1x8x128xf32>
    %343 = vector.shape_cast %342 : vector<1x8x128xf32> to vector<8x128xf32>
    %344 = vector.shape_cast %341 : vector<8x128xf32> to vector<1x8x128xf32>
    tpu.vector_store %arg13[%c1_103, %c0_104, %c0_105], %344 {strides = array<i32>} : memref<8x8x128xf32, #tpu.memory_space<vmem>>, vector<1x8x128xf32>,
    %c2 = arith.constant 2 : index
    %c0_106 = arith.constant 0 : index
    %c0_107 = arith.constant 0 : index
    %345 = vector.load %arg1[%c2, %c0_106, %c0_107] : memref<8x8x32xf32, #tpu.memory_space<vmem>>, vector<1x8x32xf32>
    %346 = vector.shape_cast %345 : vector<1x8x32xf32> to vector<8x32xf32>
    %347 = tpu.concatenate %346, %333 in 1 : vector<8x32xf32>, vector<8x32xf32> -> vector<8x64xf32>
    %cst_108 = arith.constant dense<0.000000e+00> : vector<8x128xf32>
    %348 = tpu.matmul %347, %3, %cst_108 {dimension_numbers = #tpu.dot_dimension_numbers<[1], [0], [0], [1], [0, 0, 1, 1], [], []>} : vector<8x64xf32>, vector<64x128xf32>, vector<8x128xf32> -> vector<8x128xf32>
    %349 = vector.broadcast %4 : vector<1x128xf32> to vector<8x128xf32>
    %350 = arith.addf %348, %349 : vector<8x128xf32>
    %351 = vector.extract_strided_slice %350 {offsets = [0, 0], sizes = [8, 32], strides = [1, 1]} : vector<8x128xf32> to vector<8x32xf32>
    %352 = arith.negf %351 : vector<8x32xf32>
    %353 = math.exp %352 : vector<8x32xf32>
    %cst_109 = arith.constant 1.000000e+00 : f32
    %354 = vector.broadcast %cst_109 : f32 to vector<8x32xf32>
    %355 = arith.addf %354, %353 : vector<8x32xf32>
    %356 = arith.divf %354, %355 : vector<8x32xf32>
    %357 = vector.extract_strided_slice %350 {offsets = [0, 32], sizes = [8, 32], strides = [1, 1]} : vector<8x128xf32> to vector<8x32xf32>
    %358 = arith.negf %357 : vector<8x32xf32>
    %359 = math.exp %358 : vector<8x32xf32>
    %cst_110 = arith.constant 1.000000e+00 : f32
    %360 = vector.broadcast %cst_110 : f32 to vector<8x32xf32>
    %361 = arith.addf %360, %359 : vector<8x32xf32>
    %362 = arith.divf %360, %361 : vector<8x32xf32>
    %363 = vector.extract_strided_slice %350 {offsets = [0, 64], sizes = [8, 32], strides = [1, 1]} : vector<8x128xf32> to vector<8x32xf32>
    %364 = math.tanh %363 : vector<8x32xf32>
    %365 = vector.extract_strided_slice %350 {offsets = [0, 96], sizes = [8, 32], strides = [1, 1]} : vector<8x128xf32> to vector<8x32xf32>
    %366 = arith.negf %365 : vector<8x32xf32>
    %367 = math.exp %366 : vector<8x32xf32>
    %cst_111 = arith.constant 1.000000e+00 : f32
    %368 = vector.broadcast %cst_111 : f32 to vector<8x32xf32>
    %369 = arith.addf %368, %367 : vector<8x32xf32>
    %370 = arith.divf %368, %369 : vector<8x32xf32>
    %371 = arith.mulf %362, %338 : vector<8x32xf32>
    %372 = arith.mulf %356, %364 : vector<8x32xf32>
    %373 = arith.addf %371, %372 : vector<8x32xf32>
    %374 = math.tanh %373 : vector<8x32xf32>
    %375 = arith.mulf %370, %374 : vector<8x32xf32>
    %cst_112 = arith.constant 0.899999976 : f32
    %376 = vector.broadcast %cst_112 : f32 to vector<8x32xf32>
    %377 = arith.mulf %375, %376 : vector<8x32xf32>
    %cst_113 = arith.constant 1.000000e-01 : f32
    %378 = vector.broadcast %cst_113 : f32 to vector<8x32xf32>
    %379 = arith.mulf %378, %333 : vector<8x32xf32>
    %380 = arith.addf %377, %379 : vector<8x32xf32>
    %cst_114 = arith.constant 5.000000e-01 : f32
    %381 = vector.broadcast %cst_114 : f32 to vector<8x32xf32>
    %382 = arith.mulf %373, %381 : vector<8x32xf32>
    %cst_115 = arith.constant 5.000000e-01 : f32
    %383 = vector.broadcast %cst_115 : f32 to vector<8x32xf32>
    %384 = arith.mulf %383, %338 : vector<8x32xf32>
    %385 = arith.addf %382, %384 : vector<8x32xf32>
    %386 = tpu.concatenate %380, %256 in 1 : vector<8x32xf32>, vector<8x32xf32> -> vector<8x64xf32>
    %cst_116 = arith.constant dense<0.000000e+00> : vector<8x128xf32>
    %387 = tpu.matmul %386, %5, %cst_116 {dimension_numbers = #tpu.dot_dimension_numbers<[1], [0], [0], [1], [0, 0, 1, 1], [], []>} : vector<8x64xf32>, vector<64x128xf32>, vector<8x128xf32> -> vector<8x128xf32>
    %388 = vector.broadcast %6 : vector<1x128xf32> to vector<8x128xf32>
    %389 = arith.addf %387, %388 : vector<8x128xf32>
    %390 = vector.extract_strided_slice %389 {offsets = [0, 0], sizes = [8, 32], strides = [1, 1]} : vector<8x128xf32> to vector<8x32xf32>
    %391 = arith.negf %390 : vector<8x32xf32>
    %392 = math.exp %391 : vector<8x32xf32>
    %cst_117 = arith.constant 1.000000e+00 : f32
    %393 = vector.broadcast %cst_117 : f32 to vector<8x32xf32>
    %394 = arith.addf %393, %392 : vector<8x32xf32>
    %395 = arith.divf %393, %394 : vector<8x32xf32>
    %396 = vector.extract_strided_slice %389 {offsets = [0, 32], sizes = [8, 32], strides = [1, 1]} : vector<8x128xf32> to vector<8x32xf32>
    %397 = arith.negf %396 : vector<8x32xf32>
    %398 = math.exp %397 : vector<8x32xf32>
    %cst_118 = arith.constant 1.000000e+00 : f32
    %399 = vector.broadcast %cst_118 : f32 to vector<8x32xf32>
    %400 = arith.addf %399, %398 : vector<8x32xf32>
    %401 = arith.divf %399, %400 : vector<8x32xf32>
    %402 = vector.extract_strided_slice %389 {offsets = [0, 64], sizes = [8, 32], strides = [1, 1]} : vector<8x128xf32> to vector<8x32xf32>
    %403 = math.tanh %402 : vector<8x32xf32>
    %404 = vector.extract_strided_slice %389 {offsets = [0, 96], sizes = [8, 32], strides = [1, 1]} : vector<8x128xf32> to vector<8x32xf32>
    %405 = arith.negf %404 : vector<8x32xf32>
    %406 = math.exp %405 : vector<8x32xf32>
    %cst_119 = arith.constant 1.000000e+00 : f32
    %407 = vector.broadcast %cst_119 : f32 to vector<8x32xf32>
    %408 = arith.addf %407, %406 : vector<8x32xf32>
    %409 = arith.divf %407, %408 : vector<8x32xf32>
    %410 = arith.mulf %401, %261 : vector<8x32xf32>
    %411 = arith.mulf %395, %403 : vector<8x32xf32>
    %412 = arith.addf %410, %411 : vector<8x32xf32>
    %413 = math.tanh %412 : vector<8x32xf32>
    %414 = arith.mulf %409, %413 : vector<8x32xf32>
    %cst_120 = arith.constant 0.899999976 : f32
    %415 = vector.broadcast %cst_120 : f32 to vector<8x32xf32>
    %416 = arith.mulf %414, %415 : vector<8x32xf32>
    %cst_121 = arith.constant 1.000000e-01 : f32
    %417 = vector.broadcast %cst_121 : f32 to vector<8x32xf32>
    %418 = arith.mulf %417, %256 : vector<8x32xf32>
    %419 = arith.addf %416, %418 : vector<8x32xf32>
    %cst_122 = arith.constant 5.000000e-01 : f32
    %420 = vector.broadcast %cst_122 : f32 to vector<8x32xf32>
    %421 = arith.mulf %412, %420 : vector<8x32xf32>
    %cst_123 = arith.constant 5.000000e-01 : f32
    %422 = vector.broadcast %cst_123 : f32 to vector<8x32xf32>
    %423 = arith.mulf %422, %261 : vector<8x32xf32>
    %424 = arith.addf %421, %423 : vector<8x32xf32>
    %425 = tpu.concatenate %419, %380 in 1 : vector<8x32xf32>, vector<8x32xf32> -> vector<8x64xf32>
    %cst_124 = arith.constant dense<0.000000e+00> : vector<8x128xf32>
    %426 = tpu.matmul %425, %7, %cst_124 {dimension_numbers = #tpu.dot_dimension_numbers<[1], [0], [0], [1], [0, 0, 1, 1], [], []>} : vector<8x64xf32>, vector<64x128xf32>, vector<8x128xf32> -> vector<8x128xf32>
    %427 = vector.broadcast %8 : vector<1x128xf32> to vector<8x128xf32>
    %428 = arith.addf %426, %427 : vector<8x128xf32>
    %429 = vector.extract_strided_slice %428 {offsets = [0, 0], sizes = [8, 32], strides = [1, 1]} : vector<8x128xf32> to vector<8x32xf32>
    %430 = arith.negf %429 : vector<8x32xf32>
    %431 = math.exp %430 : vector<8x32xf32>
    %cst_125 = arith.constant 1.000000e+00 : f32
    %432 = vector.broadcast %cst_125 : f32 to vector<8x32xf32>
    %433 = arith.addf %432, %431 : vector<8x32xf32>
    %434 = arith.divf %432, %433 : vector<8x32xf32>
    %435 = vector.extract_strided_slice %428 {offsets = [0, 32], sizes = [8, 32], strides = [1, 1]} : vector<8x128xf32> to vector<8x32xf32>
    %436 = arith.negf %435 : vector<8x32xf32>
    %437 = math.exp %436 : vector<8x32xf32>
    %cst_126 = arith.constant 1.000000e+00 : f32
    %438 = vector.broadcast %cst_126 : f32 to vector<8x32xf32>
    %439 = arith.addf %438, %437 : vector<8x32xf32>
    %440 = arith.divf %438, %439 : vector<8x32xf32>
    %441 = vector.extract_strided_slice %428 {offsets = [0, 64], sizes = [8, 32], strides = [1, 1]} : vector<8x128xf32> to vector<8x32xf32>
    %442 = math.tanh %441 : vector<8x32xf32>
    %443 = vector.extract_strided_slice %428 {offsets = [0, 96], sizes = [8, 32], strides = [1, 1]} : vector<8x128xf32> to vector<8x32xf32>
    %444 = arith.negf %443 : vector<8x32xf32>
    %445 = math.exp %444 : vector<8x32xf32>
    %cst_127 = arith.constant 1.000000e+00 : f32
    %446 = vector.broadcast %cst_127 : f32 to vector<8x32xf32>
    %447 = arith.addf %446, %445 : vector<8x32xf32>
    %448 = arith.divf %446, %447 : vector<8x32xf32>
    %449 = arith.mulf %440, %385 : vector<8x32xf32>
    %450 = arith.mulf %434, %442 : vector<8x32xf32>
    %451 = arith.addf %449, %450 : vector<8x32xf32>
    %452 = math.tanh %451 : vector<8x32xf32>
    %453 = arith.mulf %448, %452 : vector<8x32xf32>
    %cst_128 = arith.constant 0.899999976 : f32
    %454 = vector.broadcast %cst_128 : f32 to vector<8x32xf32>
    %455 = arith.mulf %453, %454 : vector<8x32xf32>
    %cst_129 = arith.constant 1.000000e-01 : f32
    %456 = vector.broadcast %cst_129 : f32 to vector<8x32xf32>
    %457 = arith.mulf %456, %380 : vector<8x32xf32>
    %458 = arith.addf %455, %457 : vector<8x32xf32>
    %cst_130 = arith.constant 5.000000e-01 : f32
    %459 = vector.broadcast %cst_130 : f32 to vector<8x32xf32>
    %460 = arith.mulf %451, %459 : vector<8x32xf32>
    %cst_131 = arith.constant 5.000000e-01 : f32
    %461 = vector.broadcast %cst_131 : f32 to vector<8x32xf32>
    %462 = arith.mulf %461, %385 : vector<8x32xf32>
    %463 = arith.addf %460, %462 : vector<8x32xf32>
    %cst_132 = arith.constant dense<0.000000e+00> : vector<8x128xf32>
    %464 = tpu.matmul %458, %12, %cst_132 {dimension_numbers = #tpu.dot_dimension_numbers<[1], [0], [0], [1], [0, 0, 1, 1], [], []>} : vector<8x32xf32>, vector<32x128xf32>, vector<8x128xf32> -> vector<8x128xf32>
    %465 = vector.broadcast %14 : vector<1x128xf32> to vector<8x128xf32>
    %466 = arith.addf %464, %465 : vector<8x128xf32>
    %467 = vector.extract_strided_slice %466 {offsets = [0, 0], sizes = [8, 32], strides = [1, 1]} : vector<8x128xf32> to vector<8x32xf32>
    %468 = arith.negf %467 : vector<8x32xf32>
    %469 = math.exp %468 : vector<8x32xf32>
    %cst_133 = arith.constant 1.000000e+00 : f32
    %470 = vector.broadcast %cst_133 : f32 to vector<8x32xf32>
    %471 = arith.addf %470, %469 : vector<8x32xf32>
    %472 = arith.divf %470, %471 : vector<8x32xf32>
    %473 = vector.extract_strided_slice %466 {offsets = [0, 32], sizes = [8, 32], strides = [1, 1]} : vector<8x128xf32> to vector<8x32xf32>
    %474 = arith.negf %473 : vector<8x32xf32>
    %475 = math.exp %474 : vector<8x32xf32>
    %cst_134 = arith.constant 1.000000e+00 : f32
    %476 = vector.broadcast %cst_134 : f32 to vector<8x32xf32>
    %477 = arith.addf %476, %475 : vector<8x32xf32>
    %478 = arith.divf %476, %477 : vector<8x32xf32>
    %479 = vector.extract_strided_slice %466 {offsets = [0, 64], sizes = [8, 32], strides = [1, 1]} : vector<8x128xf32> to vector<8x32xf32>
    %480 = math.tanh %479 : vector<8x32xf32>
    %481 = vector.extract_strided_slice %466 {offsets = [0, 96], sizes = [8, 32], strides = [1, 1]} : vector<8x128xf32> to vector<8x32xf32>
    %482 = arith.negf %481 : vector<8x32xf32>
    %483 = math.exp %482 : vector<8x32xf32>
    %cst_135 = arith.constant 1.000000e+00 : f32
    %484 = vector.broadcast %cst_135 : f32 to vector<8x32xf32>
    %485 = arith.addf %484, %483 : vector<8x32xf32>
    %486 = arith.divf %484, %485 : vector<8x32xf32>
    %487 = arith.mulf %478, %463 : vector<8x32xf32>
    %488 = arith.mulf %472, %480 : vector<8x32xf32>
    %489 = arith.addf %487, %488 : vector<8x32xf32>
    %490 = math.tanh %489 : vector<8x32xf32>
    %491 = arith.mulf %486, %490 : vector<8x32xf32>
    %cst_136 = arith.constant 0.899999976 : f32
    %492 = vector.broadcast %cst_136 : f32 to vector<8x32xf32>
    %493 = arith.mulf %491, %492 : vector<8x32xf32>
    %cst_137 = arith.constant 1.000000e-01 : f32
    %494 = vector.broadcast %cst_137 : f32 to vector<8x32xf32>
    %495 = arith.mulf %494, %458 : vector<8x32xf32>
    %496 = arith.addf %493, %495 : vector<8x32xf32>
    %cst_138 = arith.constant 5.000000e-01 : f32
    %497 = vector.broadcast %cst_138 : f32 to vector<8x32xf32>
    %498 = arith.mulf %489, %497 : vector<8x32xf32>
    %cst_139 = arith.constant 5.000000e-01 : f32
    %499 = vector.broadcast %cst_139 : f32 to vector<8x32xf32>
    %500 = arith.mulf %499, %463 : vector<8x32xf32>
    %501 = arith.addf %498, %500 : vector<8x32xf32>
    %cst_140 = arith.constant dense<0.000000e+00> : vector<8x128xf32>
    %502 = tpu.matmul %496, %9, %cst_140 {dimension_numbers = #tpu.dot_dimension_numbers<[1], [0], [0], [1], [0, 0, 1, 1], [], []>} : vector<8x32xf32>, vector<32x128xf32>, vector<8x128xf32> -> vector<8x128xf32>
    %503 = vector.broadcast %10 : vector<1x128xf32> to vector<8x128xf32>
    %504 = arith.addf %502, %503 : vector<8x128xf32>
    %c2_141 = arith.constant 2 : index
    %c0_142 = arith.constant 0 : index
    %c0_143 = arith.constant 0 : index
    %505 = vector.load %arg13[%c2_141, %c0_142, %c0_143] : memref<8x8x128xf32, #tpu.memory_space<vmem>>, vector<1x8x128xf32>
    %506 = vector.shape_cast %505 : vector<1x8x128xf32> to vector<8x128xf32>
    %507 = vector.shape_cast %504 : vector<8x128xf32> to vector<1x8x128xf32>
    tpu.vector_store %arg13[%c2_141, %c0_142, %c0_143], %507 {strides = array<i32>} : memref<8x8x128xf32, #tpu.memory_space<vmem>>, vector<1x8x128xf32>,
    %c3 = arith.constant 3 : index
    %c0_144 = arith.constant 0 : index
    %c0_145 = arith.constant 0 : index
    %508 = vector.load %arg1[%c3, %c0_144, %c0_145] : memref<8x8x32xf32, #tpu.memory_space<vmem>>, vector<1x8x32xf32>
    %509 = vector.shape_cast %508 : vector<1x8x32xf32> to vector<8x32xf32>
    %510 = tpu.concatenate %509, %496 in 1 : vector<8x32xf32>, vector<8x32xf32> -> vector<8x64xf32>
    %cst_146 = arith.constant dense<0.000000e+00> : vector<8x128xf32>
    %511 = tpu.matmul %510, %3, %cst_146 {dimension_numbers = #tpu.dot_dimension_numbers<[1], [0], [0], [1], [0, 0, 1, 1], [], []>} : vector<8x64xf32>, vector<64x128xf32>, vector<8x128xf32> -> vector<8x128xf32>
    %512 = vector.broadcast %4 : vector<1x128xf32> to vector<8x128xf32>
    %513 = arith.addf %511, %512 : vector<8x128xf32>
    %514 = vector.extract_strided_slice %513 {offsets = [0, 0], sizes = [8, 32], strides = [1, 1]} : vector<8x128xf32> to vector<8x32xf32>
    %515 = arith.negf %514 : vector<8x32xf32>
    %516 = math.exp %515 : vector<8x32xf32>
    %cst_147 = arith.constant 1.000000e+00 : f32
    %517 = vector.broadcast %cst_147 : f32 to vector<8x32xf32>
    %518 = arith.addf %517, %516 : vector<8x32xf32>
    %519 = arith.divf %517, %518 : vector<8x32xf32>
    %520 = vector.extract_strided_slice %513 {offsets = [0, 32], sizes = [8, 32], strides = [1, 1]} : vector<8x128xf32> to vector<8x32xf32>
    %521 = arith.negf %520 : vector<8x32xf32>
    %522 = math.exp %521 : vector<8x32xf32>
    %cst_148 = arith.constant 1.000000e+00 : f32
    %523 = vector.broadcast %cst_148 : f32 to vector<8x32xf32>
    %524 = arith.addf %523, %522 : vector<8x32xf32>
    %525 = arith.divf %523, %524 : vector<8x32xf32>
    %526 = vector.extract_strided_slice %513 {offsets = [0, 64], sizes = [8, 32], strides = [1, 1]} : vector<8x128xf32> to vector<8x32xf32>
    %527 = math.tanh %526 : vector<8x32xf32>
    %528 = vector.extract_strided_slice %513 {offsets = [0, 96], sizes = [8, 32], strides = [1, 1]} : vector<8x128xf32> to vector<8x32xf32>
    %529 = arith.negf %528 : vector<8x32xf32>
    %530 = math.exp %529 : vector<8x32xf32>
    %cst_149 = arith.constant 1.000000e+00 : f32
    %531 = vector.broadcast %cst_149 : f32 to vector<8x32xf32>
    %532 = arith.addf %531, %530 : vector<8x32xf32>
    %533 = arith.divf %531, %532 : vector<8x32xf32>
    %534 = arith.mulf %525, %501 : vector<8x32xf32>
    %535 = arith.mulf %519, %527 : vector<8x32xf32>
    %536 = arith.addf %534, %535 : vector<8x32xf32>
    %537 = math.tanh %536 : vector<8x32xf32>
    %538 = arith.mulf %533, %537 : vector<8x32xf32>
    %cst_150 = arith.constant 0.899999976 : f32
    %539 = vector.broadcast %cst_150 : f32 to vector<8x32xf32>
    %540 = arith.mulf %538, %539 : vector<8x32xf32>
    %cst_151 = arith.constant 1.000000e-01 : f32
    %541 = vector.broadcast %cst_151 : f32 to vector<8x32xf32>
    %542 = arith.mulf %541, %496 : vector<8x32xf32>
    %543 = arith.addf %540, %542 : vector<8x32xf32>
    %cst_152 = arith.constant 5.000000e-01 : f32
    %544 = vector.broadcast %cst_152 : f32 to vector<8x32xf32>
    %545 = arith.mulf %536, %544 : vector<8x32xf32>
    %cst_153 = arith.constant 5.000000e-01 : f32
    %546 = vector.broadcast %cst_153 : f32 to vector<8x32xf32>
    %547 = arith.mulf %546, %501 : vector<8x32xf32>
    %548 = arith.addf %545, %547 : vector<8x32xf32>
    %549 = tpu.concatenate %543, %419 in 1 : vector<8x32xf32>, vector<8x32xf32> -> vector<8x64xf32>
    %cst_154 = arith.constant dense<0.000000e+00> : vector<8x128xf32>
    %550 = tpu.matmul %549, %5, %cst_154 {dimension_numbers = #tpu.dot_dimension_numbers<[1], [0], [0], [1], [0, 0, 1, 1], [], []>} : vector<8x64xf32>, vector<64x128xf32>, vector<8x128xf32> -> vector<8x128xf32>
    %551 = vector.broadcast %6 : vector<1x128xf32> to vector<8x128xf32>
    %552 = arith.addf %550, %551 : vector<8x128xf32>
    %553 = vector.extract_strided_slice %552 {offsets = [0, 0], sizes = [8, 32], strides = [1, 1]} : vector<8x128xf32> to vector<8x32xf32>
    %554 = arith.negf %553 : vector<8x32xf32>
    %555 = math.exp %554 : vector<8x32xf32>
    %cst_155 = arith.constant 1.000000e+00 : f32
    %556 = vector.broadcast %cst_155 : f32 to vector<8x32xf32>
    %557 = arith.addf %556, %555 : vector<8x32xf32>
    %558 = arith.divf %556, %557 : vector<8x32xf32>
    %559 = vector.extract_strided_slice %552 {offsets = [0, 32], sizes = [8, 32], strides = [1, 1]} : vector<8x128xf32> to vector<8x32xf32>
    %560 = arith.negf %559 : vector<8x32xf32>
    %561 = math.exp %560 : vector<8x32xf32>
    %cst_156 = arith.constant 1.000000e+00 : f32
    %562 = vector.broadcast %cst_156 : f32 to vector<8x32xf32>
    %563 = arith.addf %562, %561 : vector<8x32xf32>
    %564 = arith.divf %562, %563 : vector<8x32xf32>
    %565 = vector.extract_strided_slice %552 {offsets = [0, 64], sizes = [8, 32], strides = [1, 1]} : vector<8x128xf32> to vector<8x32xf32>
    %566 = math.tanh %565 : vector<8x32xf32>
    %567 = vector.extract_strided_slice %552 {offsets = [0, 96], sizes = [8, 32], strides = [1, 1]} : vector<8x128xf32> to vector<8x32xf32>
    %568 = arith.negf %567 : vector<8x32xf32>
    %569 = math.exp %568 : vector<8x32xf32>
    %cst_157 = arith.constant 1.000000e+00 : f32
    %570 = vector.broadcast %cst_157 : f32 to vector<8x32xf32>
    %571 = arith.addf %570, %569 : vector<8x32xf32>
    %572 = arith.divf %570, %571 : vector<8x32xf32>
    %573 = arith.mulf %564, %424 : vector<8x32xf32>
    %574 = arith.mulf %558, %566 : vector<8x32xf32>
    %575 = arith.addf %573, %574 : vector<8x32xf32>
    %576 = math.tanh %575 : vector<8x32xf32>
    %577 = arith.mulf %572, %576 : vector<8x32xf32>
    %cst_158 = arith.constant 0.899999976 : f32
    %578 = vector.broadcast %cst_158 : f32 to vector<8x32xf32>
    %579 = arith.mulf %577, %578 : vector<8x32xf32>
    %cst_159 = arith.constant 1.000000e-01 : f32
    %580 = vector.broadcast %cst_159 : f32 to vector<8x32xf32>
    %581 = arith.mulf %580, %419 : vector<8x32xf32>
    %582 = arith.addf %579, %581 : vector<8x32xf32>
    %cst_160 = arith.constant 5.000000e-01 : f32
    %583 = vector.broadcast %cst_160 : f32 to vector<8x32xf32>
    %584 = arith.mulf %575, %583 : vector<8x32xf32>
    %cst_161 = arith.constant 5.000000e-01 : f32
    %585 = vector.broadcast %cst_161 : f32 to vector<8x32xf32>
    %586 = arith.mulf %585, %424 : vector<8x32xf32>
    %587 = arith.addf %584, %586 : vector<8x32xf32>
    %588 = tpu.concatenate %582, %543 in 1 : vector<8x32xf32>, vector<8x32xf32> -> vector<8x64xf32>
    %cst_162 = arith.constant dense<0.000000e+00> : vector<8x128xf32>
    %589 = tpu.matmul %588, %7, %cst_162 {dimension_numbers = #tpu.dot_dimension_numbers<[1], [0], [0], [1], [0, 0, 1, 1], [], []>} : vector<8x64xf32>, vector<64x128xf32>, vector<8x128xf32> -> vector<8x128xf32>
    %590 = vector.broadcast %8 : vector<1x128xf32> to vector<8x128xf32>
    %591 = arith.addf %589, %590 : vector<8x128xf32>
    %592 = vector.extract_strided_slice %591 {offsets = [0, 0], sizes = [8, 32], strides = [1, 1]} : vector<8x128xf32> to vector<8x32xf32>
    %593 = arith.negf %592 : vector<8x32xf32>
    %594 = math.exp %593 : vector<8x32xf32>
    %cst_163 = arith.constant 1.000000e+00 : f32
    %595 = vector.broadcast %cst_163 : f32 to vector<8x32xf32>
    %596 = arith.addf %595, %594 : vector<8x32xf32>
    %597 = arith.divf %595, %596 : vector<8x32xf32>
    %598 = vector.extract_strided_slice %591 {offsets = [0, 32], sizes = [8, 32], strides = [1, 1]} : vector<8x128xf32> to vector<8x32xf32>
    %599 = arith.negf %598 : vector<8x32xf32>
    %600 = math.exp %599 : vector<8x32xf32>
    %cst_164 = arith.constant 1.000000e+00 : f32
    %601 = vector.broadcast %cst_164 : f32 to vector<8x32xf32>
    %602 = arith.addf %601, %600 : vector<8x32xf32>
    %603 = arith.divf %601, %602 : vector<8x32xf32>
    %604 = vector.extract_strided_slice %591 {offsets = [0, 64], sizes = [8, 32], strides = [1, 1]} : vector<8x128xf32> to vector<8x32xf32>
    %605 = math.tanh %604 : vector<8x32xf32>
    %606 = vector.extract_strided_slice %591 {offsets = [0, 96], sizes = [8, 32], strides = [1, 1]} : vector<8x128xf32> to vector<8x32xf32>
    %607 = arith.negf %606 : vector<8x32xf32>
    %608 = math.exp %607 : vector<8x32xf32>
    %cst_165 = arith.constant 1.000000e+00 : f32
    %609 = vector.broadcast %cst_165 : f32 to vector<8x32xf32>
    %610 = arith.addf %609, %608 : vector<8x32xf32>
    %611 = arith.divf %609, %610 : vector<8x32xf32>
    %612 = arith.mulf %603, %548 : vector<8x32xf32>
    %613 = arith.mulf %597, %605 : vector<8x32xf32>
    %614 = arith.addf %612, %613 : vector<8x32xf32>
    %615 = math.tanh %614 : vector<8x32xf32>
    %616 = arith.mulf %611, %615 : vector<8x32xf32>
    %cst_166 = arith.constant 0.899999976 : f32
    %617 = vector.broadcast %cst_166 : f32 to vector<8x32xf32>
    %618 = arith.mulf %616, %617 : vector<8x32xf32>
    %cst_167 = arith.constant 1.000000e-01 : f32
    %619 = vector.broadcast %cst_167 : f32 to vector<8x32xf32>
    %620 = arith.mulf %619, %543 : vector<8x32xf32>
    %621 = arith.addf %618, %620 : vector<8x32xf32>
    %cst_168 = arith.constant 5.000000e-01 : f32
    %622 = vector.broadcast %cst_168 : f32 to vector<8x32xf32>
    %623 = arith.mulf %614, %622 : vector<8x32xf32>
    %cst_169 = arith.constant 5.000000e-01 : f32
    %624 = vector.broadcast %cst_169 : f32 to vector<8x32xf32>
    %625 = arith.mulf %624, %548 : vector<8x32xf32>
    %626 = arith.addf %623, %625 : vector<8x32xf32>
    %cst_170 = arith.constant dense<0.000000e+00> : vector<8x128xf32>
    %627 = tpu.matmul %621, %12, %cst_170 {dimension_numbers = #tpu.dot_dimension_numbers<[1], [0], [0], [1], [0, 0, 1, 1], [], []>} : vector<8x32xf32>, vector<32x128xf32>, vector<8x128xf32> -> vector<8x128xf32>
    %628 = vector.broadcast %14 : vector<1x128xf32> to vector<8x128xf32>
    %629 = arith.addf %627, %628 : vector<8x128xf32>
    %630 = vector.extract_strided_slice %629 {offsets = [0, 0], sizes = [8, 32], strides = [1, 1]} : vector<8x128xf32> to vector<8x32xf32>
    %631 = arith.negf %630 : vector<8x32xf32>
    %632 = math.exp %631 : vector<8x32xf32>
    %cst_171 = arith.constant 1.000000e+00 : f32
    %633 = vector.broadcast %cst_171 : f32 to vector<8x32xf32>
    %634 = arith.addf %633, %632 : vector<8x32xf32>
    %635 = arith.divf %633, %634 : vector<8x32xf32>
    %636 = vector.extract_strided_slice %629 {offsets = [0, 32], sizes = [8, 32], strides = [1, 1]} : vector<8x128xf32> to vector<8x32xf32>
    %637 = arith.negf %636 : vector<8x32xf32>
    %638 = math.exp %637 : vector<8x32xf32>
    %cst_172 = arith.constant 1.000000e+00 : f32
    %639 = vector.broadcast %cst_172 : f32 to vector<8x32xf32>
    %640 = arith.addf %639, %638 : vector<8x32xf32>
    %641 = arith.divf %639, %640 : vector<8x32xf32>
    %642 = vector.extract_strided_slice %629 {offsets = [0, 64], sizes = [8, 32], strides = [1, 1]} : vector<8x128xf32> to vector<8x32xf32>
    %643 = math.tanh %642 : vector<8x32xf32>
    %644 = vector.extract_strided_slice %629 {offsets = [0, 96], sizes = [8, 32], strides = [1, 1]} : vector<8x128xf32> to vector<8x32xf32>
    %645 = arith.negf %644 : vector<8x32xf32>
    %646 = math.exp %645 : vector<8x32xf32>
    %cst_173 = arith.constant 1.000000e+00 : f32
    %647 = vector.broadcast %cst_173 : f32 to vector<8x32xf32>
    %648 = arith.addf %647, %646 : vector<8x32xf32>
    %649 = arith.divf %647, %648 : vector<8x32xf32>
    %650 = arith.mulf %641, %626 : vector<8x32xf32>
    %651 = arith.mulf %635, %643 : vector<8x32xf32>
    %652 = arith.addf %650, %651 : vector<8x32xf32>
    %653 = math.tanh %652 : vector<8x32xf32>
    %654 = arith.mulf %649, %653 : vector<8x32xf32>
    %cst_174 = arith.constant 0.899999976 : f32
    %655 = vector.broadcast %cst_174 : f32 to vector<8x32xf32>
    %656 = arith.mulf %654, %655 : vector<8x32xf32>
    %cst_175 = arith.constant 1.000000e-01 : f32
    %657 = vector.broadcast %cst_175 : f32 to vector<8x32xf32>
    %658 = arith.mulf %657, %621 : vector<8x32xf32>
    %659 = arith.addf %656, %658 : vector<8x32xf32>
    %cst_176 = arith.constant 5.000000e-01 : f32
    %660 = vector.broadcast %cst_176 : f32 to vector<8x32xf32>
    %661 = arith.mulf %652, %660 : vector<8x32xf32>
    %cst_177 = arith.constant 5.000000e-01 : f32
    %662 = vector.broadcast %cst_177 : f32 to vector<8x32xf32>
    %663 = arith.mulf %662, %626 : vector<8x32xf32>
    %664 = arith.addf %661, %663 : vector<8x32xf32>
    %cst_178 = arith.constant dense<0.000000e+00> : vector<8x128xf32>
    %665 = tpu.matmul %659, %9, %cst_178 {dimension_numbers = #tpu.dot_dimension_numbers<[1], [0], [0], [1], [0, 0, 1, 1], [], []>} : vector<8x32xf32>, vector<32x128xf32>, vector<8x128xf32> -> vector<8x128xf32>
    %666 = vector.broadcast %10 : vector<1x128xf32> to vector<8x128xf32>
    %667 = arith.addf %665, %666 : vector<8x128xf32>
    %c3_179 = arith.constant 3 : index
    %c0_180 = arith.constant 0 : index
    %c0_181 = arith.constant 0 : index
    %668 = vector.load %arg13[%c3_179, %c0_180, %c0_181] : memref<8x8x128xf32, #tpu.memory_space<vmem>>, vector<1x8x128xf32>
    %669 = vector.shape_cast %668 : vector<1x8x128xf32> to vector<8x128xf32>
    %670 = vector.shape_cast %667 : vector<8x128xf32> to vector<1x8x128xf32>
    tpu.vector_store %arg13[%c3_179, %c0_180, %c0_181], %670 {strides = array<i32>} : memref<8x8x128xf32, #tpu.memory_space<vmem>>, vector<1x8x128xf32>,
    %c4 = arith.constant 4 : index
    %c0_182 = arith.constant 0 : index
    %c0_183 = arith.constant 0 : index
    %671 = vector.load %arg1[%c4, %c0_182, %c0_183] : memref<8x8x32xf32, #tpu.memory_space<vmem>>, vector<1x8x32xf32>
    %672 = vector.shape_cast %671 : vector<1x8x32xf32> to vector<8x32xf32>
    %673 = tpu.concatenate %672, %659 in 1 : vector<8x32xf32>, vector<8x32xf32> -> vector<8x64xf32>
    %cst_184 = arith.constant dense<0.000000e+00> : vector<8x128xf32>
    %674 = tpu.matmul %673, %3, %cst_184 {dimension_numbers = #tpu.dot_dimension_numbers<[1], [0], [0], [1], [0, 0, 1, 1], [], []>} : vector<8x64xf32>, vector<64x128xf32>, vector<8x128xf32> -> vector<8x128xf32>
    %675 = vector.broadcast %4 : vector<1x128xf32> to vector<8x128xf32>
    %676 = arith.addf %674, %675 : vector<8x128xf32>
    %677 = vector.extract_strided_slice %676 {offsets = [0, 0], sizes = [8, 32], strides = [1, 1]} : vector<8x128xf32> to vector<8x32xf32>
    %678 = arith.negf %677 : vector<8x32xf32>
    %679 = math.exp %678 : vector<8x32xf32>
    %cst_185 = arith.constant 1.000000e+00 : f32
    %680 = vector.broadcast %cst_185 : f32 to vector<8x32xf32>
    %681 = arith.addf %680, %679 : vector<8x32xf32>
    %682 = arith.divf %680, %681 : vector<8x32xf32>
    %683 = vector.extract_strided_slice %676 {offsets = [0, 32], sizes = [8, 32], strides = [1, 1]} : vector<8x128xf32> to vector<8x32xf32>
    %684 = arith.negf %683 : vector<8x32xf32>
    %685 = math.exp %684 : vector<8x32xf32>
    %cst_186 = arith.constant 1.000000e+00 : f32
    %686 = vector.broadcast %cst_186 : f32 to vector<8x32xf32>
    %687 = arith.addf %686, %685 : vector<8x32xf32>
    %688 = arith.divf %686, %687 : vector<8x32xf32>
    %689 = vector.extract_strided_slice %676 {offsets = [0, 64], sizes = [8, 32], strides = [1, 1]} : vector<8x128xf32> to vector<8x32xf32>
    %690 = math.tanh %689 : vector<8x32xf32>
    %691 = vector.extract_strided_slice %676 {offsets = [0, 96], sizes = [8, 32], strides = [1, 1]} : vector<8x128xf32> to vector<8x32xf32>
    %692 = arith.negf %691 : vector<8x32xf32>
    %693 = math.exp %692 : vector<8x32xf32>
    %cst_187 = arith.constant 1.000000e+00 : f32
    %694 = vector.broadcast %cst_187 : f32 to vector<8x32xf32>
    %695 = arith.addf %694, %693 : vector<8x32xf32>
    %696 = arith.divf %694, %695 : vector<8x32xf32>
    %697 = arith.mulf %688, %664 : vector<8x32xf32>
    %698 = arith.mulf %682, %690 : vector<8x32xf32>
    %699 = arith.addf %697, %698 : vector<8x32xf32>
    %700 = math.tanh %699 : vector<8x32xf32>
    %701 = arith.mulf %696, %700 : vector<8x32xf32>
    %cst_188 = arith.constant 0.899999976 : f32
    %702 = vector.broadcast %cst_188 : f32 to vector<8x32xf32>
    %703 = arith.mulf %701, %702 : vector<8x32xf32>
    %cst_189 = arith.constant 1.000000e-01 : f32
    %704 = vector.broadcast %cst_189 : f32 to vector<8x32xf32>
    %705 = arith.mulf %704, %659 : vector<8x32xf32>
    %706 = arith.addf %703, %705 : vector<8x32xf32>
    %cst_190 = arith.constant 5.000000e-01 : f32
    %707 = vector.broadcast %cst_190 : f32 to vector<8x32xf32>
    %708 = arith.mulf %699, %707 : vector<8x32xf32>
    %cst_191 = arith.constant 5.000000e-01 : f32
    %709 = vector.broadcast %cst_191 : f32 to vector<8x32xf32>
    %710 = arith.mulf %709, %664 : vector<8x32xf32>
    %711 = arith.addf %708, %710 : vector<8x32xf32>
    %712 = tpu.concatenate %706, %582 in 1 : vector<8x32xf32>, vector<8x32xf32> -> vector<8x64xf32>
    %cst_192 = arith.constant dense<0.000000e+00> : vector<8x128xf32>
    %713 = tpu.matmul %712, %5, %cst_192 {dimension_numbers = #tpu.dot_dimension_numbers<[1], [0], [0], [1], [0, 0, 1, 1], [], []>} : vector<8x64xf32>, vector<64x128xf32>, vector<8x128xf32> -> vector<8x128xf32>
    %714 = vector.broadcast %6 : vector<1x128xf32> to vector<8x128xf32>
    %715 = arith.addf %713, %714 : vector<8x128xf32>
    %716 = vector.extract_strided_slice %715 {offsets = [0, 0], sizes = [8, 32], strides = [1, 1]} : vector<8x128xf32> to vector<8x32xf32>
    %717 = arith.negf %716 : vector<8x32xf32>
    %718 = math.exp %717 : vector<8x32xf32>
    %cst_193 = arith.constant 1.000000e+00 : f32
    %719 = vector.broadcast %cst_193 : f32 to vector<8x32xf32>
    %720 = arith.addf %719, %718 : vector<8x32xf32>
    %721 = arith.divf %719, %720 : vector<8x32xf32>
    %722 = vector.extract_strided_slice %715 {offsets = [0, 32], sizes = [8, 32], strides = [1, 1]} : vector<8x128xf32> to vector<8x32xf32>
    %723 = arith.negf %722 : vector<8x32xf32>
    %724 = math.exp %723 : vector<8x32xf32>
    %cst_194 = arith.constant 1.000000e+00 : f32
    %725 = vector.broadcast %cst_194 : f32 to vector<8x32xf32>
    %726 = arith.addf %725, %724 : vector<8x32xf32>
    %727 = arith.divf %725, %726 : vector<8x32xf32>
    %728 = vector.extract_strided_slice %715 {offsets = [0, 64], sizes = [8, 32], strides = [1, 1]} : vector<8x128xf32> to vector<8x32xf32>
    %729 = math.tanh %728 : vector<8x32xf32>
    %730 = vector.extract_strided_slice %715 {offsets = [0, 96], sizes = [8, 32], strides = [1, 1]} : vector<8x128xf32> to vector<8x32xf32>
    %731 = arith.negf %730 : vector<8x32xf32>
    %732 = math.exp %731 : vector<8x32xf32>
    %cst_195 = arith.constant 1.000000e+00 : f32
    %733 = vector.broadcast %cst_195 : f32 to vector<8x32xf32>
    %734 = arith.addf %733, %732 : vector<8x32xf32>
    %735 = arith.divf %733, %734 : vector<8x32xf32>
    %736 = arith.mulf %727, %587 : vector<8x32xf32>
    %737 = arith.mulf %721, %729 : vector<8x32xf32>
    %738 = arith.addf %736, %737 : vector<8x32xf32>
    %739 = math.tanh %738 : vector<8x32xf32>
    %740 = arith.mulf %735, %739 : vector<8x32xf32>
    %cst_196 = arith.constant 0.899999976 : f32
    %741 = vector.broadcast %cst_196 : f32 to vector<8x32xf32>
    %742 = arith.mulf %740, %741 : vector<8x32xf32>
    %cst_197 = arith.constant 1.000000e-01 : f32
    %743 = vector.broadcast %cst_197 : f32 to vector<8x32xf32>
    %744 = arith.mulf %743, %582 : vector<8x32xf32>
    %745 = arith.addf %742, %744 : vector<8x32xf32>
    %cst_198 = arith.constant 5.000000e-01 : f32
    %746 = vector.broadcast %cst_198 : f32 to vector<8x32xf32>
    %747 = arith.mulf %738, %746 : vector<8x32xf32>
    %cst_199 = arith.constant 5.000000e-01 : f32
    %748 = vector.broadcast %cst_199 : f32 to vector<8x32xf32>
    %749 = arith.mulf %748, %587 : vector<8x32xf32>
    %750 = arith.addf %747, %749 : vector<8x32xf32>
    %751 = tpu.concatenate %745, %706 in 1 : vector<8x32xf32>, vector<8x32xf32> -> vector<8x64xf32>
    %cst_200 = arith.constant dense<0.000000e+00> : vector<8x128xf32>
    %752 = tpu.matmul %751, %7, %cst_200 {dimension_numbers = #tpu.dot_dimension_numbers<[1], [0], [0], [1], [0, 0, 1, 1], [], []>} : vector<8x64xf32>, vector<64x128xf32>, vector<8x128xf32> -> vector<8x128xf32>
    %753 = vector.broadcast %8 : vector<1x128xf32> to vector<8x128xf32>
    %754 = arith.addf %752, %753 : vector<8x128xf32>
    %755 = vector.extract_strided_slice %754 {offsets = [0, 0], sizes = [8, 32], strides = [1, 1]} : vector<8x128xf32> to vector<8x32xf32>
    %756 = arith.negf %755 : vector<8x32xf32>
    %757 = math.exp %756 : vector<8x32xf32>
    %cst_201 = arith.constant 1.000000e+00 : f32
    %758 = vector.broadcast %cst_201 : f32 to vector<8x32xf32>
    %759 = arith.addf %758, %757 : vector<8x32xf32>
    %760 = arith.divf %758, %759 : vector<8x32xf32>
    %761 = vector.extract_strided_slice %754 {offsets = [0, 32], sizes = [8, 32], strides = [1, 1]} : vector<8x128xf32> to vector<8x32xf32>
    %762 = arith.negf %761 : vector<8x32xf32>
    %763 = math.exp %762 : vector<8x32xf32>
    %cst_202 = arith.constant 1.000000e+00 : f32
    %764 = vector.broadcast %cst_202 : f32 to vector<8x32xf32>
    %765 = arith.addf %764, %763 : vector<8x32xf32>
    %766 = arith.divf %764, %765 : vector<8x32xf32>
    %767 = vector.extract_strided_slice %754 {offsets = [0, 64], sizes = [8, 32], strides = [1, 1]} : vector<8x128xf32> to vector<8x32xf32>
    %768 = math.tanh %767 : vector<8x32xf32>
    %769 = vector.extract_strided_slice %754 {offsets = [0, 96], sizes = [8, 32], strides = [1, 1]} : vector<8x128xf32> to vector<8x32xf32>
    %770 = arith.negf %769 : vector<8x32xf32>
    %771 = math.exp %770 : vector<8x32xf32>
    %cst_203 = arith.constant 1.000000e+00 : f32
    %772 = vector.broadcast %cst_203 : f32 to vector<8x32xf32>
    %773 = arith.addf %772, %771 : vector<8x32xf32>
    %774 = arith.divf %772, %773 : vector<8x32xf32>
    %775 = arith.mulf %766, %711 : vector<8x32xf32>
    %776 = arith.mulf %760, %768 : vector<8x32xf32>
    %777 = arith.addf %775, %776 : vector<8x32xf32>
    %778 = math.tanh %777 : vector<8x32xf32>
    %779 = arith.mulf %774, %778 : vector<8x32xf32>
    %cst_204 = arith.constant 0.899999976 : f32
    %780 = vector.broadcast %cst_204 : f32 to vector<8x32xf32>
    %781 = arith.mulf %779, %780 : vector<8x32xf32>
    %cst_205 = arith.constant 1.000000e-01 : f32
    %782 = vector.broadcast %cst_205 : f32 to vector<8x32xf32>
    %783 = arith.mulf %782, %706 : vector<8x32xf32>
    %784 = arith.addf %781, %783 : vector<8x32xf32>
    %cst_206 = arith.constant 5.000000e-01 : f32
    %785 = vector.broadcast %cst_206 : f32 to vector<8x32xf32>
    %786 = arith.mulf %777, %785 : vector<8x32xf32>
    %cst_207 = arith.constant 5.000000e-01 : f32
    %787 = vector.broadcast %cst_207 : f32 to vector<8x32xf32>
    %788 = arith.mulf %787, %711 : vector<8x32xf32>
    %789 = arith.addf %786, %788 : vector<8x32xf32>
    %cst_208 = arith.constant dense<0.000000e+00> : vector<8x128xf32>
    %790 = tpu.matmul %784, %12, %cst_208 {dimension_numbers = #tpu.dot_dimension_numbers<[1], [0], [0], [1], [0, 0, 1, 1], [], []>} : vector<8x32xf32>, vector<32x128xf32>, vector<8x128xf32> -> vector<8x128xf32>
    %791 = vector.broadcast %14 : vector<1x128xf32> to vector<8x128xf32>
    %792 = arith.addf %790, %791 : vector<8x128xf32>
    %793 = vector.extract_strided_slice %792 {offsets = [0, 0], sizes = [8, 32], strides = [1, 1]} : vector<8x128xf32> to vector<8x32xf32>
    %794 = arith.negf %793 : vector<8x32xf32>
    %795 = math.exp %794 : vector<8x32xf32>
    %cst_209 = arith.constant 1.000000e+00 : f32
    %796 = vector.broadcast %cst_209 : f32 to vector<8x32xf32>
    %797 = arith.addf %796, %795 : vector<8x32xf32>
    %798 = arith.divf %796, %797 : vector<8x32xf32>
    %799 = vector.extract_strided_slice %792 {offsets = [0, 32], sizes = [8, 32], strides = [1, 1]} : vector<8x128xf32> to vector<8x32xf32>
    %800 = arith.negf %799 : vector<8x32xf32>
    %801 = math.exp %800 : vector<8x32xf32>
    %cst_210 = arith.constant 1.000000e+00 : f32
    %802 = vector.broadcast %cst_210 : f32 to vector<8x32xf32>
    %803 = arith.addf %802, %801 : vector<8x32xf32>
    %804 = arith.divf %802, %803 : vector<8x32xf32>
    %805 = vector.extract_strided_slice %792 {offsets = [0, 64], sizes = [8, 32], strides = [1, 1]} : vector<8x128xf32> to vector<8x32xf32>
    %806 = math.tanh %805 : vector<8x32xf32>
    %807 = vector.extract_strided_slice %792 {offsets = [0, 96], sizes = [8, 32], strides = [1, 1]} : vector<8x128xf32> to vector<8x32xf32>
    %808 = arith.negf %807 : vector<8x32xf32>
    %809 = math.exp %808 : vector<8x32xf32>
    %cst_211 = arith.constant 1.000000e+00 : f32
    %810 = vector.broadcast %cst_211 : f32 to vector<8x32xf32>
    %811 = arith.addf %810, %809 : vector<8x32xf32>
    %812 = arith.divf %810, %811 : vector<8x32xf32>
    %813 = arith.mulf %804, %789 : vector<8x32xf32>
    %814 = arith.mulf %798, %806 : vector<8x32xf32>
    %815 = arith.addf %813, %814 : vector<8x32xf32>
    %816 = math.tanh %815 : vector<8x32xf32>
    %817 = arith.mulf %812, %816 : vector<8x32xf32>
    %cst_212 = arith.constant 0.899999976 : f32
    %818 = vector.broadcast %cst_212 : f32 to vector<8x32xf32>
    %819 = arith.mulf %817, %818 : vector<8x32xf32>
    %cst_213 = arith.constant 1.000000e-01 : f32
    %820 = vector.broadcast %cst_213 : f32 to vector<8x32xf32>
    %821 = arith.mulf %820, %784 : vector<8x32xf32>
    %822 = arith.addf %819, %821 : vector<8x32xf32>
    %cst_214 = arith.constant 5.000000e-01 : f32
    %823 = vector.broadcast %cst_214 : f32 to vector<8x32xf32>
    %824 = arith.mulf %815, %823 : vector<8x32xf32>
    %cst_215 = arith.constant 5.000000e-01 : f32
    %825 = vector.broadcast %cst_215 : f32 to vector<8x32xf32>
    %826 = arith.mulf %825, %789 : vector<8x32xf32>
    %827 = arith.addf %824, %826 : vector<8x32xf32>
    %cst_216 = arith.constant dense<0.000000e+00> : vector<8x128xf32>
    %828 = tpu.matmul %822, %9, %cst_216 {dimension_numbers = #tpu.dot_dimension_numbers<[1], [0], [0], [1], [0, 0, 1, 1], [], []>} : vector<8x32xf32>, vector<32x128xf32>, vector<8x128xf32> -> vector<8x128xf32>
    %829 = vector.broadcast %10 : vector<1x128xf32> to vector<8x128xf32>
    %830 = arith.addf %828, %829 : vector<8x128xf32>
    %c4_217 = arith.constant 4 : index
    %c0_218 = arith.constant 0 : index
    %c0_219 = arith.constant 0 : index
    %831 = vector.load %arg13[%c4_217, %c0_218, %c0_219] : memref<8x8x128xf32, #tpu.memory_space<vmem>>, vector<1x8x128xf32>
    %832 = vector.shape_cast %831 : vector<1x8x128xf32> to vector<8x128xf32>
    %833 = vector.shape_cast %830 : vector<8x128xf32> to vector<1x8x128xf32>
    tpu.vector_store %arg13[%c4_217, %c0_218, %c0_219], %833 {strides = array<i32>} : memref<8x8x128xf32, #tpu.memory_space<vmem>>, vector<1x8x128xf32>,
    %c5 = arith.constant 5 : index
    %c0_220 = arith.constant 0 : index
    %c0_221 = arith.constant 0 : index
    %834 = vector.load %arg1[%c5, %c0_220, %c0_221] : memref<8x8x32xf32, #tpu.memory_space<vmem>>, vector<1x8x32xf32>
    %835 = vector.shape_cast %834 : vector<1x8x32xf32> to vector<8x32xf32>
    %836 = tpu.concatenate %835, %822 in 1 : vector<8x32xf32>, vector<8x32xf32> -> vector<8x64xf32>
    %cst_222 = arith.constant dense<0.000000e+00> : vector<8x128xf32>
    %837 = tpu.matmul %836, %3, %cst_222 {dimension_numbers = #tpu.dot_dimension_numbers<[1], [0], [0], [1], [0, 0, 1, 1], [], []>} : vector<8x64xf32>, vector<64x128xf32>, vector<8x128xf32> -> vector<8x128xf32>
    %838 = vector.broadcast %4 : vector<1x128xf32> to vector<8x128xf32>
    %839 = arith.addf %837, %838 : vector<8x128xf32>
    %840 = vector.extract_strided_slice %839 {offsets = [0, 0], sizes = [8, 32], strides = [1, 1]} : vector<8x128xf32> to vector<8x32xf32>
    %841 = arith.negf %840 : vector<8x32xf32>
    %842 = math.exp %841 : vector<8x32xf32>
    %cst_223 = arith.constant 1.000000e+00 : f32
    %843 = vector.broadcast %cst_223 : f32 to vector<8x32xf32>
    %844 = arith.addf %843, %842 : vector<8x32xf32>
    %845 = arith.divf %843, %844 : vector<8x32xf32>
    %846 = vector.extract_strided_slice %839 {offsets = [0, 32], sizes = [8, 32], strides = [1, 1]} : vector<8x128xf32> to vector<8x32xf32>
    %847 = arith.negf %846 : vector<8x32xf32>
    %848 = math.exp %847 : vector<8x32xf32>
    %cst_224 = arith.constant 1.000000e+00 : f32
    %849 = vector.broadcast %cst_224 : f32 to vector<8x32xf32>
    %850 = arith.addf %849, %848 : vector<8x32xf32>
    %851 = arith.divf %849, %850 : vector<8x32xf32>
    %852 = vector.extract_strided_slice %839 {offsets = [0, 64], sizes = [8, 32], strides = [1, 1]} : vector<8x128xf32> to vector<8x32xf32>
    %853 = math.tanh %852 : vector<8x32xf32>
    %854 = vector.extract_strided_slice %839 {offsets = [0, 96], sizes = [8, 32], strides = [1, 1]} : vector<8x128xf32> to vector<8x32xf32>
    %855 = arith.negf %854 : vector<8x32xf32>
    %856 = math.exp %855 : vector<8x32xf32>
    %cst_225 = arith.constant 1.000000e+00 : f32
    %857 = vector.broadcast %cst_225 : f32 to vector<8x32xf32>
    %858 = arith.addf %857, %856 : vector<8x32xf32>
    %859 = arith.divf %857, %858 : vector<8x32xf32>
    %860 = arith.mulf %851, %827 : vector<8x32xf32>
    %861 = arith.mulf %845, %853 : vector<8x32xf32>
    %862 = arith.addf %860, %861 : vector<8x32xf32>
    %863 = math.tanh %862 : vector<8x32xf32>
    %864 = arith.mulf %859, %863 : vector<8x32xf32>
    %cst_226 = arith.constant 0.899999976 : f32
    %865 = vector.broadcast %cst_226 : f32 to vector<8x32xf32>
    %866 = arith.mulf %864, %865 : vector<8x32xf32>
    %cst_227 = arith.constant 1.000000e-01 : f32
    %867 = vector.broadcast %cst_227 : f32 to vector<8x32xf32>
    %868 = arith.mulf %867, %822 : vector<8x32xf32>
    %869 = arith.addf %866, %868 : vector<8x32xf32>
    %cst_228 = arith.constant 5.000000e-01 : f32
    %870 = vector.broadcast %cst_228 : f32 to vector<8x32xf32>
    %871 = arith.mulf %862, %870 : vector<8x32xf32>
    %cst_229 = arith.constant 5.000000e-01 : f32
    %872 = vector.broadcast %cst_229 : f32 to vector<8x32xf32>
    %873 = arith.mulf %872, %827 : vector<8x32xf32>
    %874 = arith.addf %871, %873 : vector<8x32xf32>
    %875 = tpu.concatenate %869, %745 in 1 : vector<8x32xf32>, vector<8x32xf32> -> vector<8x64xf32>
    %cst_230 = arith.constant dense<0.000000e+00> : vector<8x128xf32>
    %876 = tpu.matmul %875, %5, %cst_230 {dimension_numbers = #tpu.dot_dimension_numbers<[1], [0], [0], [1], [0, 0, 1, 1], [], []>} : vector<8x64xf32>, vector<64x128xf32>, vector<8x128xf32> -> vector<8x128xf32>
    %877 = vector.broadcast %6 : vector<1x128xf32> to vector<8x128xf32>
    %878 = arith.addf %876, %877 : vector<8x128xf32>
    %879 = vector.extract_strided_slice %878 {offsets = [0, 0], sizes = [8, 32], strides = [1, 1]} : vector<8x128xf32> to vector<8x32xf32>
    %880 = arith.negf %879 : vector<8x32xf32>
    %881 = math.exp %880 : vector<8x32xf32>
    %cst_231 = arith.constant 1.000000e+00 : f32
    %882 = vector.broadcast %cst_231 : f32 to vector<8x32xf32>
    %883 = arith.addf %882, %881 : vector<8x32xf32>
    %884 = arith.divf %882, %883 : vector<8x32xf32>
    %885 = vector.extract_strided_slice %878 {offsets = [0, 32], sizes = [8, 32], strides = [1, 1]} : vector<8x128xf32> to vector<8x32xf32>
    %886 = arith.negf %885 : vector<8x32xf32>
    %887 = math.exp %886 : vector<8x32xf32>
    %cst_232 = arith.constant 1.000000e+00 : f32
    %888 = vector.broadcast %cst_232 : f32 to vector<8x32xf32>
    %889 = arith.addf %888, %887 : vector<8x32xf32>
    %890 = arith.divf %888, %889 : vector<8x32xf32>
    %891 = vector.extract_strided_slice %878 {offsets = [0, 64], sizes = [8, 32], strides = [1, 1]} : vector<8x128xf32> to vector<8x32xf32>
    %892 = math.tanh %891 : vector<8x32xf32>
    %893 = vector.extract_strided_slice %878 {offsets = [0, 96], sizes = [8, 32], strides = [1, 1]} : vector<8x128xf32> to vector<8x32xf32>
    %894 = arith.negf %893 : vector<8x32xf32>
    %895 = math.exp %894 : vector<8x32xf32>
    %cst_233 = arith.constant 1.000000e+00 : f32
    %896 = vector.broadcast %cst_233 : f32 to vector<8x32xf32>
    %897 = arith.addf %896, %895 : vector<8x32xf32>
    %898 = arith.divf %896, %897 : vector<8x32xf32>
    %899 = arith.mulf %890, %750 : vector<8x32xf32>
    %900 = arith.mulf %884, %892 : vector<8x32xf32>
    %901 = arith.addf %899, %900 : vector<8x32xf32>
    %902 = math.tanh %901 : vector<8x32xf32>
    %903 = arith.mulf %898, %902 : vector<8x32xf32>
    %cst_234 = arith.constant 0.899999976 : f32
    %904 = vector.broadcast %cst_234 : f32 to vector<8x32xf32>
    %905 = arith.mulf %903, %904 : vector<8x32xf32>
    %cst_235 = arith.constant 1.000000e-01 : f32
    %906 = vector.broadcast %cst_235 : f32 to vector<8x32xf32>
    %907 = arith.mulf %906, %745 : vector<8x32xf32>
    %908 = arith.addf %905, %907 : vector<8x32xf32>
    %cst_236 = arith.constant 5.000000e-01 : f32
    %909 = vector.broadcast %cst_236 : f32 to vector<8x32xf32>
    %910 = arith.mulf %901, %909 : vector<8x32xf32>
    %cst_237 = arith.constant 5.000000e-01 : f32
    %911 = vector.broadcast %cst_237 : f32 to vector<8x32xf32>
    %912 = arith.mulf %911, %750 : vector<8x32xf32>
    %913 = arith.addf %910, %912 : vector<8x32xf32>
    %914 = tpu.concatenate %908, %869 in 1 : vector<8x32xf32>, vector<8x32xf32> -> vector<8x64xf32>
    %cst_238 = arith.constant dense<0.000000e+00> : vector<8x128xf32>
    %915 = tpu.matmul %914, %7, %cst_238 {dimension_numbers = #tpu.dot_dimension_numbers<[1], [0], [0], [1], [0, 0, 1, 1], [], []>} : vector<8x64xf32>, vector<64x128xf32>, vector<8x128xf32> -> vector<8x128xf32>
    %916 = vector.broadcast %8 : vector<1x128xf32> to vector<8x128xf32>
    %917 = arith.addf %915, %916 : vector<8x128xf32>
    %918 = vector.extract_strided_slice %917 {offsets = [0, 0], sizes = [8, 32], strides = [1, 1]} : vector<8x128xf32> to vector<8x32xf32>
    %919 = arith.negf %918 : vector<8x32xf32>
    %920 = math.exp %919 : vector<8x32xf32>
    %cst_239 = arith.constant 1.000000e+00 : f32
    %921 = vector.broadcast %cst_239 : f32 to vector<8x32xf32>
    %922 = arith.addf %921, %920 : vector<8x32xf32>
    %923 = arith.divf %921, %922 : vector<8x32xf32>
    %924 = vector.extract_strided_slice %917 {offsets = [0, 32], sizes = [8, 32], strides = [1, 1]} : vector<8x128xf32> to vector<8x32xf32>
    %925 = arith.negf %924 : vector<8x32xf32>
    %926 = math.exp %925 : vector<8x32xf32>
    %cst_240 = arith.constant 1.000000e+00 : f32
    %927 = vector.broadcast %cst_240 : f32 to vector<8x32xf32>
    %928 = arith.addf %927, %926 : vector<8x32xf32>
    %929 = arith.divf %927, %928 : vector<8x32xf32>
    %930 = vector.extract_strided_slice %917 {offsets = [0, 64], sizes = [8, 32], strides = [1, 1]} : vector<8x128xf32> to vector<8x32xf32>
    %931 = math.tanh %930 : vector<8x32xf32>
    %932 = vector.extract_strided_slice %917 {offsets = [0, 96], sizes = [8, 32], strides = [1, 1]} : vector<8x128xf32> to vector<8x32xf32>
    %933 = arith.negf %932 : vector<8x32xf32>
    %934 = math.exp %933 : vector<8x32xf32>
    %cst_241 = arith.constant 1.000000e+00 : f32
    %935 = vector.broadcast %cst_241 : f32 to vector<8x32xf32>
    %936 = arith.addf %935, %934 : vector<8x32xf32>
    %937 = arith.divf %935, %936 : vector<8x32xf32>
    %938 = arith.mulf %929, %874 : vector<8x32xf32>
    %939 = arith.mulf %923, %931 : vector<8x32xf32>
    %940 = arith.addf %938, %939 : vector<8x32xf32>
    %941 = math.tanh %940 : vector<8x32xf32>
    %942 = arith.mulf %937, %941 : vector<8x32xf32>
    %cst_242 = arith.constant 0.899999976 : f32
    %943 = vector.broadcast %cst_242 : f32 to vector<8x32xf32>
    %944 = arith.mulf %942, %943 : vector<8x32xf32>
    %cst_243 = arith.constant 1.000000e-01 : f32
    %945 = vector.broadcast %cst_243 : f32 to vector<8x32xf32>
    %946 = arith.mulf %945, %869 : vector<8x32xf32>
    %947 = arith.addf %944, %946 : vector<8x32xf32>
    %cst_244 = arith.constant 5.000000e-01 : f32
    %948 = vector.broadcast %cst_244 : f32 to vector<8x32xf32>
    %949 = arith.mulf %940, %948 : vector<8x32xf32>
    %cst_245 = arith.constant 5.000000e-01 : f32
    %950 = vector.broadcast %cst_245 : f32 to vector<8x32xf32>
    %951 = arith.mulf %950, %874 : vector<8x32xf32>
    %952 = arith.addf %949, %951 : vector<8x32xf32>
    %cst_246 = arith.constant dense<0.000000e+00> : vector<8x128xf32>
    %953 = tpu.matmul %947, %12, %cst_246 {dimension_numbers = #tpu.dot_dimension_numbers<[1], [0], [0], [1], [0, 0, 1, 1], [], []>} : vector<8x32xf32>, vector<32x128xf32>, vector<8x128xf32> -> vector<8x128xf32>
    %954 = vector.broadcast %14 : vector<1x128xf32> to vector<8x128xf32>
    %955 = arith.addf %953, %954 : vector<8x128xf32>
    %956 = vector.extract_strided_slice %955 {offsets = [0, 0], sizes = [8, 32], strides = [1, 1]} : vector<8x128xf32> to vector<8x32xf32>
    %957 = arith.negf %956 : vector<8x32xf32>
    %958 = math.exp %957 : vector<8x32xf32>
    %cst_247 = arith.constant 1.000000e+00 : f32
    %959 = vector.broadcast %cst_247 : f32 to vector<8x32xf32>
    %960 = arith.addf %959, %958 : vector<8x32xf32>
    %961 = arith.divf %959, %960 : vector<8x32xf32>
    %962 = vector.extract_strided_slice %955 {offsets = [0, 32], sizes = [8, 32], strides = [1, 1]} : vector<8x128xf32> to vector<8x32xf32>
    %963 = arith.negf %962 : vector<8x32xf32>
    %964 = math.exp %963 : vector<8x32xf32>
    %cst_248 = arith.constant 1.000000e+00 : f32
    %965 = vector.broadcast %cst_248 : f32 to vector<8x32xf32>
    %966 = arith.addf %965, %964 : vector<8x32xf32>
    %967 = arith.divf %965, %966 : vector<8x32xf32>
    %968 = vector.extract_strided_slice %955 {offsets = [0, 64], sizes = [8, 32], strides = [1, 1]} : vector<8x128xf32> to vector<8x32xf32>
    %969 = math.tanh %968 : vector<8x32xf32>
    %970 = vector.extract_strided_slice %955 {offsets = [0, 96], sizes = [8, 32], strides = [1, 1]} : vector<8x128xf32> to vector<8x32xf32>
    %971 = arith.negf %970 : vector<8x32xf32>
    %972 = math.exp %971 : vector<8x32xf32>
    %cst_249 = arith.constant 1.000000e+00 : f32
    %973 = vector.broadcast %cst_249 : f32 to vector<8x32xf32>
    %974 = arith.addf %973, %972 : vector<8x32xf32>
    %975 = arith.divf %973, %974 : vector<8x32xf32>
    %976 = arith.mulf %967, %952 : vector<8x32xf32>
    %977 = arith.mulf %961, %969 : vector<8x32xf32>
    %978 = arith.addf %976, %977 : vector<8x32xf32>
    %979 = math.tanh %978 : vector<8x32xf32>
    %980 = arith.mulf %975, %979 : vector<8x32xf32>
    %cst_250 = arith.constant 0.899999976 : f32
    %981 = vector.broadcast %cst_250 : f32 to vector<8x32xf32>
    %982 = arith.mulf %980, %981 : vector<8x32xf32>
    %cst_251 = arith.constant 1.000000e-01 : f32
    %983 = vector.broadcast %cst_251 : f32 to vector<8x32xf32>
    %984 = arith.mulf %983, %947 : vector<8x32xf32>
    %985 = arith.addf %982, %984 : vector<8x32xf32>
    %cst_252 = arith.constant 5.000000e-01 : f32
    %986 = vector.broadcast %cst_252 : f32 to vector<8x32xf32>
    %987 = arith.mulf %978, %986 : vector<8x32xf32>
    %cst_253 = arith.constant 5.000000e-01 : f32
    %988 = vector.broadcast %cst_253 : f32 to vector<8x32xf32>
    %989 = arith.mulf %988, %952 : vector<8x32xf32>
    %990 = arith.addf %987, %989 : vector<8x32xf32>
    %cst_254 = arith.constant dense<0.000000e+00> : vector<8x128xf32>
    %991 = tpu.matmul %985, %9, %cst_254 {dimension_numbers = #tpu.dot_dimension_numbers<[1], [0], [0], [1], [0, 0, 1, 1], [], []>} : vector<8x32xf32>, vector<32x128xf32>, vector<8x128xf32> -> vector<8x128xf32>
    %992 = vector.broadcast %10 : vector<1x128xf32> to vector<8x128xf32>
    %993 = arith.addf %991, %992 : vector<8x128xf32>
    %c5_255 = arith.constant 5 : index
    %c0_256 = arith.constant 0 : index
    %c0_257 = arith.constant 0 : index
    %994 = vector.load %arg13[%c5_255, %c0_256, %c0_257] : memref<8x8x128xf32, #tpu.memory_space<vmem>>, vector<1x8x128xf32>
    %995 = vector.shape_cast %994 : vector<1x8x128xf32> to vector<8x128xf32>
    %996 = vector.shape_cast %993 : vector<8x128xf32> to vector<1x8x128xf32>
    tpu.vector_store %arg13[%c5_255, %c0_256, %c0_257], %996 {strides = array<i32>} : memref<8x8x128xf32, #tpu.memory_space<vmem>>, vector<1x8x128xf32>,
    %c6 = arith.constant 6 : index
    %c0_258 = arith.constant 0 : index
    %c0_259 = arith.constant 0 : index
    %997 = vector.load %arg1[%c6, %c0_258, %c0_259] : memref<8x8x32xf32, #tpu.memory_space<vmem>>, vector<1x8x32xf32>
    %998 = vector.shape_cast %997 : vector<1x8x32xf32> to vector<8x32xf32>
    %999 = tpu.concatenate %998, %985 in 1 : vector<8x32xf32>, vector<8x32xf32> -> vector<8x64xf32>
    %cst_260 = arith.constant dense<0.000000e+00> : vector<8x128xf32>
    %1000 = tpu.matmul %999, %3, %cst_260 {dimension_numbers = #tpu.dot_dimension_numbers<[1], [0], [0], [1], [0, 0, 1, 1], [], []>} : vector<8x64xf32>, vector<64x128xf32>, vector<8x128xf32> -> vector<8x128xf32>
    %1001 = vector.broadcast %4 : vector<1x128xf32> to vector<8x128xf32>
    %1002 = arith.addf %1000, %1001 : vector<8x128xf32>
    %1003 = vector.extract_strided_slice %1002 {offsets = [0, 0], sizes = [8, 32], strides = [1, 1]} : vector<8x128xf32> to vector<8x32xf32>
    %1004 = arith.negf %1003 : vector<8x32xf32>
    %1005 = math.exp %1004 : vector<8x32xf32>
    %cst_261 = arith.constant 1.000000e+00 : f32
    %1006 = vector.broadcast %cst_261 : f32 to vector<8x32xf32>
    %1007 = arith.addf %1006, %1005 : vector<8x32xf32>
    %1008 = arith.divf %1006, %1007 : vector<8x32xf32>
    %1009 = vector.extract_strided_slice %1002 {offsets = [0, 32], sizes = [8, 32], strides = [1, 1]} : vector<8x128xf32> to vector<8x32xf32>
    %1010 = arith.negf %1009 : vector<8x32xf32>
    %1011 = math.exp %1010 : vector<8x32xf32>
    %cst_262 = arith.constant 1.000000e+00 : f32
    %1012 = vector.broadcast %cst_262 : f32 to vector<8x32xf32>
    %1013 = arith.addf %1012, %1011 : vector<8x32xf32>
    %1014 = arith.divf %1012, %1013 : vector<8x32xf32>
    %1015 = vector.extract_strided_slice %1002 {offsets = [0, 64], sizes = [8, 32], strides = [1, 1]} : vector<8x128xf32> to vector<8x32xf32>
    %1016 = math.tanh %1015 : vector<8x32xf32>
    %1017 = vector.extract_strided_slice %1002 {offsets = [0, 96], sizes = [8, 32], strides = [1, 1]} : vector<8x128xf32> to vector<8x32xf32>
    %1018 = arith.negf %1017 : vector<8x32xf32>
    %1019 = math.exp %1018 : vector<8x32xf32>
    %cst_263 = arith.constant 1.000000e+00 : f32
    %1020 = vector.broadcast %cst_263 : f32 to vector<8x32xf32>
    %1021 = arith.addf %1020, %1019 : vector<8x32xf32>
    %1022 = arith.divf %1020, %1021 : vector<8x32xf32>
    %1023 = arith.mulf %1014, %990 : vector<8x32xf32>
    %1024 = arith.mulf %1008, %1016 : vector<8x32xf32>
    %1025 = arith.addf %1023, %1024 : vector<8x32xf32>
    %1026 = math.tanh %1025 : vector<8x32xf32>
    %1027 = arith.mulf %1022, %1026 : vector<8x32xf32>
    %cst_264 = arith.constant 0.899999976 : f32
    %1028 = vector.broadcast %cst_264 : f32 to vector<8x32xf32>
    %1029 = arith.mulf %1027, %1028 : vector<8x32xf32>
    %cst_265 = arith.constant 1.000000e-01 : f32
    %1030 = vector.broadcast %cst_265 : f32 to vector<8x32xf32>
    %1031 = arith.mulf %1030, %985 : vector<8x32xf32>
    %1032 = arith.addf %1029, %1031 : vector<8x32xf32>
    %cst_266 = arith.constant 5.000000e-01 : f32
    %1033 = vector.broadcast %cst_266 : f32 to vector<8x32xf32>
    %1034 = arith.mulf %1025, %1033 : vector<8x32xf32>
    %cst_267 = arith.constant 5.000000e-01 : f32
    %1035 = vector.broadcast %cst_267 : f32 to vector<8x32xf32>
    %1036 = arith.mulf %1035, %990 : vector<8x32xf32>
    %1037 = arith.addf %1034, %1036 : vector<8x32xf32>
    %1038 = tpu.concatenate %1032, %908 in 1 : vector<8x32xf32>, vector<8x32xf32> -> vector<8x64xf32>
    %cst_268 = arith.constant dense<0.000000e+00> : vector<8x128xf32>
    %1039 = tpu.matmul %1038, %5, %cst_268 {dimension_numbers = #tpu.dot_dimension_numbers<[1], [0], [0], [1], [0, 0, 1, 1], [], []>} : vector<8x64xf32>, vector<64x128xf32>, vector<8x128xf32> -> vector<8x128xf32>
    %1040 = vector.broadcast %6 : vector<1x128xf32> to vector<8x128xf32>
    %1041 = arith.addf %1039, %1040 : vector<8x128xf32>
    %1042 = vector.extract_strided_slice %1041 {offsets = [0, 0], sizes = [8, 32], strides = [1, 1]} : vector<8x128xf32> to vector<8x32xf32>
    %1043 = arith.negf %1042 : vector<8x32xf32>
    %1044 = math.exp %1043 : vector<8x32xf32>
    %cst_269 = arith.constant 1.000000e+00 : f32
    %1045 = vector.broadcast %cst_269 : f32 to vector<8x32xf32>
    %1046 = arith.addf %1045, %1044 : vector<8x32xf32>
    %1047 = arith.divf %1045, %1046 : vector<8x32xf32>
    %1048 = vector.extract_strided_slice %1041 {offsets = [0, 32], sizes = [8, 32], strides = [1, 1]} : vector<8x128xf32> to vector<8x32xf32>
    %1049 = arith.negf %1048 : vector<8x32xf32>
    %1050 = math.exp %1049 : vector<8x32xf32>
    %cst_270 = arith.constant 1.000000e+00 : f32
    %1051 = vector.broadcast %cst_270 : f32 to vector<8x32xf32>
    %1052 = arith.addf %1051, %1050 : vector<8x32xf32>
    %1053 = arith.divf %1051, %1052 : vector<8x32xf32>
    %1054 = vector.extract_strided_slice %1041 {offsets = [0, 64], sizes = [8, 32], strides = [1, 1]} : vector<8x128xf32> to vector<8x32xf32>
    %1055 = math.tanh %1054 : vector<8x32xf32>
    %1056 = vector.extract_strided_slice %1041 {offsets = [0, 96], sizes = [8, 32], strides = [1, 1]} : vector<8x128xf32> to vector<8x32xf32>
    %1057 = arith.negf %1056 : vector<8x32xf32>
    %1058 = math.exp %1057 : vector<8x32xf32>
    %cst_271 = arith.constant 1.000000e+00 : f32
    %1059 = vector.broadcast %cst_271 : f32 to vector<8x32xf32>
    %1060 = arith.addf %1059, %1058 : vector<8x32xf32>
    %1061 = arith.divf %1059, %1060 : vector<8x32xf32>
    %1062 = arith.mulf %1053, %913 : vector<8x32xf32>
    %1063 = arith.mulf %1047, %1055 : vector<8x32xf32>
    %1064 = arith.addf %1062, %1063 : vector<8x32xf32>
    %1065 = math.tanh %1064 : vector<8x32xf32>
    %1066 = arith.mulf %1061, %1065 : vector<8x32xf32>
    %cst_272 = arith.constant 0.899999976 : f32
    %1067 = vector.broadcast %cst_272 : f32 to vector<8x32xf32>
    %1068 = arith.mulf %1066, %1067 : vector<8x32xf32>
    %cst_273 = arith.constant 1.000000e-01 : f32
    %1069 = vector.broadcast %cst_273 : f32 to vector<8x32xf32>
    %1070 = arith.mulf %1069, %908 : vector<8x32xf32>
    %1071 = arith.addf %1068, %1070 : vector<8x32xf32>
    %cst_274 = arith.constant 5.000000e-01 : f32
    %1072 = vector.broadcast %cst_274 : f32 to vector<8x32xf32>
    %1073 = arith.mulf %1064, %1072 : vector<8x32xf32>
    %cst_275 = arith.constant 5.000000e-01 : f32
    %1074 = vector.broadcast %cst_275 : f32 to vector<8x32xf32>
    %1075 = arith.mulf %1074, %913 : vector<8x32xf32>
    %1076 = arith.addf %1073, %1075 : vector<8x32xf32>
    %1077 = tpu.concatenate %1071, %1032 in 1 : vector<8x32xf32>, vector<8x32xf32> -> vector<8x64xf32>
    %cst_276 = arith.constant dense<0.000000e+00> : vector<8x128xf32>
    %1078 = tpu.matmul %1077, %7, %cst_276 {dimension_numbers = #tpu.dot_dimension_numbers<[1], [0], [0], [1], [0, 0, 1, 1], [], []>} : vector<8x64xf32>, vector<64x128xf32>, vector<8x128xf32> -> vector<8x128xf32>
    %1079 = vector.broadcast %8 : vector<1x128xf32> to vector<8x128xf32>
    %1080 = arith.addf %1078, %1079 : vector<8x128xf32>
    %1081 = vector.extract_strided_slice %1080 {offsets = [0, 0], sizes = [8, 32], strides = [1, 1]} : vector<8x128xf32> to vector<8x32xf32>
    %1082 = arith.negf %1081 : vector<8x32xf32>
    %1083 = math.exp %1082 : vector<8x32xf32>
    %cst_277 = arith.constant 1.000000e+00 : f32
    %1084 = vector.broadcast %cst_277 : f32 to vector<8x32xf32>
    %1085 = arith.addf %1084, %1083 : vector<8x32xf32>
    %1086 = arith.divf %1084, %1085 : vector<8x32xf32>
    %1087 = vector.extract_strided_slice %1080 {offsets = [0, 32], sizes = [8, 32], strides = [1, 1]} : vector<8x128xf32> to vector<8x32xf32>
    %1088 = arith.negf %1087 : vector<8x32xf32>
    %1089 = math.exp %1088 : vector<8x32xf32>
    %cst_278 = arith.constant 1.000000e+00 : f32
    %1090 = vector.broadcast %cst_278 : f32 to vector<8x32xf32>
    %1091 = arith.addf %1090, %1089 : vector<8x32xf32>
    %1092 = arith.divf %1090, %1091 : vector<8x32xf32>
    %1093 = vector.extract_strided_slice %1080 {offsets = [0, 64], sizes = [8, 32], strides = [1, 1]} : vector<8x128xf32> to vector<8x32xf32>
    %1094 = math.tanh %1093 : vector<8x32xf32>
    %1095 = vector.extract_strided_slice %1080 {offsets = [0, 96], sizes = [8, 32], strides = [1, 1]} : vector<8x128xf32> to vector<8x32xf32>
    %1096 = arith.negf %1095 : vector<8x32xf32>
    %1097 = math.exp %1096 : vector<8x32xf32>
    %cst_279 = arith.constant 1.000000e+00 : f32
    %1098 = vector.broadcast %cst_279 : f32 to vector<8x32xf32>
    %1099 = arith.addf %1098, %1097 : vector<8x32xf32>
    %1100 = arith.divf %1098, %1099 : vector<8x32xf32>
    %1101 = arith.mulf %1092, %1037 : vector<8x32xf32>
    %1102 = arith.mulf %1086, %1094 : vector<8x32xf32>
    %1103 = arith.addf %1101, %1102 : vector<8x32xf32>
    %1104 = math.tanh %1103 : vector<8x32xf32>
    %1105 = arith.mulf %1100, %1104 : vector<8x32xf32>
    %cst_280 = arith.constant 0.899999976 : f32
    %1106 = vector.broadcast %cst_280 : f32 to vector<8x32xf32>
    %1107 = arith.mulf %1105, %1106 : vector<8x32xf32>
    %cst_281 = arith.constant 1.000000e-01 : f32
    %1108 = vector.broadcast %cst_281 : f32 to vector<8x32xf32>
    %1109 = arith.mulf %1108, %1032 : vector<8x32xf32>
    %1110 = arith.addf %1107, %1109 : vector<8x32xf32>
    %cst_282 = arith.constant 5.000000e-01 : f32
    %1111 = vector.broadcast %cst_282 : f32 to vector<8x32xf32>
    %1112 = arith.mulf %1103, %1111 : vector<8x32xf32>
    %cst_283 = arith.constant 5.000000e-01 : f32
    %1113 = vector.broadcast %cst_283 : f32 to vector<8x32xf32>
    %1114 = arith.mulf %1113, %1037 : vector<8x32xf32>
    %1115 = arith.addf %1112, %1114 : vector<8x32xf32>
    %cst_284 = arith.constant dense<0.000000e+00> : vector<8x128xf32>
    %1116 = tpu.matmul %1110, %12, %cst_284 {dimension_numbers = #tpu.dot_dimension_numbers<[1], [0], [0], [1], [0, 0, 1, 1], [], []>} : vector<8x32xf32>, vector<32x128xf32>, vector<8x128xf32> -> vector<8x128xf32>
    %1117 = vector.broadcast %14 : vector<1x128xf32> to vector<8x128xf32>
    %1118 = arith.addf %1116, %1117 : vector<8x128xf32>
    %1119 = vector.extract_strided_slice %1118 {offsets = [0, 0], sizes = [8, 32], strides = [1, 1]} : vector<8x128xf32> to vector<8x32xf32>
    %1120 = arith.negf %1119 : vector<8x32xf32>
    %1121 = math.exp %1120 : vector<8x32xf32>
    %cst_285 = arith.constant 1.000000e+00 : f32
    %1122 = vector.broadcast %cst_285 : f32 to vector<8x32xf32>
    %1123 = arith.addf %1122, %1121 : vector<8x32xf32>
    %1124 = arith.divf %1122, %1123 : vector<8x32xf32>
    %1125 = vector.extract_strided_slice %1118 {offsets = [0, 32], sizes = [8, 32], strides = [1, 1]} : vector<8x128xf32> to vector<8x32xf32>
    %1126 = arith.negf %1125 : vector<8x32xf32>
    %1127 = math.exp %1126 : vector<8x32xf32>
    %cst_286 = arith.constant 1.000000e+00 : f32
    %1128 = vector.broadcast %cst_286 : f32 to vector<8x32xf32>
    %1129 = arith.addf %1128, %1127 : vector<8x32xf32>
    %1130 = arith.divf %1128, %1129 : vector<8x32xf32>
    %1131 = vector.extract_strided_slice %1118 {offsets = [0, 64], sizes = [8, 32], strides = [1, 1]} : vector<8x128xf32> to vector<8x32xf32>
    %1132 = math.tanh %1131 : vector<8x32xf32>
    %1133 = vector.extract_strided_slice %1118 {offsets = [0, 96], sizes = [8, 32], strides = [1, 1]} : vector<8x128xf32> to vector<8x32xf32>
    %1134 = arith.negf %1133 : vector<8x32xf32>
    %1135 = math.exp %1134 : vector<8x32xf32>
    %cst_287 = arith.constant 1.000000e+00 : f32
    %1136 = vector.broadcast %cst_287 : f32 to vector<8x32xf32>
    %1137 = arith.addf %1136, %1135 : vector<8x32xf32>
    %1138 = arith.divf %1136, %1137 : vector<8x32xf32>
    %1139 = arith.mulf %1130, %1115 : vector<8x32xf32>
    %1140 = arith.mulf %1124, %1132 : vector<8x32xf32>
    %1141 = arith.addf %1139, %1140 : vector<8x32xf32>
    %1142 = math.tanh %1141 : vector<8x32xf32>
    %1143 = arith.mulf %1138, %1142 : vector<8x32xf32>
    %cst_288 = arith.constant 0.899999976 : f32
    %1144 = vector.broadcast %cst_288 : f32 to vector<8x32xf32>
    %1145 = arith.mulf %1143, %1144 : vector<8x32xf32>
    %cst_289 = arith.constant 1.000000e-01 : f32
    %1146 = vector.broadcast %cst_289 : f32 to vector<8x32xf32>
    %1147 = arith.mulf %1146, %1110 : vector<8x32xf32>
    %1148 = arith.addf %1145, %1147 : vector<8x32xf32>
    %cst_290 = arith.constant 5.000000e-01 : f32
    %1149 = vector.broadcast %cst_290 : f32 to vector<8x32xf32>
    %1150 = arith.mulf %1141, %1149 : vector<8x32xf32>
    %cst_291 = arith.constant 5.000000e-01 : f32
    %1151 = vector.broadcast %cst_291 : f32 to vector<8x32xf32>
    %1152 = arith.mulf %1151, %1115 : vector<8x32xf32>
    %1153 = arith.addf %1150, %1152 : vector<8x32xf32>
    %cst_292 = arith.constant dense<0.000000e+00> : vector<8x128xf32>
    %1154 = tpu.matmul %1148, %9, %cst_292 {dimension_numbers = #tpu.dot_dimension_numbers<[1], [0], [0], [1], [0, 0, 1, 1], [], []>} : vector<8x32xf32>, vector<32x128xf32>, vector<8x128xf32> -> vector<8x128xf32>
    %1155 = vector.broadcast %10 : vector<1x128xf32> to vector<8x128xf32>
    %1156 = arith.addf %1154, %1155 : vector<8x128xf32>
    %c6_293 = arith.constant 6 : index
    %c0_294 = arith.constant 0 : index
    %c0_295 = arith.constant 0 : index
    %1157 = vector.load %arg13[%c6_293, %c0_294, %c0_295] : memref<8x8x128xf32, #tpu.memory_space<vmem>>, vector<1x8x128xf32>
    %1158 = vector.shape_cast %1157 : vector<1x8x128xf32> to vector<8x128xf32>
    %1159 = vector.shape_cast %1156 : vector<8x128xf32> to vector<1x8x128xf32>
    tpu.vector_store %arg13[%c6_293, %c0_294, %c0_295], %1159 {strides = array<i32>} : memref<8x8x128xf32, #tpu.memory_space<vmem>>, vector<1x8x128xf32>,
    %c7 = arith.constant 7 : index
    %c0_296 = arith.constant 0 : index
    %c0_297 = arith.constant 0 : index
    %1160 = vector.load %arg1[%c7, %c0_296, %c0_297] : memref<8x8x32xf32, #tpu.memory_space<vmem>>, vector<1x8x32xf32>
    %1161 = vector.shape_cast %1160 : vector<1x8x32xf32> to vector<8x32xf32>
    %1162 = tpu.concatenate %1161, %1148 in 1 : vector<8x32xf32>, vector<8x32xf32> -> vector<8x64xf32>
    %cst_298 = arith.constant dense<0.000000e+00> : vector<8x128xf32>
    %1163 = tpu.matmul %1162, %3, %cst_298 {dimension_numbers = #tpu.dot_dimension_numbers<[1], [0], [0], [1], [0, 0, 1, 1], [], []>} : vector<8x64xf32>, vector<64x128xf32>, vector<8x128xf32> -> vector<8x128xf32>
    %1164 = vector.broadcast %4 : vector<1x128xf32> to vector<8x128xf32>
    %1165 = arith.addf %1163, %1164 : vector<8x128xf32>
    %1166 = vector.extract_strided_slice %1165 {offsets = [0, 0], sizes = [8, 32], strides = [1, 1]} : vector<8x128xf32> to vector<8x32xf32>
    %1167 = arith.negf %1166 : vector<8x32xf32>
    %1168 = math.exp %1167 : vector<8x32xf32>
    %cst_299 = arith.constant 1.000000e+00 : f32
    %1169 = vector.broadcast %cst_299 : f32 to vector<8x32xf32>
    %1170 = arith.addf %1169, %1168 : vector<8x32xf32>
    %1171 = arith.divf %1169, %1170 : vector<8x32xf32>
    %1172 = vector.extract_strided_slice %1165 {offsets = [0, 32], sizes = [8, 32], strides = [1, 1]} : vector<8x128xf32> to vector<8x32xf32>
    %1173 = arith.negf %1172 : vector<8x32xf32>
    %1174 = math.exp %1173 : vector<8x32xf32>
    %cst_300 = arith.constant 1.000000e+00 : f32
    %1175 = vector.broadcast %cst_300 : f32 to vector<8x32xf32>
    %1176 = arith.addf %1175, %1174 : vector<8x32xf32>
    %1177 = arith.divf %1175, %1176 : vector<8x32xf32>
    %1178 = vector.extract_strided_slice %1165 {offsets = [0, 64], sizes = [8, 32], strides = [1, 1]} : vector<8x128xf32> to vector<8x32xf32>
    %1179 = math.tanh %1178 : vector<8x32xf32>
    %1180 = vector.extract_strided_slice %1165 {offsets = [0, 96], sizes = [8, 32], strides = [1, 1]} : vector<8x128xf32> to vector<8x32xf32>
    %1181 = arith.negf %1180 : vector<8x32xf32>
    %1182 = math.exp %1181 : vector<8x32xf32>
    %cst_301 = arith.constant 1.000000e+00 : f32
    %1183 = vector.broadcast %cst_301 : f32 to vector<8x32xf32>
    %1184 = arith.addf %1183, %1182 : vector<8x32xf32>
    %1185 = arith.divf %1183, %1184 : vector<8x32xf32>
    %1186 = arith.mulf %1177, %1153 : vector<8x32xf32>
    %1187 = arith.mulf %1171, %1179 : vector<8x32xf32>
    %1188 = arith.addf %1186, %1187 : vector<8x32xf32>
    %1189 = math.tanh %1188 : vector<8x32xf32>
    %1190 = arith.mulf %1185, %1189 : vector<8x32xf32>
    %cst_302 = arith.constant 0.899999976 : f32
    %1191 = vector.broadcast %cst_302 : f32 to vector<8x32xf32>
    %1192 = arith.mulf %1190, %1191 : vector<8x32xf32>
    %cst_303 = arith.constant 1.000000e-01 : f32
    %1193 = vector.broadcast %cst_303 : f32 to vector<8x32xf32>
    %1194 = arith.mulf %1193, %1148 : vector<8x32xf32>
    %1195 = arith.addf %1192, %1194 : vector<8x32xf32>
    %cst_304 = arith.constant 5.000000e-01 : f32
    %1196 = vector.broadcast %cst_304 : f32 to vector<8x32xf32>
    %1197 = arith.mulf %1188, %1196 : vector<8x32xf32>
    %cst_305 = arith.constant 5.000000e-01 : f32
    %1198 = vector.broadcast %cst_305 : f32 to vector<8x32xf32>
    %1199 = arith.mulf %1198, %1153 : vector<8x32xf32>
    %1200 = arith.addf %1197, %1199 : vector<8x32xf32>
    %1201 = tpu.concatenate %1195, %1071 in 1 : vector<8x32xf32>, vector<8x32xf32> -> vector<8x64xf32>
    %cst_306 = arith.constant dense<0.000000e+00> : vector<8x128xf32>
    %1202 = tpu.matmul %1201, %5, %cst_306 {dimension_numbers = #tpu.dot_dimension_numbers<[1], [0], [0], [1], [0, 0, 1, 1], [], []>} : vector<8x64xf32>, vector<64x128xf32>, vector<8x128xf32> -> vector<8x128xf32>
    %1203 = vector.broadcast %6 : vector<1x128xf32> to vector<8x128xf32>
    %1204 = arith.addf %1202, %1203 : vector<8x128xf32>
    %1205 = vector.extract_strided_slice %1204 {offsets = [0, 0], sizes = [8, 32], strides = [1, 1]} : vector<8x128xf32> to vector<8x32xf32>
    %1206 = arith.negf %1205 : vector<8x32xf32>
    %1207 = math.exp %1206 : vector<8x32xf32>
    %cst_307 = arith.constant 1.000000e+00 : f32
    %1208 = vector.broadcast %cst_307 : f32 to vector<8x32xf32>
    %1209 = arith.addf %1208, %1207 : vector<8x32xf32>
    %1210 = arith.divf %1208, %1209 : vector<8x32xf32>
    %1211 = vector.extract_strided_slice %1204 {offsets = [0, 32], sizes = [8, 32], strides = [1, 1]} : vector<8x128xf32> to vector<8x32xf32>
    %1212 = arith.negf %1211 : vector<8x32xf32>
    %1213 = math.exp %1212 : vector<8x32xf32>
    %cst_308 = arith.constant 1.000000e+00 : f32
    %1214 = vector.broadcast %cst_308 : f32 to vector<8x32xf32>
    %1215 = arith.addf %1214, %1213 : vector<8x32xf32>
    %1216 = arith.divf %1214, %1215 : vector<8x32xf32>
    %1217 = vector.extract_strided_slice %1204 {offsets = [0, 64], sizes = [8, 32], strides = [1, 1]} : vector<8x128xf32> to vector<8x32xf32>
    %1218 = math.tanh %1217 : vector<8x32xf32>
    %1219 = vector.extract_strided_slice %1204 {offsets = [0, 96], sizes = [8, 32], strides = [1, 1]} : vector<8x128xf32> to vector<8x32xf32>
    %1220 = arith.negf %1219 : vector<8x32xf32>
    %1221 = math.exp %1220 : vector<8x32xf32>
    %cst_309 = arith.constant 1.000000e+00 : f32
    %1222 = vector.broadcast %cst_309 : f32 to vector<8x32xf32>
    %1223 = arith.addf %1222, %1221 : vector<8x32xf32>
    %1224 = arith.divf %1222, %1223 : vector<8x32xf32>
    %1225 = arith.mulf %1216, %1076 : vector<8x32xf32>
    %1226 = arith.mulf %1210, %1218 : vector<8x32xf32>
    %1227 = arith.addf %1225, %1226 : vector<8x32xf32>
    %1228 = math.tanh %1227 : vector<8x32xf32>
    %1229 = arith.mulf %1224, %1228 : vector<8x32xf32>
    %cst_310 = arith.constant 0.899999976 : f32
    %1230 = vector.broadcast %cst_310 : f32 to vector<8x32xf32>
    %1231 = arith.mulf %1229, %1230 : vector<8x32xf32>
    %cst_311 = arith.constant 1.000000e-01 : f32
    %1232 = vector.broadcast %cst_311 : f32 to vector<8x32xf32>
    %1233 = arith.mulf %1232, %1071 : vector<8x32xf32>
    %1234 = arith.addf %1231, %1233 : vector<8x32xf32>
    %cst_312 = arith.constant 5.000000e-01 : f32
    %1235 = vector.broadcast %cst_312 : f32 to vector<8x32xf32>
    %1236 = arith.mulf %1227, %1235 : vector<8x32xf32>
    %cst_313 = arith.constant 5.000000e-01 : f32
    %1237 = vector.broadcast %cst_313 : f32 to vector<8x32xf32>
    %1238 = arith.mulf %1237, %1076 : vector<8x32xf32>
    %1239 = arith.addf %1236, %1238 : vector<8x32xf32>
    %1240 = tpu.concatenate %1234, %1195 in 1 : vector<8x32xf32>, vector<8x32xf32> -> vector<8x64xf32>
    %cst_314 = arith.constant dense<0.000000e+00> : vector<8x128xf32>
    %1241 = tpu.matmul %1240, %7, %cst_314 {dimension_numbers = #tpu.dot_dimension_numbers<[1], [0], [0], [1], [0, 0, 1, 1], [], []>} : vector<8x64xf32>, vector<64x128xf32>, vector<8x128xf32> -> vector<8x128xf32>
    %1242 = vector.broadcast %8 : vector<1x128xf32> to vector<8x128xf32>
    %1243 = arith.addf %1241, %1242 : vector<8x128xf32>
    %1244 = vector.extract_strided_slice %1243 {offsets = [0, 0], sizes = [8, 32], strides = [1, 1]} : vector<8x128xf32> to vector<8x32xf32>
    %1245 = arith.negf %1244 : vector<8x32xf32>
    %1246 = math.exp %1245 : vector<8x32xf32>
    %cst_315 = arith.constant 1.000000e+00 : f32
    %1247 = vector.broadcast %cst_315 : f32 to vector<8x32xf32>
    %1248 = arith.addf %1247, %1246 : vector<8x32xf32>
    %1249 = arith.divf %1247, %1248 : vector<8x32xf32>
    %1250 = vector.extract_strided_slice %1243 {offsets = [0, 32], sizes = [8, 32], strides = [1, 1]} : vector<8x128xf32> to vector<8x32xf32>
    %1251 = arith.negf %1250 : vector<8x32xf32>
    %1252 = math.exp %1251 : vector<8x32xf32>
    %cst_316 = arith.constant 1.000000e+00 : f32
    %1253 = vector.broadcast %cst_316 : f32 to vector<8x32xf32>
    %1254 = arith.addf %1253, %1252 : vector<8x32xf32>
    %1255 = arith.divf %1253, %1254 : vector<8x32xf32>
    %1256 = vector.extract_strided_slice %1243 {offsets = [0, 64], sizes = [8, 32], strides = [1, 1]} : vector<8x128xf32> to vector<8x32xf32>
    %1257 = math.tanh %1256 : vector<8x32xf32>
    %1258 = vector.extract_strided_slice %1243 {offsets = [0, 96], sizes = [8, 32], strides = [1, 1]} : vector<8x128xf32> to vector<8x32xf32>
    %1259 = arith.negf %1258 : vector<8x32xf32>
    %1260 = math.exp %1259 : vector<8x32xf32>
    %cst_317 = arith.constant 1.000000e+00 : f32
    %1261 = vector.broadcast %cst_317 : f32 to vector<8x32xf32>
    %1262 = arith.addf %1261, %1260 : vector<8x32xf32>
    %1263 = arith.divf %1261, %1262 : vector<8x32xf32>
    %1264 = arith.mulf %1255, %1200 : vector<8x32xf32>
    %1265 = arith.mulf %1249, %1257 : vector<8x32xf32>
    %1266 = arith.addf %1264, %1265 : vector<8x32xf32>
    %1267 = math.tanh %1266 : vector<8x32xf32>
    %1268 = arith.mulf %1263, %1267 : vector<8x32xf32>
    %cst_318 = arith.constant 0.899999976 : f32
    %1269 = vector.broadcast %cst_318 : f32 to vector<8x32xf32>
    %1270 = arith.mulf %1268, %1269 : vector<8x32xf32>
    %cst_319 = arith.constant 1.000000e-01 : f32
    %1271 = vector.broadcast %cst_319 : f32 to vector<8x32xf32>
    %1272 = arith.mulf %1271, %1195 : vector<8x32xf32>
    %1273 = arith.addf %1270, %1272 : vector<8x32xf32>
    %cst_320 = arith.constant 5.000000e-01 : f32
    %1274 = vector.broadcast %cst_320 : f32 to vector<8x32xf32>
    %1275 = arith.mulf %1266, %1274 : vector<8x32xf32>
    %cst_321 = arith.constant 5.000000e-01 : f32
    %1276 = vector.broadcast %cst_321 : f32 to vector<8x32xf32>
    %1277 = arith.mulf %1276, %1200 : vector<8x32xf32>
    %1278 = arith.addf %1275, %1277 : vector<8x32xf32>
    %cst_322 = arith.constant dense<0.000000e+00> : vector<8x128xf32>
    %1279 = tpu.matmul %1273, %12, %cst_322 {dimension_numbers = #tpu.dot_dimension_numbers<[1], [0], [0], [1], [0, 0, 1, 1], [], []>} : vector<8x32xf32>, vector<32x128xf32>, vector<8x128xf32> -> vector<8x128xf32>
    %1280 = vector.broadcast %14 : vector<1x128xf32> to vector<8x128xf32>
    %1281 = arith.addf %1279, %1280 : vector<8x128xf32>
    %1282 = vector.extract_strided_slice %1281 {offsets = [0, 0], sizes = [8, 32], strides = [1, 1]} : vector<8x128xf32> to vector<8x32xf32>
    %1283 = arith.negf %1282 : vector<8x32xf32>
    %1284 = math.exp %1283 : vector<8x32xf32>
    %cst_323 = arith.constant 1.000000e+00 : f32
    %1285 = vector.broadcast %cst_323 : f32 to vector<8x32xf32>
    %1286 = arith.addf %1285, %1284 : vector<8x32xf32>
    %1287 = arith.divf %1285, %1286 : vector<8x32xf32>
    %1288 = vector.extract_strided_slice %1281 {offsets = [0, 32], sizes = [8, 32], strides = [1, 1]} : vector<8x128xf32> to vector<8x32xf32>
    %1289 = arith.negf %1288 : vector<8x32xf32>
    %1290 = math.exp %1289 : vector<8x32xf32>
    %cst_324 = arith.constant 1.000000e+00 : f32
    %1291 = vector.broadcast %cst_324 : f32 to vector<8x32xf32>
    %1292 = arith.addf %1291, %1290 : vector<8x32xf32>
    %1293 = arith.divf %1291, %1292 : vector<8x32xf32>
    %1294 = vector.extract_strided_slice %1281 {offsets = [0, 64], sizes = [8, 32], strides = [1, 1]} : vector<8x128xf32> to vector<8x32xf32>
    %1295 = math.tanh %1294 : vector<8x32xf32>
    %1296 = vector.extract_strided_slice %1281 {offsets = [0, 96], sizes = [8, 32], strides = [1, 1]} : vector<8x128xf32> to vector<8x32xf32>
    %1297 = arith.negf %1296 : vector<8x32xf32>
    %1298 = math.exp %1297 : vector<8x32xf32>
    %cst_325 = arith.constant 1.000000e+00 : f32
    %1299 = vector.broadcast %cst_325 : f32 to vector<8x32xf32>
    %1300 = arith.addf %1299, %1298 : vector<8x32xf32>
    %1301 = arith.divf %1299, %1300 : vector<8x32xf32>
    %1302 = arith.mulf %1293, %1278 : vector<8x32xf32>
    %1303 = arith.mulf %1287, %1295 : vector<8x32xf32>
    %1304 = arith.addf %1302, %1303 : vector<8x32xf32>
    %1305 = math.tanh %1304 : vector<8x32xf32>
    %1306 = arith.mulf %1301, %1305 : vector<8x32xf32>
    %cst_326 = arith.constant 0.899999976 : f32
    %1307 = vector.broadcast %cst_326 : f32 to vector<8x32xf32>
    %1308 = arith.mulf %1306, %1307 : vector<8x32xf32>
    %cst_327 = arith.constant 1.000000e-01 : f32
    %1309 = vector.broadcast %cst_327 : f32 to vector<8x32xf32>
    %1310 = arith.mulf %1309, %1273 : vector<8x32xf32>
    %1311 = arith.addf %1308, %1310 : vector<8x32xf32>
    %cst_328 = arith.constant 5.000000e-01 : f32
    %1312 = vector.broadcast %cst_328 : f32 to vector<8x32xf32>
    %1313 = arith.mulf %1304, %1312 : vector<8x32xf32>
    %cst_329 = arith.constant 5.000000e-01 : f32
    %1314 = vector.broadcast %cst_329 : f32 to vector<8x32xf32>
    %1315 = arith.mulf %1314, %1278 : vector<8x32xf32>
    %1316 = arith.addf %1313, %1315 : vector<8x32xf32>
    %cst_330 = arith.constant dense<0.000000e+00> : vector<8x128xf32>
    %1317 = tpu.matmul %1311, %9, %cst_330 {dimension_numbers = #tpu.dot_dimension_numbers<[1], [0], [0], [1], [0, 0, 1, 1], [], []>} : vector<8x32xf32>, vector<32x128xf32>, vector<8x128xf32> -> vector<8x128xf32>
    %1318 = vector.broadcast %10 : vector<1x128xf32> to vector<8x128xf32>
    %1319 = arith.addf %1317, %1318 : vector<8x128xf32>
    %c7_331 = arith.constant 7 : index
    %c0_332 = arith.constant 0 : index
    %c0_333 = arith.constant 0 : index
    %1320 = vector.load %arg13[%c7_331, %c0_332, %c0_333] : memref<8x8x128xf32, #tpu.memory_space<vmem>>, vector<1x8x128xf32>
    %1321 = vector.shape_cast %1320 : vector<1x8x128xf32> to vector<8x128xf32>
    %1322 = vector.shape_cast %1319 : vector<8x128xf32> to vector<1x8x128xf32>
    tpu.vector_store %arg13[%c7_331, %c0_332, %c0_333], %1322 {strides = array<i32>} : memref<8x8x128xf32, #tpu.memory_space<vmem>>, vector<1x8x128xf32>,
    %c0_334 = arith.constant 0 : index
    %c0_335 = arith.constant 0 : index
    %1323 = vector.load %arg15[%c0_334, %c0_335] : memref<8x32xf32, #tpu.memory_space<vmem>>, vector<8x32xf32>
    tpu.vector_store %arg15[%c0_334, %c0_335], %1311 {strides = array<i32>} : memref<8x32xf32, #tpu.memory_space<vmem>>, vector<8x32xf32>,
    %c0_336 = arith.constant 0 : index
    %c0_337 = arith.constant 0 : index
    %1324 = vector.load %arg16[%c0_336, %c0_337] : memref<8x32xf32, #tpu.memory_space<vmem>>, vector<8x32xf32>
    tpu.vector_store %arg16[%c0_336, %c0_337], %1316 {strides = array<i32>} : memref<8x32xf32, #tpu.memory_space<vmem>>, vector<8x32xf32>,
    %c0_338 = arith.constant 0 : index
    %c0_339 = arith.constant 0 : index
    %1325 = vector.load %arg17[%c0_338, %c0_339] : memref<8x32xf32, #tpu.memory_space<vmem>>, vector<8x32xf32>
    tpu.vector_store %arg17[%c0_338, %c0_339], %1234 {strides = array<i32>} : memref<8x32xf32, #tpu.memory_space<vmem>>, vector<8x32xf32>,
    %c0_340 = arith.constant 0 : index
    %c0_341 = arith.constant 0 : index
    %1326 = vector.load %arg18[%c0_340, %c0_341] : memref<8x32xf32, #tpu.memory_space<vmem>>, vector<8x32xf32>
    tpu.vector_store %arg18[%c0_340, %c0_341], %1239 {strides = array<i32>} : memref<8x32xf32, #tpu.memory_space<vmem>>, vector<8x32xf32>,
    %c0_i32_342 = arith.constant 0 : i32
    %1327 = arith.cmpi eq, %arg0, %c0_i32_342 : i32
    %1328 = arith.extui %1327 : i1 to i32
    %c0_i32_343 = arith.constant 0 : i32
    %1329 = arith.cmpi ne, %1328, %c0_i32_343 : i32
    scf.if %1329 {
      %1330 = tpu.concatenate %1311, %1316, %1234, %1239 in 1 : vector<8x32xf32>, vector<8x32xf32>, vector<8x32xf32>, vector<8x32xf32> -> vector<8x128xf32>
      %c0_344 = arith.constant 0 : index
      %c0_345 = arith.constant 0 : index
      %1331 = vector.load %arg14[%c0_344, %c0_345] : memref<8x128xf32, #tpu.memory_space<vmem>>, vector<8x128xf32>
      tpu.vector_store %arg14[%c0_344, %c0_345], %1330 {strides = array<i32>} : memref<8x128xf32, #tpu.memory_space<vmem>>, vector<8x128xf32>,
    } else {
    }
    return
  }
  func.func @transform_0(%arg0: i32) -> (i32, i32, i32) {
    %c0_i32 = arith.constant 0 : i32
    %c0_i32_0 = arith.constant 0 : i32
    %c0_i32_1 = arith.constant 0 : i32
    return %arg0, %c0_i32, %c0_i32_0 : i32, i32, i32
  }
  func.func @transform_1(%arg0: i32) -> (i32, i32) {
    %c0_i32 = arith.constant 0 : i32
    %c0_i32_0 = arith.constant 0 : i32
    %c0_i32_1 = arith.constant 0 : i32
    return %c0_i32, %c0_i32_0 : i32, i32
  }
  func.func @transform_2(%arg0: i32) -> (i32, i32) {
    %c0_i32 = arith.constant 0 : i32
    %c0_i32_0 = arith.constant 0 : i32
    %c0_i32_1 = arith.constant 0 : i32
    return %c0_i32, %c0_i32_0 : i32, i32
  }
  func.func @transform_3(%arg0: i32) -> (i32, i32) {
    %c0_i32 = arith.constant 0 : i32
    %c0_i32_0 = arith.constant 0 : i32
    %c0_i32_1 = arith.constant 0 : i32
    return %c0_i32, %c0_i32_0 : i32, i32
  }
  func.func @transform_4(%arg0: i32) -> (i32, i32) {
    %c0_i32 = arith.constant 0 : i32
    %c0_i32_0 = arith.constant 0 : i32
    %c0_i32_1 = arith.constant 0 : i32
    return %c0_i32, %c0_i32_0 : i32, i32
  }
  func.func @transform_5(%arg0: i32) -> (i32, i32) {
    %c0_i32 = arith.constant 0 : i32
    %c0_i32_0 = arith.constant 0 : i32
    %c0_i32_1 = arith.constant 0 : i32
    return %c0_i32, %c0_i32_0 : i32, i32
  }
  func.func @transform_6(%arg0: i32) -> (i32, i32) {
    %c0_i32 = arith.constant 0 : i32
    %c0_i32_0 = arith.constant 0 : i32
    %c0_i32_1 = arith.constant 0 : i32
    return %c0_i32, %c0_i32_0 : i32, i32
  }
  func.func @transform_7(%arg0: i32) -> (i32, i32) {
    %c0_i32 = arith.constant 0 : i32
    %c0_i32_0 = arith.constant 0 : i32
    %c0_i32_1 = arith.constant 0 : i32
    return %c0_i32, %c0_i32_0 : i32, i32
  }
  func.func @transform_8(%arg0: i32) -> (i32, i32, i32) {
    %c0_i32 = arith.constant 0 : i32
    %c0_i32_0 = arith.constant 0 : i32
    %c0_i32_1 = arith.constant 0 : i32
    %c0_i32_2 = arith.constant 0 : i32
    return %c0_i32, %c0_i32_0, %c0_i32_1 : i32, i32, i32
  }
  func.func @transform_9(%arg0: i32) -> (i32, i32, i32) {
    %c0_i32 = arith.constant 0 : i32
    %c0_i32_0 = arith.constant 0 : i32
    %c0_i32_1 = arith.constant 0 : i32
    %c0_i32_2 = arith.constant 0 : i32
    return %c0_i32, %c0_i32_0, %c0_i32_1 : i32, i32, i32
  }
  func.func @transform_10(%arg0: i32) -> (i32, i32) {
    %c0_i32 = arith.constant 0 : i32
    %c0_i32_0 = arith.constant 0 : i32
    %c0_i32_1 = arith.constant 0 : i32
    return %c0_i32, %c0_i32_0 : i32, i32
  }
  func.func @transform_11(%arg0: i32) -> (i32, i32) {
    %c0_i32 = arith.constant 0 : i32
    %c0_i32_0 = arith.constant 0 : i32
    %c0_i32_1 = arith.constant 0 : i32
    return %c0_i32, %c0_i32_0 : i32, i32
  }
  func.func @transform_12(%arg0: i32) -> (i32, i32, i32) {
    %c0_i32 = arith.constant 0 : i32
    %c0_i32_0 = arith.constant 0 : i32
    %c0_i32_1 = arith.constant 0 : i32
    return %arg0, %c0_i32, %c0_i32_0 : i32, i32, i32
  }
  func.func @transform_13(%arg0: i32) -> (i32, i32) {
    %c0_i32 = arith.constant 0 : i32
    %c0_i32_0 = arith.constant 0 : i32
    %c0_i32_1 = arith.constant 0 : i32
    return %c0_i32, %c0_i32_0 : i32, i32
  }
}

</mosaic_0001>

<bundles_post_ra>
// kernel: fsrnn_forward_steps.1
= control target key start
LH: loop header
LB: loop body
LE: loop exit
PB: predicated region body
PF: predicated region fallthrough
CT: control target
= control target key end

     0   :  { %vm49_vm0 = vcmask 261120   ;;  %s4473_s0 = inlined_call_operand.vmem [shape: f32[8,8,32], index: 0, kind: input, shape index: {}]   ;;  %s4474_s1 = inlined_call_operand.vmem [shape: f32[8,128], index: 1, kind: input, shape index: {}, may-alias: {1,13}]   ;;  %s4475_s2 = inlined_call_operand.vmem [shape: f32[64,128], index: 2, kind: input, shape index: {}]   ;;  %s4476_s3 = inlined_call_operand.vmem [shape: f32[1,128], index: 3, kind: input, shape index: {}]   ;;  %s4477_s4 = inlined_call_operand.vmem [shape: f32[64,128], index: 4, kind: input, shape index: {}]   ;;  %s4478_s5 = inlined_call_operand.vmem [shape: f32[1,128], index: 5, kind: input, shape index: {}]   ;;  %s4479_s6 = inlined_call_operand.vmem [shape: f32[64,128], index: 6, kind: input, shape index: {}]   ;;  %s4480_s7 = inlined_call_operand.vmem [shape: f32[1,128], index: 7, kind: input, shape index: {}]   ;;  %s4481_s8 = inlined_call_operand.vmem [shape: f32[1,32,128], index: 8, kind: input, shape index: {}]   ;;  %s4482_s9 = inlined_call_operand.vmem [shape: f32[1,1,128], index: 9, kind: input, shape index: {}]   ;;  %s4483_s10 = inlined_call_operand.vmem [shape: f32[32,128], index: 10, kind: input, shape index: {}]   ;;  %s4484_s11 = inlined_call_operand.vmem [shape: f32[1,128], index: 11, kind: input, shape index: {}]   ;;  %s4485_s12 = inlined_call_operand.hbm [shape: f32[8,8,128], index: 12, kind: output, shape index: {0}]   ;;  %s4486_s13 = inlined_call_operand.vmem [shape: f32[8,128], index: 13, kind: output, shape index: {1}, may-alias: {1,13}]  }
   0x1   :  { %v3227_v0 = vld [vmem:[%s4474_s1] sm:$0xff]  ;;  %v3232_v1 = vld [vmem:[%s4475_s2 + $0x38] sm:$0xff]  ;;  %v3237_v2 = vld [vmem:[%s4475_s2 + $0x30] sm:$0xff] }
   0x2   :  { %50 = vst.msk [vmem:[#allocation2] sm:$0xff] %vm49_vm0, %v3227_v0  ;;  %127 = vmatpush.msra.mxu0 %v3232_v1  ;;  %v3245_v3 = vld [vmem:[%s4475_s2 + $0x28] sm:$0xff]  ;;  %v3251_v4 = vld [vmem:[%s4475_s2 + $0x20] sm:$0xff] }
   0x4   :  { %128 = vmatpush.msra.mxu0 %v3237_v2 }
   0x5   :  { %19 = vsyncpa [#allocation7], 0  ;;  %v3257_v5 = vld [vmem:[%s4475_s2 + $0x18] sm:$0xff]  ;;  %v3263_v7 = vld [vmem:[%s4475_s2 + $0x10] sm:$0xff]  ;;  %s3148_s21 = smov 32   ;;  %s3149_s24 = smov 96  }
   0x6   :  { %129 = vmatpush.msra.mxu0 %v3245_v3  ;;  %v3270_v8 = vld [vmem:[%s4475_s2 + $0x8] sm:$0xff]  ;;  %v3279_v9 = vld [vmem:[%s4475_s2] sm:$0xff]  ;;  %vm115_vm1 = vcmask 523264   ;;  %s3150_s14 = smov 64   ;;  %v3336_v46 = vld [vmem:[%s4477_s4 + $0x38] sm:$0xff]  ;;  %s2699_s27 = sshll.u32 %s4485_s12, 4  ;;  %s2700_s27 = int_to_ptr.hbm [resolvable:$true] %s2699_s27 }
   0x7   :  { %v105_v10 = vld [vmem:[%s4473_s0] sm:$0xff]  ;;  %v3341_v47 = vld [vmem:[%s4477_s4 + $0x30] sm:$0xff]  ;;  %217 = vmatpush.msra.mxu1 %v3336_v46  ;;  %v3347_v48 = vld [vmem:[%s4477_s4 + $0x28] sm:$0xff]  ;;  %s3153_s28 = smov 8  }
   0x8   :  { %130 = vmatpush.msra.mxu0 %v3251_v4  ;;  %v3307_v14 = vld [vmem:[%s4476_s3] ss:$0 sm:$0xff]  ;;  %v3360_v50 = vld [vmem:[%s4477_s4 + $0x18] sm:$0xff]  ;;  %v3365_v51 = vld [vmem:[%s4477_s4 + $0x10] sm:$0xff] }
   0x9   :  { %v101_v6 = vld [vmem:[#allocation2] sm:$0xff]  ;;  %218 = vmatpush.msra.mxu1 %v3341_v47  ;;  %v3371_v52 = vld [vmem:[%s4477_s4 + $0x8] sm:$0xff] }
   0xa   :  { %107 = vrot.lane.b32.xlu0 %v101_v6, %s3148_s21  ;;  %131 = vmatpush.msra.mxu0 %v3257_v5  ;;  %v181_v22 = vmul.f32 0.1, %v101_v6  ;;  %v3353_v49 = vld [vmem:[%s4477_s4 + $0x20] sm:$0xff] }
   0xb   :  { %219 = vmatpush.msra.mxu1 %v3347_v48  ;;  %v3382_v57 = vld [vmem:[%s4477_s4] sm:$0xff] }
   0xc   :  { %132 = vmatpush.msra.mxu0 %v3263_v7  ;;  %v3406_v61 = vld [vmem:[%s4478_s5] ss:$0 sm:$0xff] }
   0xd   :  { %220 = vmatpush.msra.mxu1 %v3353_v49 }
   0xe   :  { %133 = vmatpush.msra.mxu0 %v3270_v8 }
   0xf   :  { %221 = vmatpush.msra.mxu1 %v3360_v50 }
  0x10   :  { %134 = vmatpush.msra.mxu0 %v3279_v9 }
  0x11   :  { %222 = vmatpush.msra.mxu1 %v3365_v51 }
  0x12   :  { %52 = vrot.lane.b32.xlu0 %v3227_v0, %s3149_s24  ;;  %478 = vmatpush.msrb.mxu0 %v3232_v1 }
  0x13   :  { %223 = vmatpush.msra.mxu1 %v3371_v52 }
  0x14   :  { %479 = vmatpush.msrb.mxu0 %v3237_v2 }
  0x15   :  { %224 = vmatpush.msra.mxu1 %v3382_v57 }
  0x16   :  { %480 = vmatpush.msrb.mxu0 %v3245_v3 }
  0x17   :  { %552 = vmatpush.msrb.mxu1 %v3336_v46 }
  0x18   :  { %481 = vmatpush.msrb.mxu0 %v3251_v4 }
  0x19   :  { %553 = vmatpush.msrb.mxu1 %v3341_v47 }
  0x1a   :  { %482 = vmatpush.msrb.mxu0 %v3257_v5 }
  0x1b   :  { %554 = vmatpush.msrb.mxu1 %v3347_v48 }
  0x1c   :  { %483 = vmatpush.msrb.mxu0 %v3263_v7 }
  0x1d   :  { %555 = vmatpush.msrb.mxu1 %v3353_v49 }
  0x1e   :  { %484 = vmatpush.msrb.mxu0 %v3270_v8 }
  0x1f   :  { %556 = vmatpush.msrb.mxu1 %v3360_v50 }
  0x20   :  { %485 = vmatpush.msrb.mxu0 %v3279_v9 }
  0x21   :  { %557 = vmatpush.msrb.mxu1 %v3365_v51 }
  0x23   :  { %558 = vmatpush.msrb.mxu1 %v3371_v52 }
  0x25   :  { %559 = vmatpush.msrb.mxu1 %v3382_v57 }
  0x7c   :  { %v108_v11 = vpop.permute.xlu0 %107 }
  0x7d   :  { %v111_v12 = vsel %vm49_vm0, %v105_v10, %v108_v11 }
  0x7e   :  { %2715 = vmatmul.msk.f32.vlgmr.msra.gmra.mxu0 %vm115_vm1, %v111_v12 }
  0x7f   :  { %793 = vmatpush.msra.mxu0 %v3232_v1 }
  0x81   :  { %794 = vmatpush.msra.mxu0 %v3237_v2 }
  0x83   :  { %795 = vmatpush.msra.mxu0 %v3245_v3 }
  0x84   :  { %v53_v13 = vpop.permute.xlu0 %52 }
  0x85   :  { %796 = vmatpush.msra.mxu0 %v3251_v4  ;;  %55 = vst.msk [vmem:[#allocation3] sm:$0xff] %vm49_vm0, %v53_v13 }
  0x87   :  { %797 = vmatpush.msra.mxu0 %v3257_v5 }
  0x89   :  { %798 = vmatpush.msra.mxu0 %v3263_v7 }
  0x8b   :  { %799 = vmatpush.msra.mxu0 %v3270_v8 }
  0x8c   :  { %v3311_v18 = vld [vmem:[#allocation3] sm:$0xff] }
  0x8d   :  { %800 = vmatpush.msra.mxu0 %v3279_v9 }
  0xfb   :  { %v136_v15 = vpop.f32.mrf.mxu0 }
  0xfc   :  { %v137_v16 = vadd.f32 %v3307_v14, %v136_v15 }
  0xfe   :  { %2805 = vtanh.f32 %v137_v16  ;;  %v2716_v19 = vmul.f32 -1.442695, %v137_v16 }
 0x100   :  { %2807 = vpow2.f32 %v2716_v19 }
 0x104   :  { %v2806_v17 = vpop.eup %2805 }
 0x105   :  { %165 = vrot.lane.b32.xlu1 %v2806_v17, %s3150_s14 }
 0x106   :  { %v2808_v20 = vpop.eup %2807 }
 0x107   :  { %v142_v21 = vadd.f32 1.0, %v2808_v20 }
 0x109   :  { %2809 = vrcp.f32 %v142_v21  ;;  %v154_v28 = vand.u32 2147483648, %v142_v21  ;;  %vm148_vm3 = vweird.f32 %v142_v21  ;;  %v152_v29 = vand.u32 2147483647, %v142_v21 }
 0x10b   :  { %v155_v31 = vor.u32 1.1754944e-38, %v154_v28  ;;  %vm153_vm5 = vcmp.eq.f32.partialorder %v152_v29, 8.507059e+37 }
 0x10d   :  { %160 = vrot.lane.b32.xlu1 %v3311_v18, %s3148_s21 }
 0x10f   :  { %v2810_v23 = vpop.eup %2809 }
 0x110   :  { %v144_v24 = vmul.f32 %v2810_v23, %v142_v21  ;;  %vm149_vm2 = vweird.f32 %v2810_v23 }
 0x111   :  { %vm150_vm4 = vmor %vm148_vm3, %vm149_vm2 }
 0x112   :  { %v145_v25 = vsub.f32 1.0, %v144_v24 }
 0x114   :  { %v146_v26 = vmul.f32 %v2810_v23, %v145_v25 }
 0x115   :  { %183 = vrot.lane.b32.xlu1 %v181_v22, %s3149_s24 }
 0x116   :  { %v147_v27 = vadd.f32 %v2810_v23, %v146_v26 }
 0x118   :  { %v151_v30 = vsel %vm150_vm4, %v2810_v23, %v147_v27 }
 0x119   :  { %v156_v33 = vsel %vm153_vm5, %v155_v31, %v151_v30  ;;  %v3420_v31 = vld [vmem:[%s4479_s6 + $0x38] sm:$0xff] }
 0x11a   :  { %306 = vmatpush.msra.mxu2 %v3420_v31 }
 0x11d   :  { %60 = vrot.lane.b32.xlu1 %v3227_v0, %s3148_s21 }
 0x177   :  { %v166_v32 = vpop.permute.xlu1 %165 }
 0x178   :  { %v168_v34 = vmul.f32 %v166_v32, %v156_v33  ;;  %v3425_v32 = vld [vmem:[%s4479_s6 + $0x30] sm:$0xff] }
 0x179   :  { %307 = vmatpush.msra.mxu2 %v3425_v32 }
 0x17a   :  { %170 = vrot.lane.b32.xlu2 %v168_v34, %s3148_s21  ;;  %v3437_v34 = vld [vmem:[%s4479_s6 + $0x20] sm:$0xff] }
 0x17f   :  { %v161_v35 = vpop.permute.xlu1 %160 }
 0x180   :  { %v163_v36 = vmul.f32 %v161_v35, %v156_v33  ;;  %v3443_v35 = vld [vmem:[%s4479_s6 + $0x18] sm:$0xff] }
 0x182   :  { %56 = vrot.lane.b32.xlu2 %v3227_v0, %s3150_s14 }
 0x187   :  { %v184_v38 = vpop.permute.xlu1 %183 }
 0x18f   :  { %v61_v41 = vpop.permute.xlu1 %60 }
 0x190   :  { %63 = vst.msk [vmem:[#allocation5] sm:$0xff] %vm49_vm0, %v61_v41 }
 0x197   :  { %v3328_v44 = vld [vmem:[#allocation5] sm:$0xff] }
 0x1d4   :  { %v171_v37 = vpop.permute.xlu2 %170 }
 0x1d5   :  { %v3321_v39 = vadd.f32 %v171_v37, %v163_v36  ;;  %v3449_v36 = vld [vmem:[%s4479_s6 + $0x10] sm:$0xff]  ;;  %v3455_v37 = vld [vmem:[%s4479_s6 + $0x8] sm:$0xff] }
 0x1d7   :  { %2811 = vtanh.f32 %v3321_v39 }
 0x1dc   :  { %v57_v40 = vpop.permute.xlu2 %56 }
 0x1dd   :  { %v2812_v42 = vpop.eup %2811  ;;  %59 = vst.msk [vmem:[#allocation4] sm:$0xff] %vm49_vm0, %v57_v40 }
 0x1de   :  { %176 = vrot.lane.b32.xlu0 %v2812_v42, %s3150_s14 }
 0x1e4   :  { %v103_v43 = vld [vmem:[#allocation4] sm:$0xff] }
 0x1e5   :  { %v271_v45 = vmul.f32 0.1, %v103_v43 }
 0x1e6   :  { %199 = vrot.lane.b32.xlu0 %v103_v43, %s3148_s21 }
 0x1ee   :  { %250 = vrot.lane.b32.xlu0 %v3328_v44, %s3148_s21 }
 0x1f6   :  { %273 = vrot.lane.b32.xlu0 %v271_v45, %s3149_s24  ;;  %v188_v45 = vmul.f32 0.5, %v3311_v18 }
 0x250   :  { %v177_v53 = vpop.permute.xlu0 %176 }
 0x251   :  { %v179_v54 = vmul.f32 %v177_v53, %v156_v33  ;;  %v3431_v33 = vld [vmem:[%s4479_s6 + $0x28] sm:$0xff]  ;;  %v3468_v53 = vld [vmem:[%s4479_s6] sm:$0xff] }
 0x252   :  { %308 = vmatpush.msra.mxu2 %v3431_v33 }
 0x253   :  { %v180_v55 = vmul.f32 0.9, %v179_v54 }
 0x254   :  { %309 = vmatpush.msra.mxu2 %v3437_v34 }
 0x255   :  { %v3375_v56 = vadd.f32 %v184_v38, %v180_v55 }
 0x256   :  { %310 = vmatpush.msra.mxu2 %v3443_v35 }
 0x257   :  { %195 = vrot.lane.b32.xlu2 %v3375_v56, %s3148_s21 }
 0x258   :  { %v200_v58 = vpop.permute.xlu0 %199  ;;  %311 = vmatpush.msra.mxu2 %v3449_v36 }
 0x25a   :  { %312 = vmatpush.msra.mxu2 %v3455_v37 }
 0x25c   :  { %313 = vmatpush.msra.mxu2 %v3468_v53 }
 0x25e   :  { %626 = vmatpush.msrb.mxu2 %v3420_v31 }
 0x260   :  { %v251_v26 = vpop.permute.xlu0 %250  ;;  %627 = vmatpush.msrb.mxu2 %v3425_v32 }
 0x262   :  { %628 = vmatpush.msrb.mxu2 %v3431_v33 }
 0x264   :  { %629 = vmatpush.msrb.mxu2 %v3437_v34 }
 0x266   :  { %630 = vmatpush.msrb.mxu2 %v3443_v35 }
 0x268   :  { %v274_v42 = vpop.permute.xlu0 %273  ;;  %631 = vmatpush.msrb.mxu2 %v3449_v36 }
 0x26a   :  { %632 = vmatpush.msrb.mxu2 %v3455_v37 }
 0x26c   :  { %633 = vmatpush.msrb.mxu2 %v3468_v53 }
 0x2b1   :  { %v196_v59 = vpop.permute.xlu2 %195 }
 0x2b2   :  { %v202_v60 = vsel %vm49_vm0, %v196_v59, %v200_v58  ;;  %v3492_v58 = vld [vmem:[%s4480_s7] ss:$0 sm:$0xff] }
 0x2b3   :  { %2717 = vmatmul.msk.f32.vlgmr.msra.gmra.mxu1 %vm115_vm1, %v202_v60 }
 0x2b4   :  { %867 = vmatpush.msra.mxu1 %v3336_v46 }
 0x2b6   :  { %868 = vmatpush.msra.mxu1 %v3341_v47 }
 0x2b8   :  { %869 = vmatpush.msra.mxu1 %v3347_v48 }
 0x2ba   :  { %870 = vmatpush.msra.mxu1 %v3353_v49 }
 0x2bc   :  { %871 = vmatpush.msra.mxu1 %v3360_v50 }
 0x2be   :  { %872 = vmatpush.msra.mxu1 %v3365_v51 }
 0x2c0   :  { %873 = vmatpush.msra.mxu1 %v3371_v52 }
 0x2c2   :  { %874 = vmatpush.msra.mxu1 %v3382_v57 }
 0x330   :  { %v226_v62 = vpop.f32.mrf.mxu1 }
 0x331   :  { %v227_v63 = vadd.f32 %v3406_v61, %v226_v62 }
 0x333   :  { %2813 = vtanh.f32 %v227_v63  ;;  %v2718_v6 = vmul.f32 -1.442695, %v227_v63 }
 0x335   :  { %2815 = vpow2.f32 %v2718_v6 }
 0x339   :  { %v2814_v0 = vpop.eup %2813 }
 0x33a   :  { %255 = vrot.lane.b32.xlu2 %v2814_v0, %s3150_s14 }
 0x33b   :  { %v2816_v10 = vpop.eup %2815 }
 0x33c   :  { %v232_v11 = vadd.f32 1.0, %v2816_v10 }
 0x33e   :  { %2817 = vrcp.f32 %v232_v11  ;;  %v244_v19 = vand.u32 2147483648, %v232_v11  ;;  %vm238_vm7 = vweird.f32 %v232_v11  ;;  %v242_v20 = vand.u32 2147483647, %v232_v11 }
 0x340   :  { %v245_v22 = vor.u32 1.1754944e-38, %v244_v19  ;;  %vm243_vm9 = vcmp.eq.f32.partialorder %v242_v20, 8.507059e+37 }
 0x344   :  { %v2818_v12 = vpop.eup %2817 }
 0x345   :  { %v234_v13 = vmul.f32 %v2818_v12, %v232_v11  ;;  %vm239_vm6 = vweird.f32 %v2818_v12 }
 0x346   :  { %vm240_vm8 = vmor %vm238_vm7, %vm239_vm6 }
 0x347   :  { %v235_v15 = vsub.f32 1.0, %v234_v13 }
 0x349   :  { %v236_v16 = vmul.f32 %v2818_v12, %v235_v15 }
 0x34b   :  { %v237_v17 = vadd.f32 %v2818_v12, %v236_v16 }
 0x34d   :  { %v241_v21 = vsel %vm240_vm8, %v2818_v12, %v237_v17 }
 0x34e   :  { %v246_v24 = vsel %vm243_vm9, %v245_v22, %v241_v21 }
 0x34f   :  { %v253_v27 = vmul.f32 %v251_v26, %v246_v24 }
 0x394   :  { %v256_v23 = vpop.permute.xlu2 %255 }
 0x395   :  { %v258_v25 = vmul.f32 %v256_v23, %v246_v24 }
 0x397   :  { %260 = vrot.lane.b32.xlu1 %v258_v25, %s3148_s21  ;;  %v187_v25 = vmul.f32 0.5, %v3321_v39  ;;  %v3513_v39 = vld [vmem:[%s4481_s8 + $0x8] sm:$0xff] }
 0x409   :  { %v261_v28 = vpop.permute.xlu1 %260 }
 0x40a   :  { %v3411_v29 = vadd.f32 %v261_v28, %v253_v27 }
 0x40c   :  { %2819 = vtanh.f32 %v3411_v29 }
 0x412   :  { %v2820_v30 = vpop.eup %2819 }
 0x413   :  { %266 = vrot.lane.b32.xlu2 %v2820_v30, %s3150_s14 }
 0x41b   :  { %288 = vrot.lane.b32.xlu2 %v3375_v56, %s3150_s14 }
 0x46d   :  { %v267_v38 = vpop.permute.xlu2 %266 }
 0x46e   :  { %v269_v40 = vmul.f32 %v267_v38, %v246_v24 }
 0x470   :  { %v270_v41 = vmul.f32 0.9, %v269_v40  ;;  %v3502_v40 = vld [vmem:[%s4481_s8 + $0x18] sm:$0xff] }
 0x471   :  { %381 = vmatpush.msra.mxu3 %v3502_v40 }
 0x472   :  { %v3459_v43 = vadd.f32 %v274_v42, %v270_v41  ;;  %v3507_v41 = vld [vmem:[%s4481_s8 + $0x10] sm:$0xff]  ;;  %v3519_v42 = vld [vmem:[%s4481_s8] sm:$0xff] }
 0x473   :  { %382 = vmatpush.msra.mxu3 %v3507_v41 }
 0x474   :  { %285 = vrot.lane.b32.xlu1 %v3459_v43, %s3148_s21 }
 0x475   :  { %v289_v18 = vpop.permute.xlu2 %288  ;;  %383 = vmatpush.msra.mxu3 %v3513_v39 }
 0x477   :  { %384 = vmatpush.msra.mxu3 %v3519_v42 }
 0x47c   :  { %190 = vrot.lane.b32.xlu1 %v188_v45, %s3148_s21 }
 0x4e6   :  { %v286_v54 = vpop.permute.xlu1 %285 }
 0x4e7   :  { %v291_v55 = vsel %vm49_vm0, %v286_v54, %v289_v18  ;;  %v356_v54 = vmul.f32 0.1, %v3375_v56 }
 0x4e8   :  { %2719 = vmatmul.msk.f32.vlgmr.msra.gmra.mxu2 %vm115_vm1, %v291_v55 }
 0x4e9   :  { %941 = vmatpush.msra.mxu2 %v3420_v31 }
 0x4eb   :  { %942 = vmatpush.msra.mxu2 %v3425_v32 }
 0x4ed   :  { %943 = vmatpush.msra.mxu2 %v3431_v33 }
 0x4ee   :  { %v191_v24 = vpop.permute.xlu1 %190 }
 0x4ef   :  { %944 = vmatpush.msra.mxu2 %v3437_v34  ;;  %v193_v26 = vadd.f32 %v191_v24, %v187_v25 }
 0x4f1   :  { %945 = vmatpush.msra.mxu2 %v3443_v35 }
 0x4f3   :  { %946 = vmatpush.msra.mxu2 %v3449_v36 }
 0x4f5   :  { %947 = vmatpush.msra.mxu2 %v3455_v37 }
 0x4f7   :  { %948 = vmatpush.msra.mxu2 %v3468_v53 }
 0x56b   :  { %v315_v59 = vpop.f32.mrf.mxu2 }
 0x56c   :  { %v316_v60 = vadd.f32 %v3492_v58, %v315_v59 }
 0x56e   :  { %2821 = vtanh.f32 %v316_v60  ;;  %v2720_v63 = vmul.f32 -1.442695, %v316_v60 }
 0x570   :  { %2823 = vpow2.f32 %v2720_v63 }
 0x574   :  { %v2822_v62 = vpop.eup %2821 }
 0x575   :  { %340 = vrot.lane.b32.xlu0 %v2822_v62, %s3150_s14  ;;  %v3529_v62 = vld [vmem:[%s4482_s9] ss:$0 sm:$0xff] }
 0x576   :  { %v2824_v0 = vpop.eup %2823 }
 0x577   :  { %v321_v6 = vadd.f32 1.0, %v2824_v0 }
 0x579   :  { %2825 = vrcp.f32 %v321_v6  ;;  %v333_v16 = vand.u32 2147483648, %v321_v6  ;;  %vm327_vm11 = vweird.f32 %v321_v6  ;;  %v331_v17 = vand.u32 2147483647, %v321_v6 }
 0x57b   :  { %v334_v20 = vor.u32 1.1754944e-38, %v333_v16  ;;  %vm332_vm13 = vcmp.eq.f32.partialorder %v331_v17, 8.507059e+37 }
 0x57f   :  { %v2826_v10 = vpop.eup %2825 }
 0x580   :  { %v323_v11 = vmul.f32 %v2826_v10, %v321_v6  ;;  %vm328_vm10 = vweird.f32 %v2826_v10 }
 0x581   :  { %vm329_vm12 = vmor %vm327_vm11, %vm328_vm10 }
 0x582   :  { %v324_v12 = vsub.f32 1.0, %v323_v11 }
 0x584   :  { %v325_v13 = vmul.f32 %v2826_v10, %v324_v12 }
 0x586   :  { %v326_v15 = vadd.f32 %v2826_v10, %v325_v13 }
 0x588   :  { %v330_v19 = vsel %vm329_vm12, %v2826_v10, %v326_v15 }
 0x589   :  { %v335_v22 = vsel %vm332_vm13, %v334_v20, %v330_v19 }
 0x58a   :  { %v338_v27 = vmul.f32 %v335_v22, %v193_v26 }
 0x5e7   :  { %v341_v21 = vpop.permute.xlu0 %340 }
 0x5e8   :  { %v343_v23 = vmul.f32 %v341_v21, %v335_v22 }
 0x5ea   :  { %345 = vrot.lane.b32.xlu2 %v343_v23, %s3148_s21 }
 0x644   :  { %v346_v28 = vpop.permute.xlu2 %345 }
 0x645   :  { %v348_v30 = vadd.f32 %v346_v28, %v338_v27  ;;  %v359_v28 = vmul.f32 0.5, %v193_v26  ;;  %v2724_v26 = vld [vmem:[%s4473_s0 + $0x8] sm:$0xff] }
 0x647   :  { %2827 = vtanh.f32 %v348_v30  ;;  %v358_v27 = vmul.f32 0.5, %v348_v30 }
 0x64d   :  { %v2828_v38 = vpop.eup %2827 }
 0x64e   :  { %351 = vrot.lane.b32.xlu0 %v2828_v38, %s3150_s14  ;;  %v360_v38 = vadd.f32 %v359_v28, %v358_v27 }
 0x6c0   :  { %v352_v45 = vpop.permute.xlu0 %351 }
 0x6c1   :  { %v354_v18 = vmul.f32 %v352_v45, %v335_v22 }
 0x6c3   :  { %v355_v55 = vmul.f32 0.9, %v354_v18 }
 0x6c5   :  { %v357_v59 = vadd.f32 %v356_v54, %v355_v55 }
 0x6c7   :  { %365 = vrot.lane.b32.xlu1 %v357_v59, %s3148_s21 }
 0x739   :  { %v366_v60 = vpop.permute.xlu1 %365 }
 0x73a   :  { %2721 = vmatmul.msk.f32.vlgmr.msra.gmra.mxu3 %vm49_vm0, %v366_v60 }
 0x7bd   :  { %v386_v63 = vpop.f32.mrf.mxu3 }
 0x7be   :  { %v387_v0 = vadd.f32 %v3529_v62, %v386_v63 }
 0x7c0   :  { %2829 = vtanh.f32 %v387_v0  ;;  %v2722_v56 = vmul.f32 -1.442695, %v387_v0 }
 0x7c2   :  { %2831 = vpow2.f32 %v2722_v56 }
 0x7c6   :  { %v2830_v6 = vpop.eup %2829 }
 0x7c7   :  { %411 = vrot.lane.b32.xlu2 %v2830_v6, %s3150_s14  ;;  %v427_v6 = vmul.f32 0.1, %v357_v59 }
 0x7c8   :  { %v2832_v10 = vpop.eup %2831 }
 0x7c9   :  { %v392_v11 = vadd.f32 1.0, %v2832_v10 }
 0x7cb   :  { %2833 = vrcp.f32 %v392_v11  ;;  %v404_v19 = vand.u32 2147483648, %v392_v11  ;;  %vm398_vm15 = vweird.f32 %v392_v11  ;;  %v402_v20 = vand.u32 2147483647, %v392_v11 }
 0x7cd   :  { %v405_v22 = vor.u32 1.1754944e-38, %v404_v19  ;;  %vm403_vm3 = vcmp.eq.f32.partialorder %v402_v20, 8.507059e+37 }
 0x7d1   :  { %v2834_v12 = vpop.eup %2833 }
 0x7d2   :  { %v394_v13 = vmul.f32 %v2834_v12, %v392_v11  ;;  %vm399_vm14 = vweird.f32 %v2834_v12 }
 0x7d3   :  { %vm400_vm2 = vmor %vm398_vm15, %vm399_vm14 }
 0x7d4   :  { %v395_v15 = vsub.f32 1.0, %v394_v13 }
 0x7d6   :  { %v396_v16 = vmul.f32 %v2834_v12, %v395_v15 }
 0x7d8   :  { %v397_v17 = vadd.f32 %v2834_v12, %v396_v16 }
 0x7da   :  { %v401_v21 = vsel %vm400_vm2, %v2834_v12, %v397_v17 }
 0x7db   :  { %v406_v24 = vsel %vm403_vm3, %v405_v22, %v401_v21  ;;  %v430_v22 = vmul.f32 0.5, %v360_v38 }
 0x7dc   :  { %v409_v45 = vmul.f32 %v406_v24, %v360_v38  ;;  %v278_v38 = vmul.f32 0.5, %v3328_v44 }
 0x821   :  { %v412_v23 = vpop.permute.xlu2 %411 }
 0x822   :  { %v414_v25 = vmul.f32 %v412_v23, %v406_v24 }
 0x824   :  { %416 = vrot.lane.b32.xlu0 %v414_v25, %s3148_s21 }
 0x896   :  { %v417_v18 = vpop.permute.xlu0 %416 }
 0x897   :  { %v419_v54 = vadd.f32 %v417_v18, %v409_v45 }
 0x899   :  { %2835 = vtanh.f32 %v419_v54  ;;  %v429_v21 = vmul.f32 0.5, %v419_v54 }
 0x89b   :  { %v3557_v23 = vadd.f32 %v430_v22, %v429_v21 }
 0x89f   :  { %v2836_v55 = vpop.eup %2835 }
 0x8a0   :  { %422 = vrot.lane.b32.xlu1 %v2836_v55, %s3150_s14 }
 0x912   :  { %v423_v60 = vpop.permute.xlu1 %422 }
 0x913   :  { %v425_v63 = vmul.f32 %v423_v60, %v406_v24 }
 0x915   :  { %v426_v0 = vmul.f32 0.9, %v425_v63 }
 0x917   :  { %v3535_v56 = vadd.f32 %v427_v6, %v426_v0 }
 0x919   :  { %463 = vrot.lane.b32.xlu2 %v3535_v56, %s3150_s14  ;;  %v528_v60 = vmul.f32 0.1, %v3535_v56 }
 0x973   :  { %v464_v30 = vpop.permute.xlu2 %463 }
 0x974   :  { %v466_v10 = vsel %vm49_vm0, %v2724_v26, %v464_v30 }
 0x975   :  { %2725 = vmatmul.msk.f32.vlgmr.msrb.gmra.mxu0 %vm115_vm1, %v466_v10 }
 0x976   :  { %1108 = vmatpush.msrb.mxu0 %v3232_v1 }
 0x978   :  { %1109 = vmatpush.msrb.mxu0 %v3237_v2 }
 0x97a   :  { %1110 = vmatpush.msrb.mxu0 %v3245_v3 }
 0x97c   :  { %1111 = vmatpush.msrb.mxu0 %v3251_v4 }
 0x97e   :  { %1112 = vmatpush.msrb.mxu0 %v3257_v5 }
 0x980   :  { %1113 = vmatpush.msrb.mxu0 %v3263_v7 }
 0x982   :  { %1114 = vmatpush.msrb.mxu0 %v3270_v8 }
 0x984   :  { %1115 = vmatpush.msrb.mxu0 %v3279_v9 }
 0x9f2   :  { %v487_v59 = vpop.f32.mrf.mxu0 }
 0x9f3   :  { %v488_v11 = vadd.f32 %v3307_v14, %v487_v59 }
 0x9f5   :  { %2837 = vtanh.f32 %v488_v11  ;;  %v2726_v1 = vmul.f32 -1.442695, %v488_v11 }
 0x9f7   :  { %2839 = vpow2.f32 %v2726_v1 }
 0x9fb   :  { %v2838_v12 = vpop.eup %2837 }
 0x9fc   :  { %512 = vrot.lane.b32.xlu0 %v2838_v12, %s3150_s14 }
 0x9fd   :  { %v2840_v2 = vpop.eup %2839 }
 0x9fe   :  { %v493_v3 = vadd.f32 1.0, %v2840_v2 }
 0xa00   :  { %2841 = vrcp.f32 %v493_v3  ;;  %v505_v8 = vand.u32 2147483648, %v493_v3  ;;  %vm499_vm5 = vweird.f32 %v493_v3  ;;  %v503_v9 = vand.u32 2147483647, %v493_v3 }
 0xa02   :  { %v506_v16 = vor.u32 1.1754944e-38, %v505_v8  ;;  %vm504_vm7 = vcmp.eq.f32.partialorder %v503_v9, 8.507059e+37  ;;  %v277_v9 = vmul.f32 0.5, %v3411_v29 }
 0xa06   :  { %v2842_v4 = vpop.eup %2841 }
 0xa07   :  { %v495_v5 = vmul.f32 %v2842_v4, %v493_v3  ;;  %vm500_vm4 = vweird.f32 %v2842_v4 }
 0xa08   :  { %vm501_vm6 = vmor %vm499_vm5, %vm500_vm4 }
 0xa09   :  { %v496_v13 = vsub.f32 1.0, %v495_v5 }
 0xa0b   :  { %v497_v7 = vmul.f32 %v2842_v4, %v496_v13 }
 0xa0d   :  { %v498_v15 = vadd.f32 %v2842_v4, %v497_v7 }
 0xa0f   :  { %v502_v14 = vsel %vm501_vm6, %v2842_v4, %v498_v15 }
 0xa10   :  { %v507_v19 = vsel %vm504_vm7, %v506_v16, %v502_v14 }
 0xa11   :  { %v510_v24 = vmul.f32 %v507_v19, %v3557_v23 }
 0xa6e   :  { %v513_v17 = vpop.permute.xlu0 %512 }
 0xa6f   :  { %v515_v20 = vmul.f32 %v513_v17, %v507_v19 }
 0xa71   :  { %517 = vrot.lane.b32.xlu1 %v515_v20, %s3148_s21 }
 0xa79   :  { %537 = vrot.lane.b32.xlu1 %v3459_v43, %s3150_s14 }
 0xae3   :  { %v518_v25 = vpop.permute.xlu1 %517 }
 0xae4   :  { %v3560_v27 = vadd.f32 %v518_v25, %v510_v24  ;;  %v602_v24 = vmul.f32 0.1, %v3459_v43 }
 0xae6   :  { %2843 = vtanh.f32 %v3560_v27 }
 0xaeb   :  { %v538_v54 = vpop.permute.xlu1 %537 }
 0xaec   :  { %v2844_v28 = vpop.eup %2843 }
 0xaed   :  { %523 = vrot.lane.b32.xlu2 %v2844_v28, %s3150_s14 }
 0xb47   :  { %v524_v45 = vpop.permute.xlu2 %523 }
 0xb48   :  { %v526_v18 = vmul.f32 %v524_v45, %v507_v19 }
 0xb4a   :  { %v527_v55 = vmul.f32 0.9, %v526_v18 }
 0xb4c   :  { %v3565_v63 = vadd.f32 %v528_v60, %v527_v55 }
 0xb4e   :  { %534 = vrot.lane.b32.xlu0 %v3565_v63, %s3148_s21 }
 0xb56   :  { %280 = vrot.lane.b32.xlu0 %v278_v38, %s3148_s21 }
 0xbc0   :  { %v535_v0 = vpop.permute.xlu0 %534 }
 0xbc1   :  { %v540_v6 = vsel %vm49_vm0, %v535_v0, %v538_v54 }
 0xbc2   :  { %2727 = vmatmul.msk.f32.vlgmr.msrb.gmra.mxu1 %vm115_vm1, %v540_v6  ;;  %v3616_v6 = vld [vmem:[%s4483_s10 + $0x18] sm:$0xff] }
 0xbc3   :  { %1182 = vmatpush.msrb.mxu1 %v3336_v46  ;;  %452 = vmatpush.msrb.mxu3 %v3616_v6 }
 0xbc5   :  { %1183 = vmatpush.msrb.mxu1 %v3341_v47 }
 0xbc7   :  { %1184 = vmatpush.msrb.mxu1 %v3347_v48 }
 0xbc8   :  { %v281_v8 = vpop.permute.xlu0 %280 }
 0xbc9   :  { %1185 = vmatpush.msrb.mxu1 %v3353_v49  ;;  %v3587_v14 = vadd.f32 %v281_v8, %v277_v9 }
 0xbcb   :  { %1186 = vmatpush.msrb.mxu1 %v3360_v50 }
 0xbcd   :  { %1187 = vmatpush.msrb.mxu1 %v3365_v51 }
 0xbcf   :  { %1188 = vmatpush.msrb.mxu1 %v3371_v52 }
 0xbd1   :  { %1189 = vmatpush.msrb.mxu1 %v3382_v57 }
 0xc3f   :  { %v561_v44 = vpop.f32.mrf.mxu1 }
 0xc40   :  { %v562_v26 = vadd.f32 %v3406_v61, %v561_v44  ;;  %v3622_v44 = vld [vmem:[%s4483_s10 + $0x10] sm:$0xff] }
 0xc41   :  { %453 = vmatpush.msrb.mxu3 %v3622_v44 }
 0xc42   :  { %2845 = vtanh.f32 %v562_v26  ;;  %v2728_v46 = vmul.f32 -1.442695, %v562_v26  ;;  %v3633_v26 = vld [vmem:[%s4483_s10] sm:$0xff] }
 0xc44   :  { %2847 = vpow2.f32 %v2728_v46 }
 0xc48   :  { %v2846_v30 = vpop.eup %2845 }
 0xc49   :  { %586 = vrot.lane.b32.xlu2 %v2846_v30, %s3150_s14 }
 0xc4a   :  { %v2848_v47 = vpop.eup %2847 }
 0xc4b   :  { %v567_v48 = vadd.f32 1.0, %v2848_v47 }
 0xc4d   :  { %2849 = vrcp.f32 %v567_v48  ;;  %v579_v2 = vand.u32 2147483648, %v567_v48  ;;  %vm573_vm9 = vweird.f32 %v567_v48  ;;  %v577_v3 = vand.u32 2147483647, %v567_v48 }
 0xc4f   :  { %v580_v5 = vor.u32 1.1754944e-38, %v579_v2  ;;  %vm578_vm11 = vcmp.eq.f32.partialorder %v577_v3, 8.507059e+37 }
 0xc53   :  { %v2850_v10 = vpop.eup %2849 }
 0xc54   :  { %v569_v59 = vmul.f32 %v2850_v10, %v567_v48  ;;  %vm574_vm8 = vweird.f32 %v2850_v10 }
 0xc55   :  { %vm575_vm10 = vmor %vm573_vm9, %vm574_vm8 }
 0xc56   :  { %v570_v11 = vsub.f32 1.0, %v569_v59 }
 0xc58   :  { %v571_v12 = vmul.f32 %v2850_v10, %v570_v11 }
 0xc5a   :  { %v572_v1 = vadd.f32 %v2850_v10, %v571_v12 }
 0xc5c   :  { %v576_v4 = vsel %vm575_vm10, %v2850_v10, %v572_v1 }
 0xc5d   :  { %v581_v7 = vsel %vm578_vm11, %v580_v5, %v576_v4 }
 0xc5e   :  { %v584_v16 = vmul.f32 %v581_v7, %v3587_v14 }
 0xca3   :  { %v587_v13 = vpop.permute.xlu2 %586 }
 0xca4   :  { %v589_v15 = vmul.f32 %v587_v13, %v581_v7  ;;  %v530_v13 = vmul.f32 0.5, %v3560_v27 }
 0xca6   :  { %591 = vrot.lane.b32.xlu1 %v589_v15, %s3148_s21 }
 0xcae   :  { %611 = vrot.lane.b32.xlu1 %v3565_v63, %s3150_s14 }
 0xd18   :  { %v592_v17 = vpop.permute.xlu1 %591 }
 0xd19   :  { %v3590_v19 = vadd.f32 %v592_v17, %v584_v16 }
 0xd1b   :  { %2851 = vtanh.f32 %v3590_v19 }
 0xd20   :  { %v612_v29 = vpop.permute.xlu1 %611 }
 0xd21   :  { %v2852_v20 = vpop.eup %2851 }
 0xd22   :  { %597 = vrot.lane.b32.xlu2 %v2852_v20, %s3150_s14  ;;  %v3653_v20 = vld [vmem:[%s4484_s11] ss:$0 sm:$0xff] }
 0xd7c   :  { %v598_v21 = vpop.permute.xlu2 %597 }
 0xd7d   :  { %v600_v22 = vmul.f32 %v598_v21, %v581_v7  ;;  %v531_v7 = vmul.f32 0.5, %v3557_v23 }
 0xd7f   :  { %v601_v25 = vmul.f32 0.9, %v600_v22  ;;  %v532_v15 = vadd.f32 %v531_v7, %v530_v13 }
 0xd81   :  { %v3595_v28 = vadd.f32 %v602_v24, %v601_v25  ;;  %v676_v25 = vmul.f32 0.1, %v3565_v63 }
 0xd83   :  { %608 = vrot.lane.b32.xlu0 %v3595_v28, %s3148_s21 }
 0xdf5   :  { %v609_v45 = vpop.permute.xlu0 %608 }
 0xdf6   :  { %v614_v18 = vsel %vm49_vm0, %v609_v45, %v612_v29 }
 0xdf7   :  { %2729 = vmatmul.msk.f32.vlgmr.msrb.gmra.mxu2 %vm115_vm1, %v614_v18 }
 0xdf8   :  { %1256 = vmatpush.msrb.mxu2 %v3420_v31 }
 0xdfa   :  { %1257 = vmatpush.msrb.mxu2 %v3425_v32 }
 0xdfc   :  { %1258 = vmatpush.msrb.mxu2 %v3431_v33 }
 0xdfe   :  { %1259 = vmatpush.msrb.mxu2 %v3437_v34 }
 0xe00   :  { %1260 = vmatpush.msrb.mxu2 %v3443_v35 }
 0xe02   :  { %1261 = vmatpush.msrb.mxu2 %v3449_v36 }
 0xe04   :  { %1262 = vmatpush.msrb.mxu2 %v3455_v37 }
 0xe06   :  { %1263 = vmatpush.msrb.mxu2 %v3468_v53 }
 0xe7a   :  { %v635_v43 = vpop.f32.mrf.mxu2 }
 0xe7b   :  { %v636_v55 = vadd.f32 %v3492_v58, %v635_v43 }
 0xe7d   :  { %2853 = vtanh.f32 %v636_v55  ;;  %v2730_v38 = vmul.f32 -1.442695, %v636_v55 }
 0xe7f   :  { %2855 = vpow2.f32 %v2730_v38 }
 0xe83   :  { %v2854_v60 = vpop.eup %2853 }
 0xe84   :  { %660 = vrot.lane.b32.xlu2 %v2854_v60, %s3150_s14 }
 0xe85   :  { %v2856_v54 = vpop.eup %2855 }
 0xe86   :  { %v641_v0 = vadd.f32 1.0, %v2856_v54 }
 0xe88   :  { %2857 = vrcp.f32 %v641_v0  ;;  %v653_v59 = vand.u32 2147483648, %v641_v0  ;;  %vm647_vm13 = vweird.f32 %v641_v0  ;;  %v651_v11 = vand.u32 2147483647, %v641_v0 }
 0xe8a   :  { %v654_v1 = vor.u32 1.1754944e-38, %v653_v59  ;;  %vm652_vm15 = vcmp.eq.f32.partialorder %v651_v11, 8.507059e+37 }
 0xe8c   :  { %436 = vrot.lane.b32.xlu2 %v3535_v56, %s3148_s21  ;;  %v3627_v56 = vld [vmem:[%s4483_s10 + $0x8] sm:$0xff] }
 0xe8d   :  { %454 = vmatpush.msrb.mxu3 %v3627_v56 }
 0xe8e   :  { %v2858_v30 = vpop.eup %2857 }
 0xe8f   :  { %455 = vmatpush.msrb.mxu3 %v3633_v26  ;;  %v643_v46 = vmul.f32 %v2858_v30, %v641_v0  ;;  %vm648_vm12 = vweird.f32 %v2858_v30 }
 0xe90   :  { %vm649_vm14 = vmor %vm647_vm13, %vm648_vm12 }
 0xe91   :  { %698 = vmatpush.msra.mxu3 %v3502_v40  ;;  %v644_v47 = vsub.f32 1.0, %v643_v46 }
 0xe93   :  { %699 = vmatpush.msra.mxu3 %v3507_v41  ;;  %v645_v48 = vmul.f32 %v2858_v30, %v644_v47 }
 0xe95   :  { %700 = vmatpush.msra.mxu3 %v3513_v39  ;;  %v646_v10 = vadd.f32 %v2858_v30, %v645_v48 }
 0xe97   :  { %701 = vmatpush.msra.mxu3 %v3519_v42  ;;  %v650_v12 = vsel %vm649_vm14, %v2858_v30, %v646_v10 }
 0xe98   :  { %v655_v3 = vsel %vm652_vm15, %v654_v1, %v650_v12 }
 0xe99   :  { %v658_v8 = vmul.f32 %v655_v3, %v532_v15 }
 0xede   :  { %v661_v2 = vpop.permute.xlu2 %660 }
 0xedf   :  { %v663_v4 = vmul.f32 %v661_v2, %v655_v3 }
 0xee1   :  { %665 = vrot.lane.b32.xlu0 %v663_v4, %s3148_s21  ;;  %v679_v4 = vmul.f32 0.5, %v532_v15  ;;  %v2734_v15 = vld [vmem:[%s4473_s0 + $0x10] sm:$0xff] }
 0xee6   :  { %v437_v5 = vpop.permute.xlu2 %436 }
 0xee7   :  { %2723 = vmatmul.msk.f32.vlgmr.msrb.gmra.mxu3 %vm49_vm0, %v437_v5 }
 0xee8   :  { %766 = vmatpush.msrb.mxu3 %v3616_v6 }
 0xeea   :  { %767 = vmatpush.msrb.mxu3 %v3622_v44 }
 0xeec   :  { %768 = vmatpush.msrb.mxu3 %v3627_v56 }
 0xeee   :  { %769 = vmatpush.msrb.mxu3 %v3633_v26 }
 0xf53   :  { %v666_v9 = vpop.permute.xlu0 %665 }
 0xf54   :  { %v668_v16 = vadd.f32 %v666_v9, %v658_v8 }
 0xf56   :  { %2859 = vtanh.f32 %v668_v16 }
 0xf5c   :  { %v2860_v17 = vpop.eup %2859 }
 0xf5d   :  { %671 = vrot.lane.b32.xlu1 %v2860_v17, %s3150_s14 }
 0xf6a   :  { %v457_v21 = vpop.f32.mrf.mxu3 }
 0xf6b   :  { %v458_v22 = vadd.f32 %v3653_v20, %v457_v21 }
 0xf6d   :  { %460 = vst [vmem:[#allocation6] sm:$0xff] %v458_v22 }
 0xfcf   :  { %v672_v27 = vpop.permute.xlu1 %671 }
 0xfd0   :  { %v674_v24 = vmul.f32 %v672_v27, %v655_v3  ;;  %v678_v3 = vmul.f32 0.5, %v668_v16 }
 0xfd2   :  { %v675_v23 = vmul.f32 0.9, %v674_v24  ;;  %v680_v5 = vadd.f32 %v679_v4, %v678_v3 }
 0xfd4   :  { %v677_v29 = vadd.f32 %v676_v25, %v675_v23  ;;  %v3679_v25 = vld [vmem:[%s4475_s2 + $0x38] sm:$0xff] }
 0xfd6   :  { %682 = vrot.lane.b32.xlu0 %v677_v29, %s3148_s21  ;;  %v744_v27 = vmul.f32 0.1, %v677_v29  ;;  %v3685_v29 = vld [vmem:[%s4475_s2 + $0x30] sm:$0xff] }
0x1048   :  { %v683_v45 = vpop.permute.xlu0 %682 }
0x1049   :  { %2731 = vmatmul.msk.f32.vlgmr.msra.gmra.mxu3 %vm49_vm0, %v683_v45  ;;  %v3691_v45 = vld [vmem:[%s4475_s2 + $0x28] sm:$0xff] }
0x104a   :  { %1013 = vmatpush.msra.mxu3 %v3502_v40 }
0x104c   :  { %1014 = vmatpush.msra.mxu3 %v3507_v41 }
0x104e   :  { %1015 = vmatpush.msra.mxu3 %v3513_v39 }
0x1050   :  { %1016 = vmatpush.msra.mxu3 %v3519_v42 }
0x10cc   :  { %v703_v18 = vpop.f32.mrf.mxu3 }
0x10cd   :  { %v704_v43 = vadd.f32 %v3529_v62, %v703_v18  ;;  %v3697_v18 = vld [vmem:[%s4475_s2 + $0x20] sm:$0xff] }
0x10cf   :  { %2861 = vtanh.f32 %v704_v43  ;;  %v2732_v63 = vmul.f32 -1.442695, %v704_v43  ;;  %v3703_v43 = vld [vmem:[%s4475_s2 + $0x18] sm:$0xff] }
0x10d1   :  { %2863 = vpow2.f32 %v2732_v63  ;;  %v3715_v63 = vld [vmem:[%s4475_s2 + $0x8] sm:$0xff] }
0x10d5   :  { %v2862_v55 = vpop.eup %2861 }
0x10d6   :  { %728 = vrot.lane.b32.xlu1 %v2862_v55, %s3150_s14  ;;  %v3709_v55 = vld [vmem:[%s4475_s2 + $0x10] sm:$0xff] }
0x10d7   :  { %v2864_v60 = vpop.eup %2863 }
0x10d8   :  { %v709_v38 = vadd.f32 1.0, %v2864_v60  ;;  %v3721_v60 = vld [vmem:[%s4475_s2] sm:$0xff] }
0x10da   :  { %2865 = vrcp.f32 %v709_v38  ;;  %v721_v48 = vand.u32 2147483648, %v709_v38  ;;  %vm715_vm3 = vweird.f32 %v709_v38  ;;  %v719_v10 = vand.u32 2147483647, %v709_v38 }
0x10dc   :  { %v722_v11 = vor.u32 1.1754944e-38, %v721_v48  ;;  %vm720_vm5 = vcmp.eq.f32.partialorder %v719_v10, 8.507059e+37 }
0x10e0   :  { %v2866_v54 = vpop.eup %2865 }
0x10e1   :  { %v711_v0 = vmul.f32 %v2866_v54, %v709_v38  ;;  %vm716_vm2 = vweird.f32 %v2866_v54 }
0x10e2   :  { %vm717_vm4 = vmor %vm715_vm3, %vm716_vm2 }
0x10e3   :  { %v712_v30 = vsub.f32 1.0, %v711_v0 }
0x10e5   :  { %v713_v46 = vmul.f32 %v2866_v54, %v712_v30 }
0x10e7   :  { %v714_v47 = vadd.f32 %v2866_v54, %v713_v46 }
0x10e9   :  { %v718_v59 = vsel %vm717_vm4, %v2866_v54, %v714_v47  ;;  %v3727_v54 = vld [vmem:[%s4476_s3] ss:$0 sm:$0xff] }
0x10ea   :  { %v723_v1 = vsel %vm720_vm5, %v722_v11, %v718_v59 }
0x10eb   :  { %v726_v13 = vmul.f32 %v723_v1, %v680_v5 }
0x1148   :  { %v729_v12 = vpop.permute.xlu1 %728 }
0x1149   :  { %v731_v2 = vmul.f32 %v729_v12, %v723_v1 }
0x114b   :  { %733 = vrot.lane.b32.xlu2 %v731_v2, %s3148_s21 }
0x11a5   :  { %v734_v7 = vpop.permute.xlu2 %733 }
0x11a6   :  { %v736_v8 = vadd.f32 %v734_v7, %v726_v13 }
0x11a8   :  { %2867 = vtanh.f32 %v736_v8 }
0x11ae   :  { %v2868_v9 = vpop.eup %2867 }
0x11af   :  { %739 = vrot.lane.b32.xlu0 %v2868_v9, %s3150_s14 }
0x1221   :  { %v740_v17 = vpop.permute.xlu0 %739 }
0x1222   :  { %v742_v21 = vmul.f32 %v740_v17, %v723_v1 }
0x1224   :  { %v743_v22 = vmul.f32 0.9, %v742_v21  ;;  %v746_v21 = vmul.f32 0.5, %v736_v8 }
0x1226   :  { %v3667_v24 = vadd.f32 %v744_v27, %v743_v22  ;;  %v747_v22 = vmul.f32 0.5, %v680_v5 }
0x1228   :  { %778 = vrot.lane.b32.xlu1 %v3667_v24, %s3150_s14  ;;  %v3734_v27 = vadd.f32 %v747_v22, %v746_v21 }
0x129a   :  { %v779_v16 = vpop.permute.xlu1 %778 }
0x129b   :  { %v781_v23 = vsel %vm49_vm0, %v2734_v15, %v779_v16 }
0x129c   :  { %2735 = vmatmul.msk.f32.vlgmr.msra.gmra.mxu0 %vm115_vm1, %v781_v23 }
0x129d   :  { %1423 = vmatpush.msra.mxu0 %v3679_v25 }
0x129f   :  { %1424 = vmatpush.msra.mxu0 %v3685_v29 }
0x12a1   :  { %1425 = vmatpush.msra.mxu0 %v3691_v45 }
0x12a3   :  { %1426 = vmatpush.msra.mxu0 %v3697_v18 }
0x12a5   :  { %1427 = vmatpush.msra.mxu0 %v3703_v43 }
0x12a7   :  { %1428 = vmatpush.msra.mxu0 %v3709_v55 }
0x12a9   :  { %1429 = vmatpush.msra.mxu0 %v3715_v63 }
0x12ab   :  { %1430 = vmatpush.msra.mxu0 %v3721_v60 }
0x1319   :  { %v802_v38 = vpop.f32.mrf.mxu0 }
0x131a   :  { %v803_v0 = vadd.f32 %v3727_v54, %v802_v38 }
0x131c   :  { %2869 = vtanh.f32 %v803_v0  ;;  %v2736_v46 = vmul.f32 -1.442695, %v803_v0 }
0x131e   :  { %2871 = vpow2.f32 %v2736_v46 }
0x1322   :  { %v2870_v30 = vpop.eup %2869 }
0x1323   :  { %827 = vrot.lane.b32.xlu2 %v2870_v30, %s3150_s14 }
0x1324   :  { %v2872_v47 = vpop.eup %2871 }
0x1325   :  { %v808_v48 = vadd.f32 1.0, %v2872_v47  ;;  %v843_v47 = vmul.f32 0.1, %v3667_v24 }
0x1327   :  { %2873 = vrcp.f32 %v808_v48  ;;  %v820_v2 = vand.u32 2147483648, %v808_v48  ;;  %vm814_vm7 = vweird.f32 %v808_v48  ;;  %v818_v3 = vand.u32 2147483647, %v808_v48 }
0x1329   :  { %v821_v13 = vor.u32 1.1754944e-38, %v820_v2  ;;  %vm819_vm9 = vcmp.eq.f32.partialorder %v818_v3, 8.507059e+37 }
0x132d   :  { %v2874_v10 = vpop.eup %2873 }
0x132e   :  { %v810_v59 = vmul.f32 %v2874_v10, %v808_v48  ;;  %vm815_vm6 = vweird.f32 %v2874_v10 }
0x132f   :  { %vm816_vm8 = vmor %vm814_vm7, %vm815_vm6 }
0x1330   :  { %v811_v11 = vsub.f32 1.0, %v810_v59  ;;  %v3751_v59 = vld [vmem:[%s4477_s4 + $0x38] sm:$0xff] }
0x1332   :  { %v812_v12 = vmul.f32 %v2874_v10, %v811_v11  ;;  %v3757_v11 = vld [vmem:[%s4477_s4 + $0x30] sm:$0xff] }
0x1334   :  { %v813_v1 = vadd.f32 %v2874_v10, %v812_v12  ;;  %v3763_v12 = vld [vmem:[%s4477_s4 + $0x28] sm:$0xff] }
0x1336   :  { %v817_v4 = vsel %vm816_vm8, %v2874_v10, %v813_v1 }
0x1337   :  { %v822_v9 = vsel %vm819_vm9, %v821_v13, %v817_v4 }
0x1338   :  { %v825_v15 = vmul.f32 %v822_v9, %v3734_v27 }
0x137d   :  { %v828_v7 = vpop.permute.xlu2 %827 }
0x137e   :  { %v830_v17 = vmul.f32 %v828_v7, %v822_v9 }
0x1380   :  { %832 = vrot.lane.b32.xlu0 %v830_v17, %s3148_s21 }
0x1388   :  { %852 = vrot.lane.b32.xlu0 %v3595_v28, %s3150_s14 }
0x13f2   :  { %v833_v16 = vpop.permute.xlu0 %832 }
0x13f3   :  { %v3737_v23 = vadd.f32 %v833_v16, %v825_v15 }
0x13f5   :  { %2875 = vtanh.f32 %v3737_v23 }
0x13fa   :  { %v853_v5 = vpop.permute.xlu0 %852 }
0x13fb   :  { %v2876_v38 = vpop.eup %2875 }
0x13fc   :  { %838 = vrot.lane.b32.xlu1 %v2876_v38, %s3150_s14  ;;  %v604_v38 = vmul.f32 0.5, %v3590_v19 }
0x146e   :  { %v839_v0 = vpop.permute.xlu1 %838 }
0x146f   :  { %v841_v30 = vmul.f32 %v839_v0, %v822_v9  ;;  %v605_v0 = vmul.f32 0.5, %v3587_v14 }
0x1471   :  { %v842_v46 = vmul.f32 0.9, %v841_v30  ;;  %v3778_v30 = vadd.f32 %v605_v0, %v604_v38 }
0x1473   :  { %v3742_v48 = vadd.f32 %v843_v47, %v842_v46 }
0x1475   :  { %849 = vrot.lane.b32.xlu2 %v3742_v48, %s3148_s21 }
0x14cf   :  { %v850_v8 = vpop.permute.xlu2 %849 }
0x14d0   :  { %v855_v10 = vsel %vm49_vm0, %v850_v8, %v853_v5 }
0x14d1   :  { %2737 = vmatmul.msk.f32.vlgmr.msra.gmra.mxu1 %vm115_vm1, %v855_v10 }
0x14d2   :  { %1497 = vmatpush.msra.mxu1 %v3751_v59 }
0x14d4   :  { %1498 = vmatpush.msra.mxu1 %v3757_v11 }
0x14d6   :  { %1499 = vmatpush.msra.mxu1 %v3763_v12 }
0x14d8   :  { %1500 = vmatpush.msra.mxu1 %v3353_v49 }
0x14da   :  { %1501 = vmatpush.msra.mxu1 %v3360_v50 }
0x14dc   :  { %1502 = vmatpush.msra.mxu1 %v3365_v51 }
0x14de   :  { %1503 = vmatpush.msra.mxu1 %v3371_v52 }
0x14e0   :  { %1504 = vmatpush.msra.mxu1 %v3382_v57 }
0x154e   :  { %v876_v1 = vpop.f32.mrf.mxu1 }
0x154f   :  { %v877_v2 = vadd.f32 %v3406_v61, %v876_v1 }
0x1551   :  { %2877 = vtanh.f32 %v877_v2  ;;  %v2738_v4 = vmul.f32 -1.442695, %v877_v2  ;;  %v917_v2 = vmul.f32 0.1, %v3595_v28 }
0x1553   :  { %2879 = vpow2.f32 %v2738_v4 }
0x1557   :  { %v2878_v3 = vpop.eup %2877 }
0x1558   :  { %901 = vrot.lane.b32.xlu1 %v2878_v3, %s3150_s14 }
0x1559   :  { %v2880_v13 = vpop.eup %2879 }
0x155a   :  { %v882_v7 = vadd.f32 1.0, %v2880_v13 }
0x155c   :  { %2881 = vrcp.f32 %v882_v7  ;;  %v894_v52 = vand.u32 2147483648, %v882_v7  ;;  %vm888_vm11 = vweird.f32 %v882_v7  ;;  %v892_v57 = vand.u32 2147483647, %v882_v7 }
0x155e   :  { %v895_v21 = vor.u32 1.1754944e-38, %v894_v52  ;;  %vm893_vm13 = vcmp.eq.f32.partialorder %v892_v57, 8.507059e+37 }
0x1562   :  { %v2882_v49 = vpop.eup %2881 }
0x1563   :  { %v884_v50 = vmul.f32 %v2882_v49, %v882_v7  ;;  %vm889_vm10 = vweird.f32 %v2882_v49 }
0x1564   :  { %vm890_vm12 = vmor %vm888_vm11, %vm889_vm10 }
0x1565   :  { %v885_v9 = vsub.f32 1.0, %v884_v50 }
0x1567   :  { %v886_v51 = vmul.f32 %v2882_v49, %v885_v9 }
0x1569   :  { %v887_v17 = vadd.f32 %v2882_v49, %v886_v51 }
0x156b   :  { %v891_v61 = vsel %vm890_vm12, %v2882_v49, %v887_v17 }
0x156c   :  { %v896_v15 = vsel %vm893_vm13, %v895_v21, %v891_v61  ;;  %v845_v61 = vmul.f32 0.5, %v3737_v23  ;;  %v846_v21 = vmul.f32 0.5, %v3734_v27 }
0x156d   :  { %v899_v46 = vmul.f32 %v896_v15, %v3778_v30 }
0x15ca   :  { %v902_v22 = vpop.permute.xlu1 %901 }
0x15cb   :  { %v904_v16 = vmul.f32 %v902_v22, %v896_v15  ;;  %v847_v22 = vadd.f32 %v846_v21, %v845_v61  ;;  %v2744_v21 = vld [vmem:[%s4473_s0 + $0x18] sm:$0xff] }
0x15cd   :  { %906 = vrot.lane.b32.xlu2 %v904_v16, %s3148_s21 }
0x15d5   :  { %926 = vrot.lane.b32.xlu2 %v3742_v48, %s3150_s14 }
0x1627   :  { %v907_v47 = vpop.permute.xlu2 %906 }
0x1628   :  { %v3781_v5 = vadd.f32 %v907_v47, %v899_v46 }
0x162a   :  { %2883 = vtanh.f32 %v3781_v5 }
0x162f   :  { %v927_v14 = vpop.permute.xlu2 %926 }
0x1630   :  { %v2884_v8 = vpop.eup %2883 }
0x1631   :  { %912 = vrot.lane.b32.xlu0 %v2884_v8, %s3150_s14 }
0x16a3   :  { %v913_v10 = vpop.permute.xlu0 %912 }
0x16a4   :  { %v915_v1 = vmul.f32 %v913_v10, %v896_v15 }
0x16a6   :  { %v916_v3 = vmul.f32 0.9, %v915_v1 }
0x16a8   :  { %v3786_v19 = vadd.f32 %v917_v2, %v916_v3  ;;  %v991_v2 = vmul.f32 0.1, %v3742_v48 }
0x16aa   :  { %923 = vrot.lane.b32.xlu1 %v3786_v19, %s3148_s21 }
0x171c   :  { %v924_v4 = vpop.permute.xlu1 %923 }
0x171d   :  { %v929_v13 = vsel %vm49_vm0, %v924_v4, %v927_v14 }
0x171e   :  { %2739 = vmatmul.msk.f32.vlgmr.msra.gmra.mxu2 %vm115_vm1, %v929_v13 }
0x171f   :  { %1571 = vmatpush.msra.mxu2 %v3420_v31 }
0x1721   :  { %1572 = vmatpush.msra.mxu2 %v3425_v32 }
0x1723   :  { %1573 = vmatpush.msra.mxu2 %v3431_v33 }
0x1725   :  { %1574 = vmatpush.msra.mxu2 %v3437_v34 }
0x1727   :  { %1575 = vmatpush.msra.mxu2 %v3443_v35 }
0x1729   :  { %1576 = vmatpush.msra.mxu2 %v3449_v36 }
0x172b   :  { %1577 = vmatpush.msra.mxu2 %v3455_v37 }
0x172d   :  { %1578 = vmatpush.msra.mxu2 %v3468_v53 }
0x17a1   :  { %v950_v28 = vpop.f32.mrf.mxu2 }
0x17a2   :  { %v951_v7 = vadd.f32 %v3492_v58, %v950_v28 }
0x17a4   :  { %2885 = vtanh.f32 %v951_v7  ;;  %v2740_v31 = vmul.f32 -1.442695, %v951_v7 }
0x17a6   :  { %2887 = vpow2.f32 %v2740_v31 }
0x17aa   :  { %v2886_v49 = vpop.eup %2885 }
0x17ab   :  { %975 = vrot.lane.b32.xlu0 %v2886_v49, %s3150_s14 }
0x17ac   :  { %v2888_v32 = vpop.eup %2887 }
0x17ad   :  { %v956_v33 = vadd.f32 1.0, %v2888_v32 }
0x17af   :  { %2889 = vrcp.f32 %v956_v33  ;;  %v968_v50 = vand.u32 2147483648, %v956_v33  ;;  %vm962_vm15 = vweird.f32 %v956_v33  ;;  %v966_v58 = vand.u32 2147483647, %v956_v33 }
0x17b1   :  { %v969_v51 = vor.u32 1.1754944e-38, %v968_v50  ;;  %vm967_vm3 = vcmp.eq.f32.partialorder %v966_v58, 8.507059e+37 }
0x17b3   :  { %750 = vrot.lane.b32.xlu0 %v3667_v24, %s3148_s21 }
0x17b5   :  { %v2890_v34 = vpop.eup %2889 }
0x17b6   :  { %v958_v35 = vmul.f32 %v2890_v34, %v956_v33  ;;  %vm963_vm14 = vweird.f32 %v2890_v34 }
0x17b7   :  { %vm964_vm2 = vmor %vm962_vm15, %vm963_vm14 }
0x17b8   :  { %v959_v36 = vsub.f32 1.0, %v958_v35 }
0x17ba   :  { %v960_v37 = vmul.f32 %v2890_v34, %v959_v36 }
0x17bc   :  { %v961_v53 = vadd.f32 %v2890_v34, %v960_v37  ;;  %v994_v37 = vmul.f32 0.5, %v847_v22 }
0x17be   :  { %v965_v9 = vsel %vm964_vm2, %v2890_v34, %v961_v53 }
0x17bf   :  { %v970_v24 = vsel %vm967_vm3, %v969_v51, %v965_v9 }
0x17c0   :  { %v973_v15 = vmul.f32 %v970_v24, %v847_v22 }
0x181d   :  { %v976_v17 = vpop.permute.xlu0 %975 }
0x181e   :  { %v978_v52 = vmul.f32 %v976_v17, %v970_v24 }
0x1820   :  { %980 = vrot.lane.b32.xlu1 %v978_v52, %s3148_s21 }
0x1825   :  { %v751_v57 = vpop.permute.xlu0 %750 }
0x1826   :  { %2733 = vmatmul.msk.f32.vlgmr.msrb.gmra.mxu3 %vm49_vm0, %v751_v57 }
0x1827   :  { %1081 = vmatpush.msrb.mxu3 %v3616_v6 }
0x1829   :  { %1082 = vmatpush.msrb.mxu3 %v3622_v44 }
0x182b   :  { %1083 = vmatpush.msrb.mxu3 %v3627_v56 }
0x182d   :  { %1084 = vmatpush.msrb.mxu3 %v3633_v26 }
0x1892   :  { %v981_v16 = vpop.permute.xlu1 %980 }
0x1893   :  { %v983_v38 = vadd.f32 %v981_v16, %v973_v15 }
0x1895   :  { %2891 = vtanh.f32 %v983_v38  ;;  %v993_v36 = vmul.f32 0.5, %v983_v38 }
0x1897   :  { %v995_v53 = vadd.f32 %v994_v37, %v993_v36 }
0x189b   :  { %v2892_v0 = vpop.eup %2891 }
0x189c   :  { %986 = vrot.lane.b32.xlu2 %v2892_v0, %s3150_s14 }
0x18a9   :  { %v771_v46 = vpop.f32.mrf.mxu3 }
0x18aa   :  { %v772_v47 = vadd.f32 %v3653_v20, %v771_v46 }
0x18ac   :  { %775 = vst [vmem:[#allocation6 + $0x8] sm:$0xff] %v772_v47 }
0x18f6   :  { %v987_v8 = vpop.permute.xlu2 %986 }
0x18f7   :  { %v989_v10 = vmul.f32 %v987_v8, %v970_v24 }
0x18f9   :  { %v990_v1 = vmul.f32 0.9, %v989_v10 }
0x18fb   :  { %v992_v23 = vadd.f32 %v991_v2, %v990_v1 }
0x18fd   :  { %997 = vrot.lane.b32.xlu1 %v992_v23, %s3148_s21  ;;  %v1059_v57 = vmul.f32 0.1, %v992_v23 }
0x196f   :  { %v998_v27 = vpop.permute.xlu1 %997 }
0x1970   :  { %2741 = vmatmul.msk.f32.vlgmr.msra.gmra.mxu3 %vm49_vm0, %v998_v27 }
0x1971   :  { %1328 = vmatpush.msra.mxu3 %v3502_v40 }
0x1973   :  { %1329 = vmatpush.msra.mxu3 %v3507_v41 }
0x1975   :  { %1330 = vmatpush.msra.mxu3 %v3513_v39 }
0x1977   :  { %1331 = vmatpush.msra.mxu3 %v3519_v42 }
0x19f3   :  { %v1018_v3 = vpop.f32.mrf.mxu3 }
0x19f4   :  { %v1019_v14 = vadd.f32 %v3529_v62, %v1018_v3 }
0x19f6   :  { %2893 = vtanh.f32 %v1019_v14  ;;  %v2742_v48 = vmul.f32 -1.442695, %v1019_v14 }
0x19f8   :  { %2895 = vpow2.f32 %v2742_v48 }
0x19fc   :  { %v2894_v4 = vpop.eup %2893 }
0x19fd   :  { %1043 = vrot.lane.b32.xlu2 %v2894_v4, %s3150_s14 }
0x19fe   :  { %v2896_v13 = vpop.eup %2895 }
0x19ff   :  { %v1024_v28 = vadd.f32 1.0, %v2896_v13 }
0x1a01   :  { %2897 = vrcp.f32 %v1024_v28  ;;  %v1036_v39 = vand.u32 2147483648, %v1024_v28  ;;  %vm1030_vm5 = vweird.f32 %v1024_v28  ;;  %v1034_v42 = vand.u32 2147483647, %v1024_v28 }
0x1a03   :  { %v1037_v32 = vor.u32 1.1754944e-38, %v1036_v39  ;;  %vm1035_vm7 = vcmp.eq.f32.partialorder %v1034_v42, 8.507059e+37 }
0x1a07   :  { %v2898_v7 = vpop.eup %2897 }
0x1a08   :  { %v1026_v40 = vmul.f32 %v2898_v7, %v1024_v28  ;;  %vm1031_vm4 = vweird.f32 %v2898_v7 }
0x1a09   :  { %vm1032_vm6 = vmor %vm1030_vm5, %vm1031_vm4 }
0x1a0a   :  { %v1027_v49 = vsub.f32 1.0, %v1026_v40 }
0x1a0c   :  { %v1028_v41 = vmul.f32 %v2898_v7, %v1027_v49  ;;  %v1062_v49 = vmul.f32 0.5, %v995_v53 }
0x1a0e   :  { %v1029_v31 = vadd.f32 %v2898_v7, %v1028_v41 }
0x1a10   :  { %v1033_v62 = vsel %vm1032_vm6, %v2898_v7, %v1029_v31 }
0x1a11   :  { %v1038_v34 = vsel %vm1035_vm7, %v1037_v32, %v1033_v62 }
0x1a12   :  { %v1041_v50 = vmul.f32 %v1038_v34, %v995_v53 }
0x1a57   :  { %v1044_v33 = vpop.permute.xlu2 %1043 }
0x1a58   :  { %v1046_v35 = vmul.f32 %v1044_v33, %v1038_v34 }
0x1a5a   :  { %1048 = vrot.lane.b32.xlu0 %v1046_v35, %s3148_s21 }
0x1acc   :  { %v1049_v58 = vpop.permute.xlu0 %1048 }
0x1acd   :  { %v1051_v9 = vadd.f32 %v1049_v58, %v1041_v50  ;;  %v3867_v58 = vld [vmem:[%s4477_s4 + $0x20] sm:$0xff] }
0x1acf   :  { %2899 = vtanh.f32 %v1051_v9  ;;  %v1061_v40 = vmul.f32 0.5, %v1051_v9  ;;  %v3873_v9 = vld [vmem:[%s4477_s4 + $0x18] sm:$0xff] }
0x1ad1   :  { %v3847_v41 = vadd.f32 %v1062_v49, %v1061_v40 }
0x1ad5   :  { %v2900_v51 = vpop.eup %2899 }
0x1ad6   :  { %1054 = vrot.lane.b32.xlu1 %v2900_v51, %s3150_s14  ;;  %v3879_v51 = vld [vmem:[%s4477_s4 + $0x10] sm:$0xff] }
0x1b48   :  { %v1055_v17 = vpop.permute.xlu1 %1054 }
0x1b49   :  { %v1057_v24 = vmul.f32 %v1055_v17, %v1038_v34  ;;  %v3885_v17 = vld [vmem:[%s4477_s4 + $0x8] sm:$0xff] }
0x1b4b   :  { %v1058_v52 = vmul.f32 0.9, %v1057_v24  ;;  %v3891_v24 = vld [vmem:[%s4477_s4] sm:$0xff] }
0x1b4d   :  { %v3825_v61 = vadd.f32 %v1059_v57, %v1058_v52  ;;  %v3897_v57 = vld [vmem:[%s4478_s5] ss:$0 sm:$0xff] }
0x1b4f   :  { %1093 = vrot.lane.b32.xlu2 %v3825_v61, %s3150_s14  ;;  %v1158_v35 = vmul.f32 0.1, %v3825_v61 }
0x1ba9   :  { %v1094_v22 = vpop.permute.xlu2 %1093 }
0x1baa   :  { %v1096_v15 = vsel %vm49_vm0, %v2744_v21, %v1094_v22 }
0x1bab   :  { %2745 = vmatmul.msk.f32.vlgmr.msrb.gmra.mxu0 %vm115_vm1, %v1096_v15 }
0x1bac   :  { %1738 = vmatpush.msrb.mxu0 %v3679_v25 }
0x1bae   :  { %1739 = vmatpush.msrb.mxu0 %v3685_v29 }
0x1bb0   :  { %1740 = vmatpush.msrb.mxu0 %v3691_v45 }
0x1bb2   :  { %1741 = vmatpush.msrb.mxu0 %v3697_v18 }
0x1bb4   :  { %1742 = vmatpush.msrb.mxu0 %v3703_v43 }
0x1bb6   :  { %1743 = vmatpush.msrb.mxu0 %v3709_v55 }
0x1bb8   :  { %1744 = vmatpush.msrb.mxu0 %v3715_v63 }
0x1bba   :  { %1745 = vmatpush.msrb.mxu0 %v3721_v60 }
0x1c28   :  { %v1117_v16 = vpop.f32.mrf.mxu0 }
0x1c29   :  { %v1118_v38 = vadd.f32 %v3727_v54, %v1117_v16 }
0x1c2b   :  { %2901 = vtanh.f32 %v1118_v38  ;;  %v2746_v46 = vmul.f32 -1.442695, %v1118_v38 }
0x1c2d   :  { %2903 = vpow2.f32 %v2746_v46 }
0x1c31   :  { %v2902_v0 = vpop.eup %2901 }
0x1c32   :  { %1142 = vrot.lane.b32.xlu0 %v2902_v0, %s3150_s14 }
0x1c33   :  { %v2904_v47 = vpop.eup %2903 }
0x1c34   :  { %v1123_v8 = vadd.f32 1.0, %v2904_v47 }
0x1c36   :  { %2905 = vrcp.f32 %v1123_v8  ;;  %v1135_v3 = vand.u32 2147483648, %v1123_v8  ;;  %vm1129_vm9 = vweird.f32 %v1123_v8  ;;  %v1133_v14 = vand.u32 2147483647, %v1123_v8 }
0x1c38   :  { %v1136_v48 = vor.u32 1.1754944e-38, %v1135_v3  ;;  %vm1134_vm11 = vcmp.eq.f32.partialorder %v1133_v14, 8.507059e+37 }
0x1c3c   :  { %v2906_v10 = vpop.eup %2905 }
0x1c3d   :  { %v1125_v1 = vmul.f32 %v2906_v10, %v1123_v8  ;;  %vm1130_vm8 = vweird.f32 %v2906_v10 }
0x1c3e   :  { %vm1131_vm10 = vmor %vm1129_vm9, %vm1130_vm8 }
0x1c3f   :  { %v1126_v2 = vsub.f32 1.0, %v1125_v1 }
0x1c41   :  { %v1127_v23 = vmul.f32 %v2906_v10, %v1126_v2 }
0x1c43   :  { %v1128_v27 = vadd.f32 %v2906_v10, %v1127_v23 }
0x1c45   :  { %v1132_v4 = vsel %vm1131_vm10, %v2906_v10, %v1128_v27 }
0x1c46   :  { %v1137_v28 = vsel %vm1134_vm11, %v1136_v48, %v1132_v4  ;;  %v919_v48 = vmul.f32 0.5, %v3781_v5 }
0x1c47   :  { %v1140_v31 = vmul.f32 %v1137_v28, %v3847_v41 }
0x1ca4   :  { %v1143_v13 = vpop.permute.xlu0 %1142 }
0x1ca5   :  { %v1145_v7 = vmul.f32 %v1143_v13, %v1137_v28  ;;  %v920_v13 = vmul.f32 0.5, %v3778_v30 }
0x1ca7   :  { %1147 = vrot.lane.b32.xlu1 %v1145_v7, %s3148_s21 }
0x1caf   :  { %1167 = vrot.lane.b32.xlu1 %v3786_v19, %s3150_s14 }
0x1d19   :  { %v1148_v39 = vpop.permute.xlu1 %1147 }
0x1d1a   :  { %v3850_v42 = vadd.f32 %v1148_v39, %v1140_v31 }
0x1d1c   :  { %2907 = vtanh.f32 %v3850_v42 }
0x1d21   :  { %v1168_v37 = vpop.permute.xlu1 %1167 }
0x1d22   :  { %v2908_v62 = vpop.eup %2907 }
0x1d23   :  { %1153 = vrot.lane.b32.xlu2 %v2908_v62, %s3150_s14 }
0x1d7d   :  { %v1154_v32 = vpop.permute.xlu2 %1153 }
0x1d7e   :  { %v1156_v33 = vmul.f32 %v1154_v32, %v1137_v28  ;;  %v3906_v28 = vadd.f32 %v920_v13, %v919_v48  ;;  %v1232_v32 = vmul.f32 0.1, %v3786_v19  ;;  %v3929_v19 = vld [vmem:[%s4479_s6 + $0x30] sm:$0xff] }
0x1d80   :  { %v1157_v34 = vmul.f32 0.9, %v1156_v33 }
0x1d82   :  { %v3855_v36 = vadd.f32 %v1158_v35, %v1157_v34 }
0x1d84   :  { %1164 = vrot.lane.b32.xlu0 %v3855_v36, %s3148_s21 }
0x1df6   :  { %v1165_v53 = vpop.permute.xlu0 %1164 }
0x1df7   :  { %v1170_v50 = vsel %vm49_vm0, %v1165_v53, %v1168_v37  ;;  %v3923_v37 = vld [vmem:[%s4479_s6 + $0x38] sm:$0xff]  ;;  %v3935_v53 = vld [vmem:[%s4479_s6 + $0x28] sm:$0xff] }
0x1df8   :  { %2747 = vmatmul.msk.f32.vlgmr.msrb.gmra.mxu1 %vm115_vm1, %v1170_v50  ;;  %v3941_v50 = vld [vmem:[%s4479_s6 + $0x20] sm:$0xff] }
0x1df9   :  { %1812 = vmatpush.msrb.mxu1 %v3751_v59 }
0x1dfb   :  { %1813 = vmatpush.msrb.mxu1 %v3757_v11 }
0x1dfd   :  { %1814 = vmatpush.msrb.mxu1 %v3763_v12 }
0x1dff   :  { %1815 = vmatpush.msrb.mxu1 %v3867_v58 }
0x1e01   :  { %1816 = vmatpush.msrb.mxu1 %v3873_v9 }
0x1e03   :  { %1817 = vmatpush.msrb.mxu1 %v3879_v51 }
0x1e05   :  { %1818 = vmatpush.msrb.mxu1 %v3885_v17 }
0x1e07   :  { %1819 = vmatpush.msrb.mxu1 %v3891_v24 }
0x1e75   :  { %v1191_v52 = vpop.f32.mrf.mxu1 }
0x1e76   :  { %v1192_v21 = vadd.f32 %v3897_v57, %v1191_v52  ;;  %v3947_v52 = vld [vmem:[%s4479_s6 + $0x18] sm:$0xff] }
0x1e78   :  { %2909 = vtanh.f32 %v1192_v21  ;;  %v2748_v15 = vmul.f32 -1.442695, %v1192_v21  ;;  %v3953_v21 = vld [vmem:[%s4479_s6 + $0x10] sm:$0xff] }
0x1e7a   :  { %2911 = vpow2.f32 %v2748_v15  ;;  %v3965_v15 = vld [vmem:[%s4479_s6] sm:$0xff] }
0x1e7e   :  { %v2910_v22 = vpop.eup %2909 }
0x1e7f   :  { %1216 = vrot.lane.b32.xlu2 %v2910_v22, %s3150_s14  ;;  %v3959_v22 = vld [vmem:[%s4479_s6 + $0x8] sm:$0xff] }
0x1e80   :  { %v2912_v16 = vpop.eup %2911 }
0x1e81   :  { %v1197_v38 = vadd.f32 1.0, %v2912_v16 }
0x1e83   :  { %2913 = vrcp.f32 %v1197_v38  ;;  %v1209_v1 = vand.u32 2147483648, %v1197_v38  ;;  %vm1203_vm13 = vweird.f32 %v1197_v38  ;;  %v1207_v2 = vand.u32 2147483647, %v1197_v38 }
0x1e85   :  { %v1210_v27 = vor.u32 1.1754944e-38, %v1209_v1  ;;  %vm1208_vm15 = vcmp.eq.f32.partialorder %v1207_v2, 8.507059e+37 }
0x1e89   :  { %v2914_v0 = vpop.eup %2913 }
0x1e8a   :  { %v1199_v46 = vmul.f32 %v2914_v0, %v1197_v38  ;;  %vm1204_vm12 = vweird.f32 %v2914_v0  ;;  %v3971_v38 = vld [vmem:[%s4480_s7] ss:$0 sm:$0xff] }
0x1e8b   :  { %vm1205_vm14 = vmor %vm1203_vm13, %vm1204_vm12 }
0x1e8c   :  { %v1200_v47 = vsub.f32 1.0, %v1199_v46 }
0x1e8e   :  { %v1201_v8 = vmul.f32 %v2914_v0, %v1200_v47 }
0x1e90   :  { %v1202_v10 = vadd.f32 %v2914_v0, %v1201_v8 }
0x1e92   :  { %v1206_v23 = vsel %vm1205_vm14, %v2914_v0, %v1202_v10 }
0x1e93   :  { %v1211_v14 = vsel %vm1208_vm15, %v1210_v27, %v1206_v23 }
0x1e94   :  { %v1214_v7 = vmul.f32 %v1211_v14, %v3906_v28 }
0x1ed9   :  { %v1217_v3 = vpop.permute.xlu2 %1216 }
0x1eda   :  { %v1219_v4 = vmul.f32 %v1217_v3, %v1211_v14 }
0x1edc   :  { %1221 = vrot.lane.b32.xlu0 %v1219_v4, %s3148_s21 }
0x1ee4   :  { %1241 = vrot.lane.b32.xlu0 %v3855_v36, %s3150_s14 }
0x1f4e   :  { %v1222_v40 = vpop.permute.xlu0 %1221 }
0x1f4f   :  { %v3909_v49 = vadd.f32 %v1222_v40, %v1214_v7 }
0x1f51   :  { %2915 = vtanh.f32 %v3909_v49 }
0x1f56   :  { %v1242_v30 = vpop.permute.xlu0 %1241 }
0x1f57   :  { %v2916_v31 = vpop.eup %2915 }
0x1f58   :  { %1227 = vrot.lane.b32.xlu1 %v2916_v31, %s3150_s14 }
0x1fca   :  { %v1228_v39 = vpop.permute.xlu1 %1227 }
0x1fcb   :  { %v1230_v62 = vmul.f32 %v1228_v39, %v1211_v14  ;;  %v1160_v39 = vmul.f32 0.5, %v3850_v42 }
0x1fcd   :  { %v1231_v33 = vmul.f32 0.9, %v1230_v62  ;;  %v1161_v62 = vmul.f32 0.5, %v3847_v41 }
0x1fcf   :  { %v3914_v5 = vadd.f32 %v1232_v32, %v1231_v33  ;;  %v1162_v32 = vadd.f32 %v1161_v62, %v1160_v39 }
0x1fd1   :  { %1238 = vrot.lane.b32.xlu2 %v3914_v5, %s3148_s21 }
0x202b   :  { %v1239_v34 = vpop.permute.xlu2 %1238 }
0x202c   :  { %v1244_v35 = vsel %vm49_vm0, %v1239_v34, %v1242_v30 }
0x202d   :  { %2749 = vmatmul.msk.f32.vlgmr.msrb.gmra.mxu2 %vm115_vm1, %v1244_v35 }
0x202e   :  { %1886 = vmatpush.msrb.mxu2 %v3923_v37 }
0x2030   :  { %1887 = vmatpush.msrb.mxu2 %v3929_v19 }
0x2032   :  { %1888 = vmatpush.msrb.mxu2 %v3935_v53 }
0x2034   :  { %1889 = vmatpush.msrb.mxu2 %v3941_v50 }
0x2036   :  { %1890 = vmatpush.msrb.mxu2 %v3947_v52 }
0x2038   :  { %1891 = vmatpush.msrb.mxu2 %v3953_v21 }
0x203a   :  { %1892 = vmatpush.msrb.mxu2 %v3959_v22 }
0x203c   :  { %1893 = vmatpush.msrb.mxu2 %v3965_v15 }
0x20b0   :  { %v1265_v16 = vpop.f32.mrf.mxu2 }
0x20b1   :  { %v1266_v0 = vadd.f32 %v3971_v38, %v1265_v16 }
0x20b3   :  { %2917 = vtanh.f32 %v1266_v0  ;;  %v2750_v47 = vmul.f32 -1.442695, %v1266_v0 }
0x20b5   :  { %2919 = vpow2.f32 %v2750_v47  ;;  %v4011_v47 = vld [vmem:[%s4481_s8] sm:$0xff] }
0x20b9   :  { %v2918_v46 = vpop.eup %2917 }
0x20ba   :  { %1290 = vrot.lane.b32.xlu1 %v2918_v46, %s3150_s14  ;;  %v3993_v46 = vld [vmem:[%s4481_s8 + $0x18] sm:$0xff] }
0x20bb   :  { %v2920_v8 = vpop.eup %2919 }
0x20bc   :  { %v1271_v10 = vadd.f32 1.0, %v2920_v8 }
0x20be   :  { %2921 = vrcp.f32 %v1271_v10  ;;  %v1283_v14 = vand.u32 2147483648, %v1271_v10  ;;  %vm1277_vm3 = vweird.f32 %v1271_v10  ;;  %v1281_v4 = vand.u32 2147483647, %v1271_v10 }
0x20c0   :  { %v1284_v13 = vor.u32 1.1754944e-38, %v1283_v14  ;;  %vm1282_vm5 = vcmp.eq.f32.partialorder %v1281_v4, 8.507059e+37 }
0x20c2   :  { %1065 = vrot.lane.b32.xlu1 %v3825_v61, %s3148_s21 }
0x20c4   :  { %v2922_v1 = vpop.eup %2921 }
0x20c5   :  { %v1273_v2 = vmul.f32 %v2922_v1, %v1271_v10  ;;  %vm1278_vm2 = vweird.f32 %v2922_v1  ;;  %v4017_v10 = vld [vmem:[%s4482_s9] ss:$0 sm:$0xff] }
0x20c6   :  { %vm1279_vm4 = vmor %vm1277_vm3, %vm1278_vm2 }
0x20c7   :  { %v1274_v23 = vsub.f32 1.0, %v1273_v2 }
0x20c9   :  { %v1275_v27 = vmul.f32 %v2922_v1, %v1274_v23 }
0x20cb   :  { %v1276_v3 = vadd.f32 %v2922_v1, %v1275_v27 }
0x20cd   :  { %v1280_v48 = vsel %vm1279_vm4, %v2922_v1, %v1276_v3 }
0x20ce   :  { %v1285_v61 = vsel %vm1282_vm5, %v1284_v13, %v1280_v48 }
0x20cf   :  { %v1288_v33 = vmul.f32 %v1285_v61, %v1162_v32 }
0x212c   :  { %v1291_v7 = vpop.permute.xlu1 %1290 }
0x212d   :  { %v1293_v40 = vmul.f32 %v1291_v7, %v1285_v61 }
0x212f   :  { %1295 = vrot.lane.b32.xlu2 %v1293_v40, %s3148_s21 }
0x2134   :  { %v1066_v31 = vpop.permute.xlu1 %1065 }
0x2135   :  { %2743 = vmatmul.msk.f32.vlgmr.msrb.gmra.mxu3 %vm49_vm0, %v1066_v31 }
0x2136   :  { %1396 = vmatpush.msrb.mxu3 %v3616_v6 }
0x2138   :  { %1397 = vmatpush.msrb.mxu3 %v3622_v44 }
0x213a   :  { %1398 = vmatpush.msrb.mxu3 %v3627_v56 }
0x213c   :  { %1399 = vmatpush.msrb.mxu3 %v3633_v26  ;;  %v1306_v26 = vmul.f32 0.1, %v3855_v36  ;;  %v4005_v36 = vld [vmem:[%s4481_s8 + $0x8] sm:$0xff] }
0x2189   :  { %v1296_v30 = vpop.permute.xlu2 %1295 }
0x218a   :  { %v1298_v34 = vadd.f32 %v1296_v30, %v1288_v33 }
0x218c   :  { %2923 = vtanh.f32 %v1298_v34 }
0x2192   :  { %v2924_v35 = vpop.eup %2923 }
0x2193   :  { %1301 = vrot.lane.b32.xlu0 %v2924_v35, %s3150_s14  ;;  %v1308_v35 = vmul.f32 0.5, %v1298_v34 }
0x21b8   :  { %v1086_v16 = vpop.f32.mrf.mxu3 }
0x21b9   :  { %v1087_v6 = vadd.f32 %v3653_v20, %v1086_v16  ;;  %v3999_v20 = vld [vmem:[%s4481_s8 + $0x10] sm:$0xff]  ;;  %v1309_v16 = vmul.f32 0.5, %v1162_v32  ;;  %v2754_v32 = vld [vmem:[%s4473_s0 + $0x20] sm:$0xff] }
0x21bb   :  { %1090 = vst [vmem:[#allocation6 + $0x10] sm:$0xff] %v1087_v6  ;;  %v1310_v6 = vadd.f32 %v1309_v16, %v1308_v35 }
0x2205   :  { %v1302_v44 = vpop.permute.xlu0 %1301 }
0x2206   :  { %v1304_v56 = vmul.f32 %v1302_v44, %v1285_v61 }
0x2208   :  { %v1305_v0 = vmul.f32 0.9, %v1304_v56 }
0x220a   :  { %v1307_v42 = vadd.f32 %v1306_v26, %v1305_v0 }
0x220c   :  { %1312 = vrot.lane.b32.xlu2 %v1307_v42, %s3148_s21 }
0x2266   :  { %v1313_v41 = vpop.permute.xlu2 %1312 }
0x2267   :  { %2751 = vmatmul.msk.f32.vlgmr.msra.gmra.mxu3 %vm49_vm0, %v1313_v41 }
0x2268   :  { %1643 = vmatpush.msra.mxu3 %v3993_v46 }
0x226a   :  { %1644 = vmatpush.msra.mxu3 %v3999_v20 }
0x226c   :  { %1645 = vmatpush.msra.mxu3 %v4005_v36 }
0x226e   :  { %1646 = vmatpush.msra.mxu3 %v4011_v47 }
0x22ea   :  { %v1333_v8 = vpop.f32.mrf.mxu3 }
0x22eb   :  { %v1334_v1 = vadd.f32 %v4017_v10, %v1333_v8 }
0x22ed   :  { %2925 = vtanh.f32 %v1334_v1  ;;  %v2752_v23 = vmul.f32 -1.442695, %v1334_v1 }
0x22ef   :  { %2927 = vpow2.f32 %v2752_v23 }
0x22f3   :  { %v2926_v2 = vpop.eup %2925 }
0x22f4   :  { %1358 = vrot.lane.b32.xlu0 %v2926_v2, %s3150_s14  ;;  %v1374_v2 = vmul.f32 0.1, %v1307_v42 }
0x22f5   :  { %v2928_v27 = vpop.eup %2927 }
0x22f6   :  { %v1339_v3 = vadd.f32 1.0, %v2928_v27 }
0x22f8   :  { %2929 = vrcp.f32 %v1339_v3  ;;  %v1351_v61 = vand.u32 2147483648, %v1339_v3  ;;  %vm1345_vm7 = vweird.f32 %v1339_v3  ;;  %v1349_v40 = vand.u32 2147483647, %v1339_v3 }
0x22fa   :  { %v1352_v39 = vor.u32 1.1754944e-38, %v1351_v61  ;;  %vm1350_vm9 = vcmp.eq.f32.partialorder %v1349_v40, 8.507059e+37 }
0x22fe   :  { %v2930_v14 = vpop.eup %2929 }
0x22ff   :  { %v1341_v4 = vmul.f32 %v2930_v14, %v1339_v3  ;;  %vm1346_vm6 = vweird.f32 %v2930_v14 }
0x2300   :  { %vm1347_vm8 = vmor %vm1345_vm7, %vm1346_vm6 }
0x2301   :  { %v1342_v48 = vsub.f32 1.0, %v1341_v4 }
0x2303   :  { %v1343_v13 = vmul.f32 %v2930_v14, %v1342_v48 }
0x2305   :  { %v1344_v7 = vadd.f32 %v2930_v14, %v1343_v13 }
0x2307   :  { %v1348_v31 = vsel %vm1347_vm8, %v2930_v14, %v1344_v7 }
0x2308   :  { %v1353_v33 = vsel %vm1350_vm9, %v1352_v39, %v1348_v31  ;;  %v1377_v39 = vmul.f32 0.5, %v1310_v6 }
0x2309   :  { %v1356_v44 = vmul.f32 %v1353_v33, %v1310_v6 }
0x2366   :  { %v1359_v62 = vpop.permute.xlu0 %1358 }
0x2367   :  { %v1361_v30 = vmul.f32 %v1359_v62, %v1353_v33 }
0x2369   :  { %1363 = vrot.lane.b32.xlu1 %v1361_v30, %s3148_s21 }
0x23db   :  { %v1364_v56 = vpop.permute.xlu1 %1363 }
0x23dc   :  { %v1366_v0 = vadd.f32 %v1364_v56, %v1356_v44 }
0x23de   :  { %2931 = vtanh.f32 %v1366_v0  ;;  %v1376_v31 = vmul.f32 0.5, %v1366_v0 }
0x23e0   :  { %v4045_v62 = vadd.f32 %v1377_v39, %v1376_v31 }
0x23e4   :  { %v2932_v26 = vpop.eup %2931 }
0x23e5   :  { %1369 = vrot.lane.b32.xlu2 %v2932_v26, %s3150_s14 }
0x243f   :  { %v1370_v41 = vpop.permute.xlu2 %1369 }
0x2440   :  { %v1372_v8 = vmul.f32 %v1370_v41, %v1353_v33 }
0x2442   :  { %v1373_v1 = vmul.f32 0.9, %v1372_v8 }
0x2444   :  { %v4023_v23 = vadd.f32 %v1374_v2, %v1373_v1 }
0x2446   :  { %1408 = vrot.lane.b32.xlu0 %v4023_v23, %s3150_s14  ;;  %v1473_v41 = vmul.f32 0.1, %v4023_v23 }
0x24b8   :  { %v1409_v34 = vpop.permute.xlu0 %1408 }
0x24b9   :  { %v1411_v27 = vsel %vm49_vm0, %v2754_v32, %v1409_v34 }
0x24ba   :  { %2755 = vmatmul.msk.f32.vlgmr.msra.gmra.mxu0 %vm115_vm1, %v1411_v27 }
0x24bb   :  { %2053 = vmatpush.msra.mxu0 %v3679_v25 }
0x24bd   :  { %2054 = vmatpush.msra.mxu0 %v3685_v29 }
0x24bf   :  { %2055 = vmatpush.msra.mxu0 %v3691_v45 }
0x24c1   :  { %2056 = vmatpush.msra.mxu0 %v3697_v18 }
0x24c3   :  { %2057 = vmatpush.msra.mxu0 %v3703_v43 }
0x24c5   :  { %2058 = vmatpush.msra.mxu0 %v3709_v55 }
0x24c7   :  { %2059 = vmatpush.msra.mxu0 %v3715_v63 }
0x24c9   :  { %2060 = vmatpush.msra.mxu0 %v3721_v60 }
0x2537   :  { %v1432_v42 = vpop.f32.mrf.mxu0 }
0x2538   :  { %v1433_v3 = vadd.f32 %v3727_v54, %v1432_v42 }
0x253a   :  { %2933 = vtanh.f32 %v1433_v3  ;;  %v2756_v25 = vmul.f32 -1.442695, %v1433_v3 }
0x253c   :  { %2935 = vpow2.f32 %v2756_v25 }
0x2540   :  { %v2934_v14 = vpop.eup %2933 }
0x2541   :  { %1457 = vrot.lane.b32.xlu1 %v2934_v14, %s3150_s14 }
0x2542   :  { %v2936_v29 = vpop.eup %2935 }
0x2543   :  { %v1438_v45 = vadd.f32 1.0, %v2936_v29 }
0x2545   :  { %2937 = vrcp.f32 %v1438_v45  ;;  %v1450_v63 = vand.u32 2147483648, %v1438_v45  ;;  %vm1444_vm11 = vweird.f32 %v1438_v45  ;;  %v1448_v60 = vand.u32 2147483647, %v1438_v45 }
0x2547   :  { %v1451_v13 = vor.u32 1.1754944e-38, %v1450_v63  ;;  %vm1449_vm13 = vcmp.eq.f32.partialorder %v1448_v60, 8.507059e+37  ;;  %v1234_v63 = vmul.f32 0.5, %v3909_v49  ;;  %v1235_v60 = vmul.f32 0.5, %v3906_v28 }
0x254b   :  { %v2938_v18 = vpop.eup %2937 }
0x254c   :  { %v1440_v43 = vmul.f32 %v2938_v18, %v1438_v45  ;;  %vm1445_vm10 = vweird.f32 %v2938_v18 }
0x254d   :  { %vm1446_vm12 = vmor %vm1444_vm11, %vm1445_vm10 }
0x254e   :  { %v1441_v4 = vsub.f32 1.0, %v1440_v43 }
0x2550   :  { %v1442_v55 = vmul.f32 %v2938_v18, %v1441_v4 }
0x2552   :  { %v1443_v48 = vadd.f32 %v2938_v18, %v1442_v55 }
0x2554   :  { %v1447_v54 = vsel %vm1446_vm12, %v2938_v18, %v1443_v48 }
0x2555   :  { %v1452_v61 = vsel %vm1449_vm13, %v1451_v13, %v1447_v54  ;;  %v4074_v54 = vadd.f32 %v1235_v60, %v1234_v63 }
0x2556   :  { %v1455_v33 = vmul.f32 %v1452_v61, %v4045_v62 }
0x25b3   :  { %v1458_v7 = vpop.permute.xlu1 %1457 }
0x25b4   :  { %v1460_v40 = vmul.f32 %v1458_v7, %v1452_v61 }
0x25b6   :  { %1462 = vrot.lane.b32.xlu2 %v1460_v40, %s3148_s21 }
0x25be   :  { %1482 = vrot.lane.b32.xlu2 %v3914_v5, %s3150_s14 }
0x2610   :  { %v1463_v30 = vpop.permute.xlu2 %1462 }
0x2611   :  { %v4048_v35 = vadd.f32 %v1463_v30, %v1455_v33  ;;  %v1547_v33 = vmul.f32 0.1, %v3914_v5 }
0x2613   :  { %2939 = vtanh.f32 %v4048_v35 }
0x2618   :  { %v1483_v6 = vpop.permute.xlu2 %1482 }
0x2619   :  { %v2940_v16 = vpop.eup %2939 }
0x261a   :  { %1468 = vrot.lane.b32.xlu0 %v2940_v16, %s3150_s14 }
0x268c   :  { %v1469_v44 = vpop.permute.xlu0 %1468 }
0x268d   :  { %v1471_v56 = vmul.f32 %v1469_v44, %v1452_v61 }
0x268f   :  { %v1472_v26 = vmul.f32 0.9, %v1471_v56 }
0x2691   :  { %v4053_v8 = vadd.f32 %v1473_v41, %v1472_v26 }
0x2693   :  { %1479 = vrot.lane.b32.xlu1 %v4053_v8, %s3148_s21 }
0x2705   :  { %v1480_v0 = vpop.permute.xlu1 %1479 }
0x2706   :  { %v1485_v1 = vsel %vm49_vm0, %v1480_v0, %v1483_v6 }
0x2707   :  { %2757 = vmatmul.msk.f32.vlgmr.msra.gmra.mxu1 %vm115_vm1, %v1485_v1 }
0x2708   :  { %2127 = vmatpush.msra.mxu1 %v3751_v59 }
0x270a   :  { %2128 = vmatpush.msra.mxu1 %v3757_v11 }
0x270c   :  { %2129 = vmatpush.msra.mxu1 %v3763_v12 }
0x270e   :  { %2130 = vmatpush.msra.mxu1 %v3867_v58 }
0x2710   :  { %2131 = vmatpush.msra.mxu1 %v3873_v9 }
0x2712   :  { %2132 = vmatpush.msra.mxu1 %v3879_v51 }
0x2714   :  { %2133 = vmatpush.msra.mxu1 %v3885_v17 }
0x2716   :  { %2134 = vmatpush.msra.mxu1 %v3891_v24 }
0x2784   :  { %v1506_v2 = vpop.f32.mrf.mxu1 }
0x2785   :  { %v1507_v32 = vadd.f32 %v3897_v57, %v1506_v2 }
0x2787   :  { %2941 = vtanh.f32 %v1507_v32  ;;  %v2758_v59 = vmul.f32 -1.442695, %v1507_v32 }
0x2789   :  { %2943 = vpow2.f32 %v2758_v59 }
0x278d   :  { %v2942_v34 = vpop.eup %2941 }
0x278e   :  { %1531 = vrot.lane.b32.xlu0 %v2942_v34, %s3150_s14 }
0x278f   :  { %v2944_v11 = vpop.eup %2943 }
0x2790   :  { %v1512_v12 = vadd.f32 1.0, %v2944_v11 }
0x2792   :  { %2945 = vrcp.f32 %v1512_v12  ;;  %v1524_v29 = vand.u32 2147483648, %v1512_v12  ;;  %vm1518_vm15 = vweird.f32 %v1512_v12  ;;  %v1522_v45 = vand.u32 2147483647, %v1512_v12 }
0x2794   :  { %v1525_v43 = vor.u32 1.1754944e-38, %v1524_v29  ;;  %vm1523_vm3 = vcmp.eq.f32.partialorder %v1522_v45, 8.507059e+37  ;;  %v4105_v29 = vld [vmem:[%s4483_s10 + $0x18] sm:$0xff]  ;;  %v4111_v45 = vld [vmem:[%s4483_s10 + $0x10] sm:$0xff] }
0x2798   :  { %v2946_v27 = vpop.eup %2945 }
0x2799   :  { %v1514_v42 = vmul.f32 %v2946_v27, %v1512_v12  ;;  %vm1519_vm14 = vweird.f32 %v2946_v27 }
0x279a   :  { %vm1520_vm2 = vmor %vm1518_vm15, %vm1519_vm14 }
0x279b   :  { %v1515_v3 = vsub.f32 1.0, %v1514_v42 }
0x279d   :  { %v1516_v14 = vmul.f32 %v2946_v27, %v1515_v3 }
0x279f   :  { %v1517_v25 = vadd.f32 %v2946_v27, %v1516_v14 }
0x27a1   :  { %v1521_v18 = vsel %vm1520_vm2, %v2946_v27, %v1517_v25 }
0x27a2   :  { %v1526_v55 = vsel %vm1523_vm3, %v1525_v43, %v1521_v18  ;;  %v4117_v18 = vld [vmem:[%s4483_s10 + $0x8] sm:$0xff]  ;;  %v4123_v43 = vld [vmem:[%s4483_s10] sm:$0xff] }
0x27a3   :  { %v1529_v13 = vmul.f32 %v1526_v55, %v4074_v54 }
0x2800   :  { %v1532_v4 = vpop.permute.xlu0 %1531 }
0x2801   :  { %v1534_v48 = vmul.f32 %v1532_v4, %v1526_v55  ;;  %v1475_v4 = vmul.f32 0.5, %v4048_v35 }
0x2803   :  { %1536 = vrot.lane.b32.xlu1 %v1534_v48, %s3148_s21 }
0x280b   :  { %1556 = vrot.lane.b32.xlu1 %v4053_v8, %s3150_s14 }
0x2875   :  { %v1537_v7 = vpop.permute.xlu1 %1536 }
0x2876   :  { %v4077_v61 = vadd.f32 %v1537_v7, %v1529_v13 }
0x2878   :  { %2947 = vtanh.f32 %v4077_v61 }
0x287d   :  { %v1557_v28 = vpop.permute.xlu1 %1556 }
0x287e   :  { %v2948_v40 = vpop.eup %2947 }
0x287f   :  { %1542 = vrot.lane.b32.xlu2 %v2948_v40, %s3150_s14 }
0x28d9   :  { %v1543_v31 = vpop.permute.xlu2 %1542 }
0x28da   :  { %v1545_v39 = vmul.f32 %v1543_v31, %v1526_v55  ;;  %v1476_v55 = vmul.f32 0.5, %v4045_v62  ;;  %v4132_v31 = vld [vmem:[%s4484_s11] ss:$0 sm:$0xff] }
0x28dc   :  { %v1546_v30 = vmul.f32 0.9, %v1545_v39  ;;  %v1477_v48 = vadd.f32 %v1476_v55, %v1475_v4 }
0x28de   :  { %v4082_v49 = vadd.f32 %v1547_v33, %v1546_v30  ;;  %v1621_v30 = vmul.f32 0.1, %v4053_v8 }
0x28e0   :  { %1553 = vrot.lane.b32.xlu0 %v4082_v49, %s3148_s21 }
0x2952   :  { %v1554_v16 = vpop.permute.xlu0 %1553 }
0x2953   :  { %v1559_v44 = vsel %vm49_vm0, %v1554_v16, %v1557_v28 }
0x2954   :  { %2759 = vmatmul.msk.f32.vlgmr.msra.gmra.mxu2 %vm115_vm1, %v1559_v44 }
0x2955   :  { %2201 = vmatpush.msra.mxu2 %v3923_v37 }
0x2957   :  { %2202 = vmatpush.msra.mxu2 %v3929_v19 }
0x2959   :  { %2203 = vmatpush.msra.mxu2 %v3935_v53 }
0x295b   :  { %2204 = vmatpush.msra.mxu2 %v3941_v50 }
0x295d   :  { %2205 = vmatpush.msra.mxu2 %v3947_v52 }
0x295f   :  { %2206 = vmatpush.msra.mxu2 %v3953_v21 }
0x2961   :  { %2207 = vmatpush.msra.mxu2 %v3959_v22 }
0x2963   :  { %2208 = vmatpush.msra.mxu2 %v3965_v15 }
0x29d7   :  { %v1580_v5 = vpop.f32.mrf.mxu2 }
0x29d8   :  { %v1581_v56 = vadd.f32 %v3971_v38, %v1580_v5 }
0x29da   :  { %2949 = vtanh.f32 %v1581_v56  ;;  %v2760_v41 = vmul.f32 -1.442695, %v1581_v56 }
0x29dc   :  { %2951 = vpow2.f32 %v2760_v41 }
0x29e0   :  { %v2950_v26 = vpop.eup %2949 }
0x29e1   :  { %1605 = vrot.lane.b32.xlu2 %v2950_v26, %s3150_s14 }
0x29e2   :  { %v2952_v6 = vpop.eup %2951 }
0x29e3   :  { %v1586_v0 = vadd.f32 1.0, %v2952_v6 }
0x29e5   :  { %2953 = vrcp.f32 %v1586_v0  ;;  %v1598_v11 = vand.u32 2147483648, %v1586_v0  ;;  %vm1592_vm5 = vweird.f32 %v1586_v0  ;;  %v1596_v12 = vand.u32 2147483647, %v1586_v0 }
0x29e7   :  { %v1599_v42 = vor.u32 1.1754944e-38, %v1598_v11  ;;  %vm1597_vm7 = vcmp.eq.f32.partialorder %v1596_v12, 8.507059e+37 }
0x29e9   :  { %1380 = vrot.lane.b32.xlu2 %v4023_v23, %s3148_s21 }
0x29eb   :  { %v2954_v1 = vpop.eup %2953 }
0x29ec   :  { %v1588_v2 = vmul.f32 %v2954_v1, %v1586_v0  ;;  %vm1593_vm4 = vweird.f32 %v2954_v1 }
0x29ed   :  { %vm1594_vm6 = vmor %vm1592_vm5, %vm1593_vm4 }
0x29ee   :  { %v1589_v32 = vsub.f32 1.0, %v1588_v2 }
0x29f0   :  { %v1590_v34 = vmul.f32 %v2954_v1, %v1589_v32 }
0x29f2   :  { %v1591_v59 = vadd.f32 %v2954_v1, %v1590_v34 }
0x29f4   :  { %v1595_v27 = vsel %vm1594_vm6, %v2954_v1, %v1591_v59 }
0x29f5   :  { %v1600_v23 = vsel %vm1597_vm7, %v1599_v42, %v1595_v27 }
0x29f6   :  { %v1603_v63 = vmul.f32 %v1600_v23, %v1477_v48 }
0x2a3b   :  { %v1606_v3 = vpop.permute.xlu2 %1605 }
0x2a3c   :  { %v1608_v14 = vmul.f32 %v1606_v3, %v1600_v23 }
0x2a3e   :  { %1610 = vrot.lane.b32.xlu0 %v1608_v14, %s3148_s21  ;;  %v1624_v14 = vmul.f32 0.5, %v1477_v48  ;;  %v2764_v48 = vld [vmem:[%s4473_s0 + $0x28] sm:$0xff] }
0x2a43   :  { %v1381_v25 = vpop.permute.xlu2 %1380 }
0x2a44   :  { %2753 = vmatmul.msk.f32.vlgmr.msrb.gmra.mxu3 %vm49_vm0, %v1381_v25 }
0x2a45   :  { %1711 = vmatpush.msrb.mxu3 %v4105_v29 }
0x2a47   :  { %1712 = vmatpush.msrb.mxu3 %v4111_v45 }
0x2a49   :  { %1713 = vmatpush.msrb.mxu3 %v4117_v18 }
0x2a4b   :  { %1714 = vmatpush.msrb.mxu3 %v4123_v43 }
0x2ab0   :  { %v1611_v60 = vpop.permute.xlu0 %1610 }
0x2ab1   :  { %v1613_v13 = vadd.f32 %v1611_v60, %v1603_v63 }
0x2ab3   :  { %2955 = vtanh.f32 %v1613_v13 }
0x2ab9   :  { %v2956_v7 = vpop.eup %2955 }
0x2aba   :  { %1616 = vrot.lane.b32.xlu1 %v2956_v7, %s3150_s14 }
0x2ac7   :  { %v1401_v40 = vpop.f32.mrf.mxu3 }
0x2ac8   :  { %v1402_v39 = vadd.f32 %v4132_v31, %v1401_v40 }
0x2aca   :  { %1405 = vst [vmem:[#allocation6 + $0x18] sm:$0xff] %v1402_v39 }
0x2b2c   :  { %v1617_v35 = vpop.permute.xlu1 %1616 }
0x2b2d   :  { %v1619_v33 = vmul.f32 %v1617_v35, %v1600_v23  ;;  %v1623_v23 = vmul.f32 0.5, %v1613_v13 }
0x2b2f   :  { %v1620_v62 = vmul.f32 0.9, %v1619_v33  ;;  %v1625_v25 = vadd.f32 %v1624_v14, %v1623_v23 }
0x2b31   :  { %v1622_v28 = vadd.f32 %v1621_v30, %v1620_v62  ;;  %v3098_v30 = vld [vmem:[%s4475_s2 + $0x38] sm:$0xff] }
0x2b33   :  { %1627 = vrot.lane.b32.xlu0 %v1622_v28, %s3148_s21  ;;  %v1689_v35 = vmul.f32 0.1, %v1622_v28  ;;  %v3099_v28 = vld [vmem:[%s4475_s2 + $0x30] sm:$0xff] }
0x2ba5   :  { %v1628_v16 = vpop.permute.xlu0 %1627 }
0x2ba6   :  { %2761 = vmatmul.msk.f32.vlgmr.msra.gmra.mxu3 %vm49_vm0, %v1628_v16  ;;  %v3100_v16 = vld [vmem:[%s4475_s2 + $0x28] sm:$0xff] }
0x2ba7   :  { %1958 = vmatpush.msra.mxu3 %v3993_v46 }
0x2ba9   :  { %1959 = vmatpush.msra.mxu3 %v3999_v20 }
0x2bab   :  { %1960 = vmatpush.msra.mxu3 %v4005_v36 }
0x2bad   :  { %1961 = vmatpush.msra.mxu3 %v4011_v47 }
0x2c29   :  { %v1648_v44 = vpop.f32.mrf.mxu3 }
0x2c2a   :  { %v1649_v5 = vadd.f32 %v4017_v10, %v1648_v44  ;;  %v3101_v44 = vld [vmem:[%s4475_s2 + $0x20] sm:$0xff] }
0x2c2c   :  { %2957 = vtanh.f32 %v1649_v5  ;;  %v2762_v8 = vmul.f32 -1.442695, %v1649_v5  ;;  %v3102_v5 = vld [vmem:[%s4475_s2 + $0x18] sm:$0xff] }
0x2c2e   :  { %2959 = vpow2.f32 %v2762_v8  ;;  %v3104_v8 = vld [vmem:[%s4475_s2 + $0x8] sm:$0xff] }
0x2c32   :  { %v2958_v56 = vpop.eup %2957 }
0x2c33   :  { %1673 = vrot.lane.b32.xlu1 %v2958_v56, %s3150_s14  ;;  %v3103_v56 = vld [vmem:[%s4475_s2 + $0x10] sm:$0xff] }
0x2c34   :  { %v2960_v26 = vpop.eup %2959 }
0x2c35   :  { %v1654_v41 = vadd.f32 1.0, %v2960_v26  ;;  %v3105_v26 = vld [vmem:[%s4475_s2] sm:$0xff] }
0x2c37   :  { %2961 = vrcp.f32 %v1654_v41  ;;  %v1666_v34 = vand.u32 2147483648, %v1654_v41  ;;  %vm1660_vm9 = vweird.f32 %v1654_v41  ;;  %v1664_v59 = vand.u32 2147483647, %v1654_v41 }
0x2c39   :  { %v1667_v12 = vor.u32 1.1754944e-38, %v1666_v34  ;;  %vm1665_vm11 = vcmp.eq.f32.partialorder %v1664_v59, 8.507059e+37 }
0x2c3d   :  { %v2962_v6 = vpop.eup %2961 }
0x2c3e   :  { %v1656_v0 = vmul.f32 %v2962_v6, %v1654_v41  ;;  %vm1661_vm8 = vweird.f32 %v2962_v6 }
0x2c3f   :  { %vm1662_vm10 = vmor %vm1660_vm9, %vm1661_vm8 }
0x2c40   :  { %v1657_v1 = vsub.f32 1.0, %v1656_v0 }
0x2c42   :  { %v1658_v2 = vmul.f32 %v2962_v6, %v1657_v1 }
0x2c44   :  { %v1659_v32 = vadd.f32 %v2962_v6, %v1658_v2 }
0x2c46   :  { %v1663_v11 = vsel %vm1662_vm10, %v2962_v6, %v1659_v32  ;;  %v4182_v6 = vld [vmem:[%s4476_s3] ss:$0 sm:$0xff] }
0x2c47   :  { %v1668_v42 = vsel %vm1665_vm11, %v1667_v12, %v1663_v11 }
0x2c48   :  { %v1671_v4 = vmul.f32 %v1668_v42, %v1625_v25 }
0x2ca5   :  { %v1674_v27 = vpop.permute.xlu1 %1673 }
0x2ca6   :  { %v1676_v3 = vmul.f32 %v1674_v27, %v1668_v42 }
0x2ca8   :  { %1678 = vrot.lane.b32.xlu2 %v1676_v3, %s3148_s21 }
0x2d02   :  { %v1679_v55 = vpop.permute.xlu2 %1678 }
0x2d03   :  { %v1681_v63 = vadd.f32 %v1679_v55, %v1671_v4 }
0x2d05   :  { %2963 = vtanh.f32 %v1681_v63 }
0x2d0b   :  { %v2964_v60 = vpop.eup %2963 }
0x2d0c   :  { %1684 = vrot.lane.b32.xlu0 %v2964_v60, %s3150_s14 }
0x2d7e   :  { %v1685_v7 = vpop.permute.xlu0 %1684 }
0x2d7f   :  { %v1687_v40 = vmul.f32 %v1685_v7, %v1668_v42 }
0x2d81   :  { %v1688_v39 = vmul.f32 0.9, %v1687_v40  ;;  %v1691_v40 = vmul.f32 0.5, %v1681_v63 }
0x2d83   :  { %v4146_v33 = vadd.f32 %v1689_v35, %v1688_v39  ;;  %v1692_v39 = vmul.f32 0.5, %v1625_v25 }
0x2d85   :  { %1723 = vrot.lane.b32.xlu1 %v4146_v33, %s3150_s14  ;;  %v4189_v35 = vadd.f32 %v1692_v39, %v1691_v40 }
0x2df7   :  { %v1724_v13 = vpop.permute.xlu1 %1723 }
0x2df8   :  { %v1726_v62 = vsel %vm49_vm0, %v2764_v48, %v1724_v13 }
0x2df9   :  { %2765 = vmatmul.msk.f32.vlgmr.msrb.gmra.mxu0 %vm115_vm1, %v1726_v62 }
0x2dfa   :  { %2368 = vmatpush.msrb.mxu0 %v3098_v30 }
0x2dfc   :  { %2369 = vmatpush.msrb.mxu0 %v3099_v28 }
0x2dfe   :  { %2370 = vmatpush.msrb.mxu0 %v3100_v16 }
0x2e00   :  { %2371 = vmatpush.msrb.mxu0 %v3101_v44 }
0x2e02   :  { %2372 = vmatpush.msrb.mxu0 %v3102_v5  ;;  %v1788_v5 = vmul.f32 0.1, %v4146_v33 }
0x2e04   :  { %2373 = vmatpush.msrb.mxu0 %v3103_v56 }
0x2e06   :  { %2374 = vmatpush.msrb.mxu0 %v3104_v8 }
0x2e08   :  { %2375 = vmatpush.msrb.mxu0 %v3105_v26  ;;  %v3107_v26 = vld [vmem:[%s4477_s4 + $0x38] sm:$0xff] }
0x2e76   :  { %v1747_v41 = vpop.f32.mrf.mxu0 }
0x2e77   :  { %v1748_v0 = vadd.f32 %v4182_v6, %v1747_v41  ;;  %v3108_v41 = vld [vmem:[%s4477_s4 + $0x30] sm:$0xff] }
0x2e79   :  { %2965 = vtanh.f32 %v1748_v0  ;;  %v2766_v2 = vmul.f32 -1.442695, %v1748_v0  ;;  %v3109_v0 = vld [vmem:[%s4477_s4 + $0x28] sm:$0xff] }
0x2e7b   :  { %2967 = vpow2.f32 %v2766_v2 }
0x2e7f   :  { %v2966_v1 = vpop.eup %2965 }
0x2e80   :  { %1772 = vrot.lane.b32.xlu2 %v2966_v1, %s3150_s14 }
0x2e81   :  { %v2968_v32 = vpop.eup %2967 }
0x2e82   :  { %v1753_v34 = vadd.f32 1.0, %v2968_v32 }
0x2e84   :  { %2969 = vrcp.f32 %v1753_v34  ;;  %v1765_v3 = vand.u32 2147483648, %v1753_v34  ;;  %vm1759_vm13 = vweird.f32 %v1753_v34  ;;  %v1763_v23 = vand.u32 2147483647, %v1753_v34 }
0x2e86   :  { %v1766_v4 = vor.u32 1.1754944e-38, %v1765_v3  ;;  %vm1764_vm15 = vcmp.eq.f32.partialorder %v1763_v23, 8.507059e+37 }
0x2e8a   :  { %v2970_v59 = vpop.eup %2969 }
0x2e8b   :  { %v1755_v11 = vmul.f32 %v2970_v59, %v1753_v34  ;;  %vm1760_vm12 = vweird.f32 %v2970_v59 }
0x2e8c   :  { %vm1761_vm14 = vmor %vm1759_vm13, %vm1760_vm12 }
0x2e8d   :  { %v1756_v12 = vsub.f32 1.0, %v1755_v11 }
0x2e8f   :  { %v1757_v27 = vmul.f32 %v2970_v59, %v1756_v12 }
0x2e91   :  { %v1758_v42 = vadd.f32 %v2970_v59, %v1757_v27 }
0x2e93   :  { %v1762_v14 = vsel %vm1761_vm14, %v2970_v59, %v1758_v42 }
0x2e94   :  { %v1767_v60 = vsel %vm1764_vm15, %v1766_v4, %v1762_v14  ;;  %v1549_v4 = vmul.f32 0.5, %v4077_v61 }
0x2e95   :  { %v1770_v48 = vmul.f32 %v1767_v60, %v4189_v35 }
0x2eda   :  { %v1773_v55 = vpop.permute.xlu2 %1772 }
0x2edb   :  { %v1775_v7 = vmul.f32 %v1773_v55, %v1767_v60  ;;  %v1550_v55 = vmul.f32 0.5, %v4074_v54 }
0x2edd   :  { %1777 = vrot.lane.b32.xlu0 %v1775_v7, %s3148_s21 }
0x2ee5   :  { %1797 = vrot.lane.b32.xlu0 %v4082_v49, %s3150_s14 }
0x2f4f   :  { %v1778_v13 = vpop.permute.xlu0 %1777 }
0x2f50   :  { %v4192_v62 = vadd.f32 %v1778_v13, %v1770_v48 }
0x2f52   :  { %2971 = vtanh.f32 %v4192_v62 }
0x2f57   :  { %v1798_v25 = vpop.permute.xlu0 %1797 }
0x2f58   :  { %v2972_v30 = vpop.eup %2971 }
0x2f59   :  { %1783 = vrot.lane.b32.xlu1 %v2972_v30, %s3150_s14 }
0x2fcb   :  { %v1784_v28 = vpop.permute.xlu1 %1783 }
0x2fcc   :  { %v1786_v16 = vmul.f32 %v1784_v28, %v1767_v60  ;;  %v4224_v60 = vadd.f32 %v1550_v55, %v1549_v4  ;;  %v1862_v28 = vmul.f32 0.1, %v4082_v49 }
0x2fce   :  { %v1787_v44 = vmul.f32 0.9, %v1786_v16 }
0x2fd0   :  { %v4197_v56 = vadd.f32 %v1788_v5, %v1787_v44 }
0x2fd2   :  { %1794 = vrot.lane.b32.xlu2 %v4197_v56, %s3148_s21 }
0x302c   :  { %v1795_v63 = vpop.permute.xlu2 %1794 }
0x302d   :  { %v1800_v8 = vsel %vm49_vm0, %v1795_v63, %v1798_v25 }
0x302e   :  { %2767 = vmatmul.msk.f32.vlgmr.msrb.gmra.mxu1 %vm115_vm1, %v1800_v8 }
0x302f   :  { %2442 = vmatpush.msrb.mxu1 %v3107_v26 }
0x3031   :  { %2443 = vmatpush.msrb.mxu1 %v3108_v41 }
0x3033   :  { %2444 = vmatpush.msrb.mxu1 %v3109_v0 }
0x3035   :  { %2445 = vmatpush.msrb.mxu1 %v3867_v58 }
0x3037   :  { %2446 = vmatpush.msrb.mxu1 %v3873_v9 }
0x3039   :  { %2447 = vmatpush.msrb.mxu1 %v3879_v51 }
0x303b   :  { %2448 = vmatpush.msrb.mxu1 %v3885_v17 }
0x303d   :  { %2449 = vmatpush.msrb.mxu1 %v3891_v24 }
0x30ab   :  { %v1821_v1 = vpop.f32.mrf.mxu1 }
0x30ac   :  { %v1822_v2 = vadd.f32 %v3897_v57, %v1821_v1 }
0x30ae   :  { %2973 = vtanh.f32 %v1822_v2  ;;  %v2768_v34 = vmul.f32 -1.442695, %v1822_v2 }
0x30b0   :  { %2975 = vpow2.f32 %v2768_v34  ;;  %v1791_v34 = vmul.f32 0.5, %v4189_v35 }
0x30b4   :  { %v2974_v32 = vpop.eup %2973 }
0x30b5   :  { %1846 = vrot.lane.b32.xlu1 %v2974_v32, %s3150_s14  ;;  %v1790_v32 = vmul.f32 0.5, %v4192_v62 }
0x30b6   :  { %v2976_v59 = vpop.eup %2975 }
0x30b7   :  { %v1827_v11 = vadd.f32 1.0, %v2976_v59  ;;  %v1792_v59 = vadd.f32 %v1791_v34, %v1790_v32 }
0x30b9   :  { %2977 = vrcp.f32 %v1827_v11  ;;  %v1839_v17 = vand.u32 2147483648, %v1827_v11  ;;  %vm1833_vm3 = vweird.f32 %v1827_v11  ;;  %v1837_v24 = vand.u32 2147483647, %v1827_v11 }
0x30bb   :  { %v1840_v42 = vor.u32 1.1754944e-38, %v1839_v17  ;;  %vm1838_vm5 = vcmp.eq.f32.partialorder %v1837_v24, 8.507059e+37 }
0x30bf   :  { %v2978_v58 = vpop.eup %2977 }
0x30c0   :  { %v1829_v9 = vmul.f32 %v2978_v58, %v1827_v11  ;;  %vm1834_vm2 = vweird.f32 %v2978_v58 }
0x30c1   :  { %vm1835_vm4 = vmor %vm1833_vm3, %vm1834_vm2 }
0x30c2   :  { %v1830_v12 = vsub.f32 1.0, %v1829_v9 }
0x30c4   :  { %v1831_v51 = vmul.f32 %v2978_v58, %v1830_v12 }
0x30c6   :  { %v1832_v27 = vadd.f32 %v2978_v58, %v1831_v51 }
0x30c8   :  { %v1836_v57 = vsel %vm1835_vm4, %v2978_v58, %v1832_v27 }
0x30c9   :  { %v1841_v23 = vsel %vm1838_vm5, %v1840_v42, %v1836_v57  ;;  %v1936_v42 = vmul.f32 0.1, %v4197_v56 }
0x30ca   :  { %v1844_v7 = vmul.f32 %v1841_v23, %v4224_v60 }
0x3127   :  { %v1847_v3 = vpop.permute.xlu1 %1846 }
0x3128   :  { %v1849_v14 = vmul.f32 %v1847_v3, %v1841_v23 }
0x312a   :  { %1851 = vrot.lane.b32.xlu2 %v1849_v14, %s3148_s21 }
0x3132   :  { %1871 = vrot.lane.b32.xlu2 %v4197_v56, %s3150_s14 }
0x3184   :  { %v1852_v40 = vpop.permute.xlu2 %1851 }
0x3185   :  { %v4227_v39 = vadd.f32 %v1852_v40, %v1844_v7 }
0x3187   :  { %2979 = vtanh.f32 %v4227_v39 }
0x318c   :  { %v1872_v54 = vpop.permute.xlu2 %1871 }
0x318d   :  { %v2980_v48 = vpop.eup %2979 }
0x318e   :  { %1857 = vrot.lane.b32.xlu0 %v2980_v48, %s3150_s14 }
0x3200   :  { %v1858_v13 = vpop.permute.xlu0 %1857 }
0x3201   :  { %v1860_v30 = vmul.f32 %v1858_v13, %v1841_v23 }
0x3203   :  { %v1861_v16 = vmul.f32 0.9, %v1860_v30 }
0x3205   :  { %v4232_v61 = vadd.f32 %v1862_v28, %v1861_v16 }
0x3207   :  { %1868 = vrot.lane.b32.xlu1 %v4232_v61, %s3148_s21 }
0x3279   :  { %v1869_v44 = vpop.permute.xlu1 %1868 }
0x327a   :  { %v1874_v5 = vsel %vm49_vm0, %v1869_v44, %v1872_v54  ;;  %v1939_v44 = vmul.f32 0.5, %v1792_v59 }
0x327b   :  { %2769 = vmatmul.msk.f32.vlgmr.msrb.gmra.mxu2 %vm115_vm1, %v1874_v5 }
0x327c   :  { %2516 = vmatpush.msrb.mxu2 %v3923_v37 }
0x327e   :  { %2517 = vmatpush.msrb.mxu2 %v3929_v19 }
0x3280   :  { %2518 = vmatpush.msrb.mxu2 %v3935_v53 }
0x3282   :  { %2519 = vmatpush.msrb.mxu2 %v3941_v50 }
0x3284   :  { %2520 = vmatpush.msrb.mxu2 %v3947_v52 }
0x3286   :  { %2521 = vmatpush.msrb.mxu2 %v3953_v21 }
0x3288   :  { %2522 = vmatpush.msrb.mxu2 %v3959_v22 }
0x328a   :  { %2523 = vmatpush.msrb.mxu2 %v3965_v15 }
0x32fe   :  { %v1895_v49 = vpop.f32.mrf.mxu2 }
0x32ff   :  { %v1896_v25 = vadd.f32 %v3971_v38, %v1895_v49 }
0x3301   :  { %2981 = vtanh.f32 %v1896_v25  ;;  %v2770_v37 = vmul.f32 -1.442695, %v1896_v25 }
0x3303   :  { %2983 = vpow2.f32 %v2770_v37 }
0x3307   :  { %v2982_v63 = vpop.eup %2981 }
0x3308   :  { %1920 = vrot.lane.b32.xlu0 %v2982_v63, %s3150_s14 }
0x3309   :  { %v2984_v19 = vpop.eup %2983 }
0x330a   :  { %v1901_v53 = vadd.f32 1.0, %v2984_v19 }
0x330c   :  { %2985 = vrcp.f32 %v1901_v53  ;;  %v1913_v8 = vand.u32 2147483648, %v1901_v53  ;;  %vm1907_vm7 = vweird.f32 %v1901_v53  ;;  %v1911_v38 = vand.u32 2147483647, %v1901_v53 }
0x330e   :  { %v1914_v41 = vor.u32 1.1754944e-38, %v1913_v8  ;;  %vm1912_vm9 = vcmp.eq.f32.partialorder %v1911_v38, 8.507059e+37 }
0x3310   :  { %1695 = vrot.lane.b32.xlu0 %v4146_v33, %s3148_s21 }
0x3312   :  { %v2986_v50 = vpop.eup %2985 }
0x3313   :  { %v1903_v52 = vmul.f32 %v2986_v50, %v1901_v53  ;;  %vm1908_vm6 = vweird.f32 %v2986_v50 }
0x3314   :  { %vm1909_vm8 = vmor %vm1907_vm7, %vm1908_vm6 }
0x3315   :  { %v1904_v21 = vsub.f32 1.0, %v1903_v52 }
0x3317   :  { %v1905_v22 = vmul.f32 %v2986_v50, %v1904_v21 }
0x3319   :  { %v1906_v15 = vadd.f32 %v2986_v50, %v1905_v22  ;;  %v2774_v22 = vld [vmem:[%s4473_s0 + $0x30] sm:$0xff] }
0x331b   :  { %v1910_v26 = vsel %vm1909_vm8, %v2986_v50, %v1906_v15 }
0x331c   :  { %v1915_v33 = vsel %vm1912_vm9, %v1914_v41, %v1910_v26 }
0x331d   :  { %v1918_v11 = vmul.f32 %v1915_v33, %v1792_v59 }
0x337a   :  { %v1921_v0 = vpop.permute.xlu0 %1920 }
0x337b   :  { %v1923_v1 = vmul.f32 %v1921_v0, %v1915_v33 }
0x337d   :  { %1925 = vrot.lane.b32.xlu1 %v1923_v1, %s3148_s21 }
0x3382   :  { %v1696_v2 = vpop.permute.xlu0 %1695 }
0x3383   :  { %2763 = vmatmul.msk.f32.vlgmr.msrb.gmra.mxu3 %vm49_vm0, %v1696_v2 }
0x3384   :  { %2026 = vmatpush.msrb.mxu3 %v4105_v29 }
0x3386   :  { %2027 = vmatpush.msrb.mxu3 %v4111_v45 }
0x3388   :  { %2028 = vmatpush.msrb.mxu3 %v4117_v18 }
0x338a   :  { %2029 = vmatpush.msrb.mxu3 %v4123_v43 }
0x33ef   :  { %v1926_v58 = vpop.permute.xlu1 %1925 }
0x33f0   :  { %v1928_v9 = vadd.f32 %v1926_v58, %v1918_v11 }
0x33f2   :  { %2987 = vtanh.f32 %v1928_v9  ;;  %v1938_v54 = vmul.f32 0.5, %v1928_v9 }
0x33f4   :  { %v1940_v5 = vadd.f32 %v1939_v44, %v1938_v54 }
0x33f8   :  { %v2988_v12 = vpop.eup %2987 }
0x33f9   :  { %1931 = vrot.lane.b32.xlu2 %v2988_v12, %s3150_s14 }
0x3406   :  { %v1716_v51 = vpop.f32.mrf.mxu3 }
0x3407   :  { %v1717_v27 = vadd.f32 %v4132_v31, %v1716_v51 }
0x3409   :  { %1720 = vst [vmem:[#allocation6 + $0x20] sm:$0xff] %v1717_v27 }
0x3453   :  { %v1932_v17 = vpop.permute.xlu2 %1931 }
0x3454   :  { %v1934_v24 = vmul.f32 %v1932_v17, %v1915_v33 }
0x3456   :  { %v1935_v57 = vmul.f32 0.9, %v1934_v24 }
0x3458   :  { %v1937_v62 = vadd.f32 %v1936_v42, %v1935_v57  ;;  %v2007_v42 = vmul.f32 0.5, %v1940_v5 }
0x345a   :  { %1942 = vrot.lane.b32.xlu1 %v1937_v62, %s3148_s21  ;;  %v2004_v52 = vmul.f32 0.1, %v1937_v62 }
0x34cc   :  { %v1943_v35 = vpop.permute.xlu1 %1942 }
0x34cd   :  { %2771 = vmatmul.msk.f32.vlgmr.msra.gmra.mxu3 %vm49_vm0, %v1943_v35 }
0x34ce   :  { %2273 = vmatpush.msra.mxu3 %v3993_v46 }
0x34d0   :  { %2274 = vmatpush.msra.mxu3 %v3999_v20 }
0x34d2   :  { %2275 = vmatpush.msra.mxu3 %v4005_v36 }
0x34d4   :  { %2276 = vmatpush.msra.mxu3 %v4011_v47 }
0x3550   :  { %v1963_v3 = vpop.f32.mrf.mxu3 }
0x3551   :  { %v1964_v23 = vadd.f32 %v4017_v10, %v1963_v3 }
0x3553   :  { %2989 = vtanh.f32 %v1964_v23  ;;  %v2772_v56 = vmul.f32 -1.442695, %v1964_v23 }
0x3555   :  { %2991 = vpow2.f32 %v2772_v56 }
0x3559   :  { %v2990_v14 = vpop.eup %2989 }
0x355a   :  { %1988 = vrot.lane.b32.xlu2 %v2990_v14, %s3150_s14 }
0x355b   :  { %v2992_v4 = vpop.eup %2991 }
0x355c   :  { %v1969_v55 = vadd.f32 1.0, %v2992_v4 }
0x355e   :  { %2993 = vrcp.f32 %v1969_v55  ;;  %v1981_v36 = vand.u32 2147483648, %v1969_v55  ;;  %vm1975_vm11 = vweird.f32 %v1969_v55  ;;  %v1979_v47 = vand.u32 2147483647, %v1969_v55 }
0x3560   :  { %v1982_v13 = vor.u32 1.1754944e-38, %v1981_v36  ;;  %vm1980_vm13 = vcmp.eq.f32.partialorder %v1979_v47, 8.507059e+37  ;;  %v4302_v47 = vld [vmem:[%s4478_s5] ss:$0 sm:$0xff] }
0x3564   :  { %v2994_v7 = vpop.eup %2993 }
0x3565   :  { %v1971_v46 = vmul.f32 %v2994_v7, %v1969_v55  ;;  %vm1976_vm10 = vweird.f32 %v2994_v7 }
0x3566   :  { %vm1977_vm12 = vmor %vm1975_vm11, %vm1976_vm10 }
0x3567   :  { %v1972_v40 = vsub.f32 1.0, %v1971_v46 }
0x3569   :  { %v1973_v20 = vmul.f32 %v2994_v7, %v1972_v40 }
0x356b   :  { %v1974_v48 = vadd.f32 %v2994_v7, %v1973_v20 }
0x356d   :  { %v1978_v10 = vsel %vm1977_vm12, %v2994_v7, %v1974_v48 }
0x356e   :  { %v1983_v28 = vsel %vm1980_vm13, %v1982_v13, %v1978_v10 }
0x356f   :  { %v1986_v49 = vmul.f32 %v1983_v28, %v1940_v5 }
0x35b4   :  { %v1989_v30 = vpop.permute.xlu2 %1988 }
0x35b5   :  { %v1991_v16 = vmul.f32 %v1989_v30, %v1983_v28 }
0x35b7   :  { %1993 = vrot.lane.b32.xlu0 %v1991_v16, %s3148_s21 }
0x3629   :  { %v1994_v25 = vpop.permute.xlu0 %1993 }
0x362a   :  { %v1996_v63 = vadd.f32 %v1994_v25, %v1986_v49 }
0x362c   :  { %2995 = vtanh.f32 %v1996_v63  ;;  %v2006_v57 = vmul.f32 0.5, %v1996_v63 }
0x362e   :  { %v4285_v62 = vadd.f32 %v2007_v42, %v2006_v57 }
0x3632   :  { %v2996_v37 = vpop.eup %2995 }
0x3633   :  { %1999 = vrot.lane.b32.xlu1 %v2996_v37, %s3150_s14 }
0x36a5   :  { %v2000_v19 = vpop.permute.xlu1 %1999 }
0x36a6   :  { %v2002_v53 = vmul.f32 %v2000_v19, %v1983_v28 }
0x36a8   :  { %v2003_v50 = vmul.f32 0.9, %v2002_v53 }
0x36aa   :  { %v4271_v21 = vadd.f32 %v2004_v52, %v2003_v50 }
0x36ac   :  { %2038 = vrot.lane.b32.xlu2 %v4271_v21, %s3150_s14  ;;  %v2103_v7 = vmul.f32 0.1, %v4271_v21 }
0x3706   :  { %v2039_v15 = vpop.permute.xlu2 %2038 }
0x3707   :  { %v2041_v8 = vsel %vm49_vm0, %v2774_v22, %v2039_v15  ;;  %v1864_v15 = vmul.f32 0.5, %v4227_v39 }
0x3708   :  { %2775 = vmatmul.msk.f32.vlgmr.msra.gmra.mxu0 %vm115_vm1, %v2041_v8  ;;  %v1865_v8 = vmul.f32 0.5, %v4224_v60 }
0x3785   :  { %v2062_v38 = vpop.f32.mrf.mxu0 }
0x3786   :  { %v2063_v26 = vadd.f32 %v4182_v6, %v2062_v38  ;;  %v4311_v38 = vadd.f32 %v1865_v8, %v1864_v15 }
0x3788   :  { %2997 = vtanh.f32 %v2063_v26  ;;  %v2776_v0 = vmul.f32 -1.442695, %v2063_v26 }
0x378a   :  { %2999 = vpow2.f32 %v2776_v0 }
0x378e   :  { %v2998_v41 = vpop.eup %2997 }
0x378f   :  { %2087 = vrot.lane.b32.xlu0 %v2998_v41, %s3150_s14 }
0x3790   :  { %v3000_v33 = vpop.eup %2999 }
0x3791   :  { %v2068_v1 = vadd.f32 1.0, %v3000_v33 }
0x3793   :  { %3001 = vrcp.f32 %v2068_v1  ;;  %v2080_v58 = vand.u32 2147483648, %v2068_v1  ;;  %vm2074_vm15 = vweird.f32 %v2068_v1  ;;  %v2078_v9 = vand.u32 2147483647, %v2068_v1 }
0x3795   :  { %v2081_v51 = vor.u32 1.1754944e-38, %v2080_v58  ;;  %vm2079_vm3 = vcmp.eq.f32.partialorder %v2078_v9, 8.507059e+37  ;;  %v4328_v9 = vld [vmem:[%s4480_s7] ss:$0 sm:$0xff]  ;;  %s3152_s7 = smov 128  }
0x3799   :  { %v3002_v2 = vpop.eup %3001 }
0x379a   :  { %v2070_v32 = vmul.f32 %v3002_v2, %v2068_v1  ;;  %vm2075_vm14 = vweird.f32 %v3002_v2 }
0x379b   :  { %vm2076_vm2 = vmor %vm2074_vm15, %vm2075_vm14 }
0x379c   :  { %v2071_v34 = vsub.f32 1.0, %v2070_v32  ;;  %v2177_v32 = vmul.f32 0.1, %v4232_v61 }
0x379e   :  { %v2072_v59 = vmul.f32 %v3002_v2, %v2071_v34 }
0x37a0   :  { %v2073_v11 = vadd.f32 %v3002_v2, %v2072_v59 }
0x37a2   :  { %v2077_v12 = vsel %vm2076_vm2, %v3002_v2, %v2073_v11 }
0x37a3   :  { %v2082_v17 = vsel %vm2079_vm3, %v2081_v51, %v2077_v12 }
0x37a4   :  { %v2085_v35 = vmul.f32 %v2082_v17, %v4285_v62 }
0x3801   :  { %v2088_v27 = vpop.permute.xlu0 %2087 }
0x3802   :  { %v2090_v24 = vmul.f32 %v2088_v27, %v2082_v17 }
0x3804   :  { %2092 = vrot.lane.b32.xlu1 %v2090_v24, %s3148_s21 }
0x380c   :  { %2112 = vrot.lane.b32.xlu1 %v4232_v61, %s3150_s14 }
0x3876   :  { %v2093_v3 = vpop.permute.xlu1 %2092 }
0x3877   :  { %v4288_v23 = vadd.f32 %v2093_v3, %v2085_v35 }
0x3879   :  { %3003 = vtanh.f32 %v4288_v23 }
0x387e   :  { %v2113_v40 = vpop.permute.xlu1 %2112 }
0x387f   :  { %v3004_v14 = vpop.eup %3003 }
0x3880   :  { %2098 = vrot.lane.b32.xlu2 %v3004_v14, %s3150_s14 }
0x38da   :  { %v2099_v56 = vpop.permute.xlu2 %2098 }
0x38db   :  { %v2101_v4 = vmul.f32 %v2099_v56, %v2082_v17 }
0x38dd   :  { %v2102_v55 = vmul.f32 0.9, %v2101_v4 }
0x38df   :  { %v4293_v46 = vadd.f32 %v2103_v7, %v2102_v55 }
0x38e1   :  { %2109 = vrot.lane.b32.xlu0 %v4293_v46, %s3148_s21 }
0x3953   :  { %v2110_v20 = vpop.permute.xlu0 %2109 }
0x3954   :  { %v2115_v48 = vsel %vm49_vm0, %v2110_v20, %v2113_v40 }
0x3955   :  { %2777 = vmatmul.msk.f32.vlgmr.msra.gmra.mxu1 %vm115_vm1, %v2115_v48  ;;  %v2105_v48 = vmul.f32 0.5, %v4288_v23 }
0x39d2   :  { %v2136_v36 = vpop.f32.mrf.mxu1 }
0x39d3   :  { %v2137_v10 = vadd.f32 %v4302_v47, %v2136_v36  ;;  %v2106_v36 = vmul.f32 0.5, %v4285_v62 }
0x39d5   :  { %3005 = vtanh.f32 %v2137_v10  ;;  %v2778_v30 = vmul.f32 -1.442695, %v2137_v10  ;;  %v2107_v10 = vadd.f32 %v2106_v36, %v2105_v48 }
0x39d7   :  { %3007 = vpow2.f32 %v2778_v30 }
0x39db   :  { %v3006_v13 = vpop.eup %3005 }
0x39dc   :  { %2161 = vrot.lane.b32.xlu2 %v3006_v13, %s3150_s14 }
0x39dd   :  { %v3008_v28 = vpop.eup %3007 }
0x39de   :  { %v2142_v16 = vadd.f32 1.0, %v3008_v28 }
0x39e0   :  { %3009 = vrcp.f32 %v2142_v16  ;;  %v2154_v63 = vand.u32 2147483648, %v2142_v16  ;;  %vm2148_vm5 = vweird.f32 %v2142_v16  ;;  %v2152_v37 = vand.u32 2147483647, %v2142_v16 }
0x39e2   :  { %v2155_v53 = vor.u32 1.1754944e-38, %v2154_v63  ;;  %vm2153_vm7 = vcmp.eq.f32.partialorder %v2152_v37, 8.507059e+37  ;;  %v4362_v63 = vld [vmem:[%s4482_s9] ss:$0 sm:$0xff] }
0x39e6   :  { %v3010_v54 = vpop.eup %3009 }
0x39e7   :  { %v2144_v44 = vmul.f32 %v3010_v54, %v2142_v16  ;;  %vm2149_vm4 = vweird.f32 %v3010_v54 }
0x39e8   :  { %vm2150_vm6 = vmor %vm2148_vm5, %vm2149_vm4 }
0x39e9   :  { %v2145_v5 = vsub.f32 1.0, %v2144_v44 }
0x39eb   :  { %v2146_v49 = vmul.f32 %v3010_v54, %v2145_v5  ;;  %v3112_v5 = vld [vmem:[%s4481_s8 + $0x18] sm:$0xff] }
0x39ed   :  { %v2147_v25 = vadd.f32 %v3010_v54, %v2146_v49  ;;  %v3115_v49 = vld [vmem:[%s4481_s8] sm:$0xff] }
0x39ef   :  { %v2151_v19 = vsel %vm2150_vm6, %v3010_v54, %v2147_v25 }
0x39f0   :  { %v2156_v52 = vsel %vm2153_vm7, %v2155_v53, %v2151_v19 }
0x39f1   :  { %v2159_v26 = vmul.f32 %v2156_v52, %v4311_v38 }
0x3a36   :  { %v2162_v50 = vpop.permute.xlu2 %2161 }
0x3a37   :  { %v2164_v22 = vmul.f32 %v2162_v50, %v2156_v52 }
0x3a39   :  { %2166 = vrot.lane.b32.xlu0 %v2164_v22, %s3148_s21 }
0x3a41   :  { %2186 = vrot.lane.b32.xlu0 %v4293_v46, %s3150_s14 }
0x3aab   :  { %v2167_v41 = vpop.permute.xlu0 %2166 }
0x3aac   :  { %v4314_v0 = vadd.f32 %v2167_v41, %v2159_v26 }
0x3aae   :  { %3011 = vtanh.f32 %v4314_v0 }
0x3ab3   :  { %v2187_v60 = vpop.permute.xlu0 %2186 }
0x3ab4   :  { %v3012_v33 = vpop.eup %3011 }
0x3ab5   :  { %2172 = vrot.lane.b32.xlu1 %v3012_v33, %s3150_s14 }
0x3b27   :  { %v2173_v1 = vpop.permute.xlu1 %2172 }
0x3b28   :  { %v2175_v2 = vmul.f32 %v2173_v1, %v2156_v52 }
0x3b2a   :  { %v2176_v34 = vmul.f32 0.9, %v2175_v2 }
0x3b2c   :  { %v4319_v39 = vadd.f32 %v2177_v32, %v2176_v34 }
0x3b2e   :  { %2183 = vrot.lane.b32.xlu2 %v4319_v39, %s3148_s21 }
0x3b88   :  { %v2184_v59 = vpop.permute.xlu2 %2183 }
0x3b89   :  { %v2189_v11 = vsel %vm49_vm0, %v2184_v59, %v2187_v60 }
0x3b8a   :  { %2779 = vmatmul.msk.f32.vlgmr.msra.gmra.mxu2 %vm115_vm1, %v2189_v11 }
0x3c0d   :  { %v2210_v58 = vpop.f32.mrf.mxu2 }
0x3c0e   :  { %v2211_v61 = vadd.f32 %v4328_v9, %v2210_v58  ;;  %v2254_v58 = vmul.f32 0.5, %v2107_v10 }
0x3c10   :  { %3013 = vtanh.f32 %v2211_v61  ;;  %v2780_v51 = vmul.f32 -1.442695, %v2211_v61 }
0x3c12   :  { %3015 = vpow2.f32 %v2780_v51 }
0x3c16   :  { %v3014_v12 = vpop.eup %3013 }
0x3c17   :  { %2235 = vrot.lane.b32.xlu1 %v3014_v12, %s3150_s14 }
0x3c18   :  { %v3016_v27 = vpop.eup %3015 }
0x3c19   :  { %v2216_v17 = vadd.f32 1.0, %v3016_v27 }
0x3c1b   :  { %3017 = vrcp.f32 %v2216_v17  ;;  %v2228_v14 = vand.u32 2147483648, %v2216_v17  ;;  %vm2222_vm9 = vweird.f32 %v2216_v17  ;;  %v2226_v56 = vand.u32 2147483647, %v2216_v17 }
0x3c1d   :  { %v2229_v55 = vor.u32 1.1754944e-38, %v2228_v14  ;;  %vm2227_vm11 = vcmp.eq.f32.partialorder %v2226_v56, 8.507059e+37  ;;  %v2784_v14 = vld [vmem:[%s4473_s0 + $0x38] sm:$0xff] }
0x3c1f   :  { %2010 = vrot.lane.b32.xlu1 %v4271_v21, %s3148_s21 }
0x3c21   :  { %v3018_v24 = vpop.eup %3017 }
0x3c22   :  { %v2218_v57 = vmul.f32 %v3018_v24, %v2216_v17  ;;  %vm2223_vm8 = vweird.f32 %v3018_v24 }
0x3c23   :  { %vm2224_vm10 = vmor %vm2222_vm9, %vm2223_vm8 }
0x3c24   :  { %v2219_v42 = vsub.f32 1.0, %v2218_v57 }
0x3c26   :  { %v2220_v35 = vmul.f32 %v3018_v24, %v2219_v42 }
0x3c28   :  { %v2221_v3 = vadd.f32 %v3018_v24, %v2220_v35 }
0x3c2a   :  { %v2225_v4 = vsel %vm2224_vm10, %v3018_v24, %v2221_v3 }
0x3c2b   :  { %v2230_v21 = vsel %vm2227_vm11, %v2229_v55, %v2225_v4 }
0x3c2c   :  { %v2233_v13 = vmul.f32 %v2230_v21, %v2107_v10 }
0x3c89   :  { %v2236_v7 = vpop.permute.xlu1 %2235 }
0x3c8a   :  { %v2238_v40 = vmul.f32 %v2236_v7, %v2230_v21 }
0x3c8c   :  { %2240 = vrot.lane.b32.xlu2 %v2238_v40, %s3148_s21 }
0x3c91   :  { %v2011_v20 = vpop.permute.xlu1 %2010 }
0x3c92   :  { %2773 = vmatmul.msk.f32.vlgmr.msrb.gmra.mxu3 %vm49_vm0, %v2011_v20 }
0x3c93   :  { %2341 = vmatpush.msrb.mxu3 %v4105_v29 }
0x3c95   :  { %2342 = vmatpush.msrb.mxu3 %v4111_v45 }
0x3c97   :  { %2343 = vmatpush.msrb.mxu3 %v4117_v18 }
0x3c99   :  { %2344 = vmatpush.msrb.mxu3 %v4123_v43  ;;  %v2251_v43 = vmul.f32 0.1, %v4293_v46  ;;  %v3114_v46 = vld [vmem:[%s4481_s8 + $0x8] sm:$0xff] }
0x3ce6   :  { %v2241_v30 = vpop.permute.xlu2 %2240 }
0x3ce7   :  { %v2243_v28 = vadd.f32 %v2241_v30, %v2233_v13 }
0x3ce9   :  { %3019 = vtanh.f32 %v2243_v28  ;;  %v2253_v11 = vmul.f32 0.5, %v2243_v28 }
0x3ceb   :  { %v2255_v61 = vadd.f32 %v2254_v58, %v2253_v11 }
0x3cef   :  { %v3020_v16 = vpop.eup %3019 }
0x3cf0   :  { %2246 = vrot.lane.b32.xlu0 %v3020_v16, %s3150_s14 }
0x3d15   :  { %v2031_v54 = vpop.f32.mrf.mxu3 }
0x3d16   :  { %v2032_v29 = vadd.f32 %v4132_v31, %v2031_v54  ;;  %v3113_v31 = vld [vmem:[%s4481_s8 + $0x10] sm:$0xff] }
0x3d18   :  { %2035 = vst [vmem:[#allocation6 + $0x28] sm:$0xff] %v2032_v29 }
0x3d62   :  { %v2247_v45 = vpop.permute.xlu0 %2246 }
0x3d63   :  { %v2249_v18 = vmul.f32 %v2247_v45, %v2230_v21 }
0x3d65   :  { %v2250_v44 = vmul.f32 0.9, %v2249_v18 }
0x3d67   :  { %v2252_v23 = vadd.f32 %v2251_v43, %v2250_v44 }
0x3d69   :  { %2257 = vrot.lane.b32.xlu2 %v2252_v23, %s3148_s21  ;;  %v2319_v35 = vmul.f32 0.1, %v2252_v23  ;;  %v2322_v23 = vmul.f32 0.5, %v2255_v61 }
0x3dc3   :  { %v2258_v62 = vpop.permute.xlu2 %2257 }
0x3dc4   :  { %2781 = vmatmul.msk.f32.vlgmr.msra.gmra.mxu3 %vm49_vm0, %v2258_v62 }
0x3dc5   :  { %2588 = vmatpush.msra.mxu3 %v3112_v5 }
0x3dc7   :  { %2589 = vmatpush.msra.mxu3 %v3113_v31 }
0x3dc9   :  { %2590 = vmatpush.msra.mxu3 %v3114_v46 }
0x3dcb   :  { %2591 = vmatpush.msra.mxu3 %v3115_v49 }
0x3e47   :  { %v2278_v25 = vpop.f32.mrf.mxu3 }
0x3e48   :  { %v2279_v37 = vadd.f32 %v4362_v63, %v2278_v25 }
0x3e4a   :  { %3021 = vtanh.f32 %v2279_v37  ;;  %v2782_v53 = vmul.f32 -1.442695, %v2279_v37 }
0x3e4c   :  { %3023 = vpow2.f32 %v2782_v53 }
0x3e50   :  { %v3022_v19 = vpop.eup %3021 }
0x3e51   :  { %2303 = vrot.lane.b32.xlu0 %v3022_v19, %s3150_s14 }
0x3e52   :  { %v3024_v50 = vpop.eup %3023 }
0x3e53   :  { %v2284_v52 = vadd.f32 1.0, %v3024_v50 }
0x3e55   :  { %3025 = vrcp.f32 %v2284_v52  ;;  %v2296_v33 = vand.u32 2147483648, %v2284_v52  ;;  %vm2290_vm13 = vweird.f32 %v2284_v52  ;;  %v2294_v1 = vand.u32 2147483647, %v2284_v52 }
0x3e57   :  { %v2297_v32 = vor.u32 1.1754944e-38, %v2296_v33  ;;  %vm2295_vm15 = vcmp.eq.f32.partialorder %v2294_v1, 8.507059e+37 }
0x3e5b   :  { %v3026_v22 = vpop.eup %3025 }
0x3e5c   :  { %v2286_v15 = vmul.f32 %v3026_v22, %v2284_v52  ;;  %vm2291_vm12 = vweird.f32 %v3026_v22 }
0x3e5d   :  { %vm2292_vm14 = vmor %vm2290_vm13, %vm2291_vm12 }
0x3e5e   :  { %v2287_v8 = vsub.f32 1.0, %v2286_v15 }
0x3e60   :  { %v2288_v26 = vmul.f32 %v3026_v22, %v2287_v8 }
0x3e62   :  { %v2289_v41 = vadd.f32 %v3026_v22, %v2288_v26 }
0x3e64   :  { %v2293_v2 = vsel %vm2292_vm14, %v3026_v22, %v2289_v41 }
0x3e65   :  { %v2298_v60 = vsel %vm2295_vm15, %v2297_v32, %v2293_v2 }
0x3e66   :  { %v2301_v12 = vmul.f32 %v2298_v60, %v2255_v61 }
0x3ec3   :  { %v2304_v34 = vpop.permute.xlu0 %2303 }
0x3ec4   :  { %v2306_v59 = vmul.f32 %v2304_v34, %v2298_v60 }
0x3ec6   :  { %2308 = vrot.lane.b32.xlu1 %v2306_v59, %s3148_s21 }
0x3f38   :  { %v2309_v51 = vpop.permute.xlu1 %2308 }
0x3f39   :  { %v2311_v27 = vadd.f32 %v2309_v51, %v2301_v12 }
0x3f3b   :  { %3027 = vtanh.f32 %v2311_v27  ;;  %v2321_v43 = vmul.f32 0.5, %v2311_v27 }
0x3f3d   :  { %v4382_v62 = vadd.f32 %v2322_v23, %v2321_v43 }
0x3f41   :  { %v3028_v17 = vpop.eup %3027 }
0x3f42   :  { %2314 = vrot.lane.b32.xlu2 %v3028_v17, %s3150_s14 }
0x3f9c   :  { %v2315_v24 = vpop.permute.xlu2 %2314 }
0x3f9d   :  { %v2317_v57 = vmul.f32 %v2315_v24, %v2298_v60  ;;  %v2179_v24 = vmul.f32 0.5, %v4314_v0 }
0x3f9f   :  { %v2318_v42 = vmul.f32 0.9, %v2317_v57  ;;  %v2180_v57 = vmul.f32 0.5, %v4311_v38 }
0x3fa1   :  { %v4368_v3 = vadd.f32 %v2319_v35, %v2318_v42  ;;  %v4403_v42 = vadd.f32 %v2180_v57, %v2179_v24 }
0x3fa3   :  { %2353 = vrot.lane.b32.xlu0 %v4368_v3, %s3150_s14  ;;  %v2418_v53 = vmul.f32 0.1, %v4368_v3 }
0x4015   :  { %v2354_v56 = vpop.permute.xlu0 %2353 }
0x4016   :  { %v2356_v4 = vsel %vm49_vm0, %v2784_v14, %v2354_v56 }
0x4017   :  { %2785 = vmatmul.msk.f32.vlgmr.msrb.gmra.mxu0 %vm115_vm1, %v2356_v4 }
0x4094   :  { %v2377_v55 = vpop.f32.mrf.mxu0 }
0x4095   :  { %v2378_v7 = vadd.f32 %v4182_v6, %v2377_v55 }
0x4097   :  { %3029 = vtanh.f32 %v2378_v7  ;;  %v2786_v40 = vmul.f32 -1.442695, %v2378_v7 }
0x4099   :  { %3031 = vpow2.f32 %v2786_v40 }
0x409d   :  { %v3030_v21 = vpop.eup %3029 }
0x409e   :  { %2402 = vrot.lane.b32.xlu1 %v3030_v21, %s3150_s14  ;;  %v2492_v21 = vmul.f32 0.1, %v4319_v39 }
0x409f   :  { %v3032_v20 = vpop.eup %3031 }
0x40a0   :  { %v2383_v48 = vadd.f32 1.0, %v3032_v20 }
0x40a2   :  { %3033 = vrcp.f32 %v2383_v48  ;;  %v2395_v16 = vand.u32 2147483648, %v2383_v48  ;;  %vm2389_vm3 = vweird.f32 %v2383_v48  ;;  %v2393_v54 = vand.u32 2147483647, %v2383_v48 }
0x40a4   :  { %v2396_v29 = vor.u32 1.1754944e-38, %v2395_v16  ;;  %vm2394_vm5 = vcmp.eq.f32.partialorder %v2393_v54, 8.507059e+37 }
0x40a8   :  { %v3034_v36 = vpop.eup %3033 }
0x40a9   :  { %v2385_v10 = vmul.f32 %v3034_v36, %v2383_v48  ;;  %vm2390_vm2 = vweird.f32 %v3034_v36 }
0x40aa   :  { %vm2391_vm4 = vmor %vm2389_vm3, %vm2390_vm2 }
0x40ab   :  { %v2386_v13 = vsub.f32 1.0, %v2385_v10 }
0x40ad   :  { %v2387_v30 = vmul.f32 %v3034_v36, %v2386_v13 }
0x40af   :  { %v2388_v28 = vadd.f32 %v3034_v36, %v2387_v30 }
0x40b1   :  { %v2392_v6 = vsel %vm2391_vm4, %v3034_v36, %v2388_v28  ;;  %vm2690_vm4 = vcmask 785408  }
0x40b2   :  { %v2397_v18 = vsel %vm2394_vm5, %v2396_v29, %v2392_v6 }
0x40b3   :  { %v2400_v5 = vmul.f32 %v2397_v18, %v4382_v62 }
0x4110   :  { %v2403_v45 = vpop.permute.xlu1 %2402 }
0x4111   :  { %v2405_v44 = vmul.f32 %v2403_v45, %v2397_v18 }
0x4113   :  { %2407 = vrot.lane.b32.xlu2 %v2405_v44, %s3148_s21 }
0x411b   :  { %2427 = vrot.lane.b32.xlu2 %v4319_v39, %s3150_s14 }
0x416d   :  { %v2408_v31 = vpop.permute.xlu2 %2407 }
0x416e   :  { %v4385_v46 = vadd.f32 %v2408_v31, %v2400_v5 }
0x4170   :  { %3035 = vtanh.f32 %v4385_v46 }
0x4175   :  { %v2428_v52 = vpop.permute.xlu2 %2427 }
0x4176   :  { %v3036_v49 = vpop.eup %3035 }
0x4177   :  { %2413 = vrot.lane.b32.xlu0 %v3036_v49, %s3150_s14  ;;  %v3117_v49 = vld [vmem:[%s4483_s10 + $0x18] sm:$0xff] }
0x41e9   :  { %v2414_v25 = vpop.permute.xlu0 %2413 }
0x41ea   :  { %v2416_v37 = vmul.f32 %v2414_v25, %v2397_v18  ;;  %v3118_v25 = vld [vmem:[%s4483_s10 + $0x10] sm:$0xff] }
0x41ec   :  { %v2417_v19 = vmul.f32 0.9, %v2416_v37  ;;  %v3119_v37 = vld [vmem:[%s4483_s10 + $0x8] sm:$0xff] }
0x41ee   :  { %v4390_v50 = vadd.f32 %v2418_v53, %v2417_v19  ;;  %v3120_v19 = vld [vmem:[%s4483_s10] sm:$0xff]  ;;  %v2420_v53 = vmul.f32 0.5, %v4385_v46 }
0x41f0   :  { %2424 = vrot.lane.b32.xlu1 %v4390_v50, %s3148_s21 }
0x4262   :  { %v2425_v22 = vpop.permute.xlu1 %2424 }
0x4263   :  { %v2430_v15 = vsel %vm49_vm0, %v2425_v22, %v2428_v52  ;;  %v2421_v52 = vmul.f32 0.5, %v4382_v62 }
0x4264   :  { %2787 = vmatmul.msk.f32.vlgmr.msrb.gmra.mxu1 %vm115_vm1, %v2430_v15 }
0x4265   :  { %v2422_v22 = vadd.f32 %v2421_v52, %v2420_v53 }
0x42e1   :  { %v2451_v8 = vpop.f32.mrf.mxu1 }
0x42e2   :  { %v2452_v26 = vadd.f32 %v4302_v47, %v2451_v8 }
0x42e4   :  { %3037 = vtanh.f32 %v2452_v26  ;;  %v2788_v33 = vmul.f32 -1.442695, %v2452_v26 }
0x42e6   :  { %3039 = vpow2.f32 %v2788_v33 }
0x42ea   :  { %v3038_v41 = vpop.eup %3037 }
0x42eb   :  { %2476 = vrot.lane.b32.xlu0 %v3038_v41, %s3150_s14 }
0x42ec   :  { %v3040_v1 = vpop.eup %3039 }
0x42ed   :  { %v2457_v2 = vadd.f32 1.0, %v3040_v1  ;;  %v4442_v1 = vld [vmem:[%s4484_s11] ss:$0 sm:$0xff] }
0x42ef   :  { %3041 = vrcp.f32 %v2457_v2  ;;  %v2469_v58 = vand.u32 2147483648, %v2457_v2  ;;  %vm2463_vm7 = vweird.f32 %v2457_v2  ;;  %v2467_v61 = vand.u32 2147483647, %v2457_v2 }
0x42f1   :  { %v2470_v12 = vor.u32 1.1754944e-38, %v2469_v58  ;;  %vm2468_vm9 = vcmp.eq.f32.partialorder %v2467_v61, 8.507059e+37 }
0x42f5   :  { %v3042_v32 = vpop.eup %3041 }
0x42f6   :  { %v2459_v34 = vmul.f32 %v3042_v32, %v2457_v2  ;;  %vm2464_vm6 = vweird.f32 %v3042_v32 }
0x42f7   :  { %vm2465_vm8 = vmor %vm2463_vm7, %vm2464_vm6 }
0x42f8   :  { %v2460_v60 = vsub.f32 1.0, %v2459_v34  ;;  %v2566_v34 = vmul.f32 0.1, %v4390_v50 }
0x42fa   :  { %v2461_v59 = vmul.f32 %v3042_v32, %v2460_v60 }
0x42fc   :  { %v2462_v11 = vadd.f32 %v3042_v32, %v2461_v59 }
0x42fe   :  { %v2466_v47 = vsel %vm2465_vm8, %v3042_v32, %v2462_v11 }
0x42ff   :  { %v2471_v27 = vsel %vm2468_vm9, %v2470_v12, %v2466_v47 }
0x4300   :  { %v2474_v35 = vmul.f32 %v2471_v27, %v4403_v42 }
0x435d   :  { %v2477_v51 = vpop.permute.xlu0 %2476 }
0x435e   :  { %v2479_v17 = vmul.f32 %v2477_v51, %v2471_v27 }
0x4360   :  { %2481 = vrot.lane.b32.xlu1 %v2479_v17, %s3148_s21 }
0x4368   :  { %2501 = vrot.lane.b32.xlu1 %v4390_v50, %s3150_s14 }
0x43d2   :  { %v2482_v14 = vpop.permute.xlu1 %2481 }
0x43d3   :  { %v4406_v56 = vadd.f32 %v2482_v14, %v2474_v35 }
0x43d5   :  { %3043 = vtanh.f32 %v4406_v56 }
0x43da   :  { %v2502_v38 = vpop.permute.xlu1 %2501 }
0x43db   :  { %v3044_v4 = vpop.eup %3043 }
0x43dc   :  { %2487 = vrot.lane.b32.xlu2 %v3044_v4, %s3150_s14 }
0x4436   :  { %v2488_v55 = vpop.permute.xlu2 %2487 }
0x4437   :  { %v2490_v7 = vmul.f32 %v2488_v55, %v2471_v27 }
0x4439   :  { %v2491_v40 = vmul.f32 0.9, %v2490_v7 }
0x443b   :  { %v4411_v0 = vadd.f32 %v2492_v21, %v2491_v40  ;;  %v2494_v40 = vmul.f32 0.5, %v4406_v56 }
0x443d   :  { %2498 = vrot.lane.b32.xlu0 %v4411_v0, %s3148_s21 }
0x44af   :  { %v2499_v20 = vpop.permute.xlu0 %2498 }
0x44b0   :  { %v2504_v48 = vsel %vm49_vm0, %v2499_v20, %v2502_v38  ;;  %2673 = vst.msk [vmem:[#allocation4] sm:$0xff] %vm49_vm0, %v2499_v20  ;;  %v2495_v38 = vmul.f32 0.5, %v4403_v42 }
0x44b1   :  { %2789 = vmatmul.msk.f32.vlgmr.msrb.gmra.mxu2 %vm115_vm1, %v2504_v48 }
0x44b2   :  { %v2496_v20 = vadd.f32 %v2495_v38, %v2494_v40 }
0x4534   :  { %v2525_v36 = vpop.f32.mrf.mxu2 }
0x4535   :  { %v2526_v10 = vadd.f32 %v4328_v9, %v2525_v36  ;;  %v2569_v36 = vmul.f32 0.5, %v2422_v22 }
0x4537   :  { %3045 = vtanh.f32 %v2526_v10  ;;  %v2790_v39 = vmul.f32 -1.442695, %v2526_v10 }
0x4539   :  { %3047 = vpow2.f32 %v2790_v39 }
0x453d   :  { %v3046_v13 = vpop.eup %3045 }
0x453e   :  { %2550 = vrot.lane.b32.xlu2 %v3046_v13, %s3150_s14 }
0x453f   :  { %v3048_v30 = vpop.eup %3047 }
0x4540   :  { %v2531_v28 = vadd.f32 1.0, %v3048_v30 }
0x4542   :  { %3049 = vrcp.f32 %v2531_v28  ;;  %v2543_v18 = vand.u32 2147483648, %v2531_v28  ;;  %vm2537_vm11 = vweird.f32 %v2531_v28  ;;  %v2541_v9 = vand.u32 2147483647, %v2531_v28 }
0x4544   :  { %v2544_v43 = vor.u32 1.1754944e-38, %v2543_v18  ;;  %vm2542_vm13 = vcmp.eq.f32.partialorder %v2541_v9, 8.507059e+37 }
0x4546   :  { %2325 = vrot.lane.b32.xlu2 %v4368_v3, %s3148_s21 }
0x4548   :  { %v3050_v16 = vpop.eup %3049 }
0x4549   :  { %v2533_v54 = vmul.f32 %v3050_v16, %v2531_v28  ;;  %vm2538_vm10 = vweird.f32 %v3050_v16 }
0x454a   :  { %vm2539_vm12 = vmor %vm2537_vm11, %vm2538_vm10 }
0x454b   :  { %v2534_v6 = vsub.f32 1.0, %v2533_v54 }
0x454d   :  { %v2535_v29 = vmul.f32 %v3050_v16, %v2534_v6 }
0x454f   :  { %v2536_v45 = vadd.f32 %v3050_v16, %v2535_v29 }
0x4551   :  { %v2540_v44 = vsel %vm2539_vm12, %v3050_v16, %v2536_v45 }
0x4552   :  { %v2545_v3 = vsel %vm2542_vm13, %v2544_v43, %v2540_v44 }
0x4553   :  { %v2548_v15 = vmul.f32 %v2545_v3, %v2422_v22 }
0x4598   :  { %v2551_v23 = vpop.permute.xlu2 %2550 }
0x4599   :  { %v2553_v5 = vmul.f32 %v2551_v23, %v2545_v3 }
0x459b   :  { %2555 = vrot.lane.b32.xlu0 %v2553_v5, %s3148_s21 }
0x45a0   :  { %v2326_v31 = vpop.permute.xlu2 %2325 }
0x45a1   :  { %2783 = vmatmul.msk.f32.vlgmr.msrb.gmra.mxu3 %vm49_vm0, %v2326_v31 }
0x45a2   :  { %2656 = vmatpush.msrb.mxu3 %v3117_v49 }
0x45a4   :  { %2657 = vmatpush.msrb.mxu3 %v3118_v25 }
0x45a6   :  { %2658 = vmatpush.msrb.mxu3 %v3119_v37 }
0x45a8   :  { %2659 = vmatpush.msrb.mxu3 %v3120_v19 }
0x460d   :  { %v2556_v8 = vpop.permute.xlu0 %2555 }
0x460e   :  { %v2558_v26 = vadd.f32 %v2556_v8, %v2548_v15 }
0x4610   :  { %3051 = vtanh.f32 %v2558_v26  ;;  %v2568_v48 = vmul.f32 0.5, %v2558_v26 }
0x4612   :  { %v2570_v10 = vadd.f32 %v2569_v36, %v2568_v48 }
0x4614   :  { %v2637_v18 = vmul.f32 0.5, %v2570_v10 }
0x4616   :  { %v3052_v41 = vpop.eup %3051 }
0x4617   :  { %2561 = vrot.lane.b32.xlu1 %v3052_v41, %s3150_s14 }
0x4624   :  { %v2346_v33 = vpop.f32.mrf.mxu3 }
0x4625   :  { %v2347_v2 = vadd.f32 %v4442_v1, %v2346_v33 }
0x4627   :  { %2350 = vst [vmem:[#allocation6 + $0x30] sm:$0xff] %v2347_v2 }
0x4689   :  { %v2562_v46 = vpop.permute.xlu1 %2561 }
0x468a   :  { %v2564_v32 = vmul.f32 %v2562_v46, %v2545_v3 }
0x468c   :  { %v2565_v62 = vmul.f32 0.9, %v2564_v32 }
0x468e   :  { %v2567_v60 = vadd.f32 %v2566_v34, %v2565_v62 }
0x4690   :  { %2572 = vrot.lane.b32.xlu0 %v2567_v60, %s3148_s21  ;;  %v2634_v6 = vmul.f32 0.1, %v2567_v60 }
0x4702   :  { %v2573_v59 = vpop.permute.xlu0 %2572 }
0x4703   :  { %2791 = vmatmul.msk.f32.vlgmr.msra.gmra.mxu3 %vm49_vm0, %v2573_v59 }
0x4786   :  { %v2593_v11 = vpop.f32.mrf.mxu3 }
0x4787   :  { %v2594_v58 = vadd.f32 %v4362_v63, %v2593_v11 }
0x4789   :  { %3053 = vtanh.f32 %v2594_v58  ;;  %v2792_v47 = vmul.f32 -1.442695, %v2594_v58 }
0x478b   :  { %3055 = vpow2.f32 %v2792_v47 }
0x478f   :  { %v3054_v61 = vpop.eup %3053 }
0x4790   :  { %2618 = vrot.lane.b32.xlu1 %v3054_v61, %s3150_s14 }
0x4791   :  { %v3056_v12 = vpop.eup %3055 }
0x4792   :  { %v2599_v51 = vadd.f32 1.0, %v3056_v12 }
0x4794   :  { %3057 = vrcp.f32 %v2599_v51  ;;  %v2611_v35 = vand.u32 2147483648, %v2599_v51  ;;  %vm2605_vm15 = vweird.f32 %v2599_v51  ;;  %v2609_v14 = vand.u32 2147483647, %v2599_v51 }
0x4796   :  { %v2612_v4 = vor.u32 1.1754944e-38, %v2611_v35  ;;  %vm2610_vm3 = vcmp.eq.f32.partialorder %v2609_v14, 8.507059e+37 }
0x479a   :  { %v3058_v27 = vpop.eup %3057 }
0x479b   :  { %v2601_v50 = vmul.f32 %v3058_v27, %v2599_v51  ;;  %vm2606_vm14 = vweird.f32 %v3058_v27 }
0x479c   :  { %vm2607_vm2 = vmor %vm2605_vm15, %vm2606_vm14 }
0x479d   :  { %v2602_v17 = vsub.f32 1.0, %v2601_v50 }
0x479f   :  { %v2603_v24 = vmul.f32 %v3058_v27, %v2602_v17 }
0x47a1   :  { %v2604_v57 = vadd.f32 %v3058_v27, %v2603_v24 }
0x47a3   :  { %v2608_v63 = vsel %vm2607_vm2, %v3058_v27, %v2604_v57 }
0x47a4   :  { %v2613_v7 = vsel %vm2610_vm3, %v2612_v4, %v2608_v63 }
0x47a5   :  { %v2616_v13 = vmul.f32 %v2613_v7, %v2570_v10 }
0x4802   :  { %v2619_v55 = vpop.permute.xlu1 %2618 }
0x4803   :  { %v2621_v21 = vmul.f32 %v2619_v55, %v2613_v7 }
0x4805   :  { %2623 = vrot.lane.b32.xlu2 %v2621_v21, %s3148_s21 }
0x480d   :  { %2682 = vrot.lane.b32.xlu2 %v4411_v0, %s3149_s24 }
0x4815   :  { %2675 = vrot.lane.b32.xlu2 %v2496_v20, %s3149_s24 }
0x485f   :  { %v2624_v39 = vpop.permute.xlu2 %2623 }
0x4860   :  { %v2626_v30 = vadd.f32 %v2624_v39, %v2616_v13 }
0x4862   :  { %3059 = vtanh.f32 %v2626_v30  ;;  %v2636_v45 = vmul.f32 0.5, %v2626_v30 }
0x4864   :  { %v2638_v9 = vadd.f32 %v2637_v18, %v2636_v45 }
0x4867   :  { %v2683_v28 = vpop.permute.xlu2 %2682 }
0x4868   :  { %v3060_v16 = vpop.eup %3059 }
0x4869   :  { %2629 = vrot.lane.b32.xlu0 %v3060_v16, %s3150_s14 }
0x486f   :  { %v2676_v54 = vpop.permute.xlu2 %2675 }
0x4870   :  { %2678 = vst.msk [vmem:[#allocation5] sm:$0xff] %vm49_vm0, %v2676_v54 }
0x4871   :  { %2685 = vrot.lane.b32.xlu0 %v2496_v20, %s3150_s14 }
0x48db   :  { %v2630_v42 = vpop.permute.xlu0 %2629 }
0x48dc   :  { %v2632_v56 = vmul.f32 %v2630_v42, %v2613_v7 }
0x48de   :  { %v2633_v0 = vmul.f32 0.9, %v2632_v56 }
0x48e0   :  { %v2635_v29 = vadd.f32 %v2634_v6, %v2633_v0 }
0x48e2   :  { %2640 = vrot.lane.b32.xlu1 %v2635_v29, %s3148_s21  ;;  %s3151_s21 = smov [#allocation6]  }
0x48e3   :  { %v2686_v23 = vpop.permute.xlu0 %2685 }
0x48ea   :  { %2669 = vrot.lane.b32.xlu1 %v2638_v9, %s3149_s24  ;;  %s2697_s24 = sshll.u32 %s3151_s21, 4  ;;  %s2698_s24 = int_to_ptr.vmem [resolvable:$true] %s2697_s24 }
0x4954   :  { %v2641_v44 = vpop.permute.xlu1 %2640 }
0x4955   :  { %2667 = vst.msk [vmem:[#allocation2] sm:$0xff] %vm49_vm0, %v2641_v44  ;;  %v2688_v43 = vsel %vm49_vm0, %v2641_v44, %v2638_v9  ;;  %2793 = vmatmul.msk.f32.vlgmr.msrb.gmra.mxu3 %vm49_vm0, %v2641_v44 }
0x4956   :  { %v2689_v3 = vsel %vm115_vm1, %v2688_v43, %v2683_v28 }
0x4957   :  { %v2691_v5 = vsel %vm2690_vm4, %v2689_v3, %v2686_v23 }
0x4958   :  { %2692 = vst [vmem:[%s4486_s13] sm:$0xff] %v2691_v5 }
0x495c   :  { %v2670_v31 = vpop.permute.xlu1 %2669 }
0x495d   :  { %2672 = vst.msk [vmem:[#allocation3] sm:$0xff] %vm49_vm0, %v2670_v31 }
0x49d8   :  { %v2661_v49 = vpop.f32.mrf.mxu3 }
0x49d9   :  { %v2662_v25 = vadd.f32 %v4442_v1, %v2661_v49 }
0x49db   :  { %2665 = vst [vmem:[#allocation6 + $0x38] sm:$0xff] %v2662_v25 }
0x49dc   :  { %2705 = dma.vmem_to_hbm [thread:$0]  %s2698_s24, 1024, %s2700_s27, [#allocation7], %s3152_s7, %s3152_s7, %s3153_s28  }
0x49dd   :  { %3146 = dma.done.wait [#allocation7], 1024  }
0x49de   :  { %3147 = vsyncadd [#allocation7], 4294966272 }
0x49df   :  { %2714 = vsyncpa [#allocation7], 1 }

</bundles_post_ra>
